<compile_context>
chip_gen: v7x
topology: tpu7x:2x2x1
jax: 0.10.0
libtpu: 0.0.40
codegen_flags: <defaults>
</compile_context>

<pallas_src>
import math
from functools import partial

import jax
import jax.numpy as jnp
from jax import lax
from jax.experimental import pallas as pl
from jax.experimental.pallas import tpu as pltpu

LN_EPS = 1e-5          # torch.nn.LayerNorm default
NEG_BIG = -1e30        # "masked" additive bias (finite -> softmax can't NaN)

LAYER_PARAM_ORDER = (
    "ln1_g", "ln1_b", "wqkv1", "bqkv1", "wo1", "bo1",
    "ln2_g", "ln2_b", "wq2", "bq2", "wkv2", "bkv2", "wo2", "bo2",
    "ln3_g", "ln3_b", "w1", "b1", "w2", "b2",
)
PARAMS_PER_LAYER = len(LAYER_PARAM_ORDER)


# ----------------------------- in-kernel helpers -----------------------------

def _layer_norm(x_f32, g_ref, b_ref):
    """LayerNorm over the last dim; statistics and affine in f32."""
    g = g_ref[...].astype(jnp.float32)
    b = b_ref[...].astype(jnp.float32)
    mu = jnp.mean(x_f32, axis=-1, keepdims=True)
    var = jnp.mean((x_f32 - mu) ** 2, axis=-1, keepdims=True)
    return (x_f32 - mu) * lax.rsqrt(var + LN_EPS) * g + b


def _linear(x_f32, w_ref, b_ref):
    """x @ W + b with bf16 MXU operands (weights stored bf16), f32 accumulation."""
    return (jnp.dot(x_f32.astype(jnp.bfloat16), w_ref[...],
                    preferred_element_type=jnp.float32)
            + b_ref[...].astype(jnp.float32))


def _erf(x):
    """Abramowitz & Stegun 7.1.26 erf approximation (|err| < 1.5e-7), f32.

    Built only from ops with guaranteed Mosaic lowerings (abs, exp, div, where).
    """
    a1, a2, a3, a4, a5 = 0.254829592, -0.284496736, 1.421413741, -1.453152027, 1.061405429
    p = 0.3275911
    ax = jnp.abs(x)
    t = 1.0 / (1.0 + p * ax)
    poly = ((((a5 * t + a4) * t + a3) * t + a2) * t + a1) * t
    y = 1.0 - poly * jnp.exp(-ax * ax)
    return jnp.where(x >= 0.0, y, -y)


def _gelu(x):
    return 0.5 * x * (1.0 + _erf(x * (1.0 / math.sqrt(2.0))))


def _split_heads(x2d, heads, dh):
    """(rows, H*Dh) -> (H, rows, Dh) via static lane slices stacked on a new
    leading batch axis (avoids generic 3-D transposes)."""
    return jnp.concatenate(
        [x2d[:, h * dh:(h + 1) * dh][None] for h in range(heads)], axis=0)


def _mha(q, k, v, bias, heads):
    """Head-batched multi-head attention on folded-batch rows.

    q: (Rq, D), k/v: (Rk, D) f32.  bias: (Rq, Rk) f32 additive (block-diagonal
    over batch, plus causal / key-padding terms).  Heads are processed with ONE
    batched QK^T einsum, ONE softmax and ONE batched PV einsum.
    """
    d = q.shape[-1]
    dh = d // heads
    scale = 1.0 / math.sqrt(dh)

    q3 = _split_heads(q * scale, heads, dh).astype(jnp.bfloat16)   # (H, Rq, Dh)
    k3 = _split_heads(k, heads, dh).astype(jnp.bfloat16)           # (H, Rk, Dh)
    v3 = _split_heads(v, heads, dh).astype(jnp.bfloat16)           # (H, Rk, Dh)

    s = jnp.einsum('hqd,hkd->hqk', q3, k3,
                   preferred_element_type=jnp.float32)             # (H, Rq, Rk)
    s = s + bias[None, :, :]
    m = jnp.max(s, axis=-1, keepdims=True)
    p = jnp.exp(s - m)
    l = jnp.sum(p, axis=-1, keepdims=True)
    o = jnp.einsum('hqk,hkd->hqd', p.astype(jnp.bfloat16), v3,
                   preferred_element_type=jnp.float32)             # (H, Rq, Dh)
    o = o * pl.reciprocal(l, approx=True)
    # merge heads back into a lane-contiguous (Rq, D) slab
    return jnp.concatenate([o[h] for h in range(heads)], axis=-1)


# ------------------------- fully fused decoder kernel -------------------------

def _decoder_kernel(heads, n_layers, *refs):
    # refs layout: x, enc, self_bias, cross_bias,
    #              20 params per layer * n_layers, norm_g, norm_b, o_ref
    x_ref, enc_ref, sb_ref, cb_ref = refs[:4]
    o_ref = refs[-1]
    params = refs[4:-1]

    d = x_ref.shape[-1]
    x = x_ref[...].astype(jnp.float32)          # (B*S, D)
    enc = enc_ref[...].astype(jnp.float32)      # (B*S_src, D)
    self_bias = sb_ref[...]                     # (B*S, B*S)
    cross_bias = cb_ref[...]                    # (B*S, B*S_src)

    for i in range(n_layers):                   # static unroll over layers
        (ln1_g, ln1_b, wqkv1, bqkv1, wo1, bo1,
         ln2_g, ln2_b, wq2, bq2, wkv2, bkv2, wo2, bo2,
         ln3_g, ln3_b, w1, b1, w2, b2) = params[i * PARAMS_PER_LAYER:
                                                (i + 1) * PARAMS_PER_LAYER]

        # -- LN1 -> fused QKV -> masked self-attention -> out-proj -> +residual
        x2 = _layer_norm(x, ln1_g, ln1_b)
        qkv = _linear(x2, wqkv1, bqkv1)                       # (B*S, 3D), one matmul
        a = _mha(qkv[:, :d], qkv[:, d:2 * d], qkv[:, 2 * d:], self_bias, heads)
        x = x + _linear(a, wo1, bo1)

        # -- LN2 -> Q proj / fused KV proj (encoder) -> cross-attn -> out-proj -> +residual
        x2 = _layer_norm(x, ln2_g, ln2_b)
        q = _linear(x2, wq2, bq2)
        kv = _linear(enc, wkv2, bkv2)                         # (B*S_src, 2D), one matmul
        a = _mha(q, kv[:, :d], kv[:, d:], cross_bias, heads)
        x = x + _linear(a, wo2, bo2)

        # -- LN3 -> FFN (Linear -> GELU -> Linear) -> +residual
        x2 = _layer_norm(x, ln3_g, ln3_b)
        h = _gelu(_linear(x2, w1, b1))
        x = x + _linear(h, w2, b2)

    # fused final LayerNorm
    norm_g, norm_b = params[-2], params[-1]
    o_ref[...] = _layer_norm(x, norm_g, norm_b).astype(o_ref.dtype)


def _pick_vmem_limit():
    """Per-generation VMEM budget: ~3/4 of physical capacity, capped."""
    try:
        cap = getattr(pltpu.get_tpu_info(), "vmem_capacity_bytes", None)
        if cap:
            return int(min(cap * 3 // 4, 100 * 1024 * 1024))
    except Exception:
        pass
    return 32 * 1024 * 1024


# --------------------------------- forward -----------------------------------

def decoder_forward(params, trg, e_outputs, src_mask, trg_mask, trg_attn_mask, heads):
    B, S = trg.shape
    S_src = e_outputs.shape[1]
    D = params["embed"].shape[1]
    assert S <= params["pe"].shape[0], "sequence longer than positional-encoding table"

    # JAX glue: embedding gather * sqrt(D) + positional encoding (dropout = identity)
    x = jnp.take(params["embed"], trg, axis=0) * math.sqrt(D)
    x = x + params["pe"][:S][None, :, :]

    # Fold batch into the matmul rows.
    x2d = x.reshape(B * S, D).astype(jnp.float32)
    enc2d = e_outputs.reshape(B * S_src, D).astype(jnp.float32)

    # Block-diagonal additive attention biases over the folded-row layout.
    # Tiny at these shapes ((B*S)^2 f32, ~1 KiB); for large B*S switch to a
    # per-batch loop inside the kernel instead.
    bq = jnp.arange(B)
    same_batch = bq[:, None, None, None] == bq[None, None, :, None]     # (B,1,B,1)
    trg_kp = jnp.where(trg_mask, NEG_BIG, 0.0).astype(jnp.float32)      # (B, S)
    src_kp = jnp.where(src_mask, NEG_BIG, 0.0).astype(jnp.float32)      # (B, S_src)
    causal = trg_attn_mask.astype(jnp.float32)                          # (S, S)

    self_bias = jnp.where(
        same_batch,
        causal[None, :, None, :] + trg_kp[None, None, :, :],
        NEG_BIG).reshape(B * S, B * S).astype(jnp.float32)
    cross_bias = jnp.broadcast_to(
        jnp.where(same_batch, src_kp[None, None, :, :], NEG_BIG),
        (B, S, B, S_src)).reshape(B * S, B * S_src).astype(jnp.float32)

    flat_params = []
    for lp in params["layers"]:
        flat_params += [lp[k] for k in LAYER_PARAM_ORDER]
    n_layers = len(params["layers"])

    out2d = pl.pallas_call(
        partial(_decoder_kernel, heads, n_layers),
        out_shape=jax.ShapeDtypeStruct((B * S, D), jnp.float32),
        compiler_params=pltpu.CompilerParams(
            vmem_limit_bytes=_pick_vmem_limit()),
    )(x2d, enc2d, self_bias, cross_bias, *flat_params,
      params["norm_g"], params["norm_b"])

    return out2d.reshape(B, S, D)


# ------------------------------ parameter init --------------------------------

def make_positional_encoding(d_model, max_len=64):
    position = jnp.arange(max_len, dtype=jnp.float32)[:, None]
    div_term = jnp.exp(jnp.arange(0, d_model, 2, dtype=jnp.float32)
                       * (-math.log(10000.0) / d_model))
    pe = jnp.zeros((max_len, d_model), jnp.float32)
    pe = pe.at[:, 0::2].set(jnp.sin(position * div_term))
    pe = pe.at[:, 1::2].set(jnp.cos(position * div_term))
    return pe


def init_decoder_params(key, vocab_size, d_model, d_ff, N):
    k_emb, k_a1, k_a2, k_f1, k_f2 = jax.random.split(key, 5)
    ka = jax.random.split(k_a1, 2)
    kb = jax.random.split(k_a2, 3)
    scale = 0.05

    def w(k, shape):  # matmul weights stored (in, out) and bf16 for the MXU
        return (scale * jax.random.normal(k, shape, jnp.float32)).astype(jnp.bfloat16)

    layer = {
        "ln1_g": jnp.ones((1, d_model), jnp.float32),
        "ln1_b": jnp.zeros((1, d_model), jnp.float32),
        "ln2_g": jnp.ones((1, d_model), jnp.float32),
        "ln2_b": jnp.zeros((1, d_model), jnp.float32),
        "ln3_g": jnp.ones((1, d_model), jnp.float32),
        "ln3_b": jnp.zeros((1, d_model), jnp.float32),
        # self-attention: fused QKV projection (one matmul instead of three)
        "wqkv1": w(ka[0], (d_model, 3 * d_model)),
        "bqkv1": jnp.zeros((1, 3 * d_model), jnp.float32),
        "wo1": w(ka[1], (d_model, d_model)),
        "bo1": jnp.zeros((1, d_model), jnp.float32),
        # cross-attention: Q on the decoder stream, fused KV on the encoder stream
        "wq2": w(kb[0], (d_model, d_model)),
        "bq2": jnp.zeros((1, d_model), jnp.float32),
        "wkv2": w(kb[1], (d_model, 2 * d_model)),
        "bkv2": jnp.zeros((1, 2 * d_model), jnp.float32),
        "wo2": w(kb[2], (d_model, d_model)),
        "bo2": jnp.zeros((1, d_model), jnp.float32),
        # FFN
        "w1": w(k_f1, (d_model, d_ff)),
        "b1": jnp.zeros((1, d_ff), jnp.float32),
        "w2": w(k_f2, (d_ff, d_model)),
        "b2": jnp.zeros((1, d_model), jnp.float32),
    }
    # get_clones deep-copies one initialized layer -> all N layers share init values
    layers = [dict(layer) for _ in range(N)]
    return {
        "embed": 0.1 * jax.random.normal(k_emb, (vocab_size, d_model), jnp.float32),
        "pe": make_positional_encoding(d_model),
        "layers": layers,
        "norm_g": jnp.ones((1, d_model), jnp.float32),
        "norm_b": jnp.zeros((1, d_model), jnp.float32),
    }


# ----------------------------------- main -------------------------------------

if __name__ == "__main__":
    vocab_size, d_model, d_ff, N, heads, dropout = 50, 32, 64, 2, 4, 0.1
    B, S_trg, S_src = 2, 8, 8

    key = jax.random.PRNGKey(0)
    k_params, k_trg, k_enc = jax.random.split(key, 3)

    params = init_decoder_params(k_params, vocab_size, d_model, d_ff, N)

    trg = jax.random.randint(k_trg, (B, S_trg), 0, vocab_size, dtype=jnp.int32)
    e_outputs = jax.random.normal(k_enc, (B, S_src, d_model), jnp.float32)

    # key_padding masks (bool, True = ignore); keep at least one valid key per row
    trg_mask = jnp.zeros((B, S_trg), dtype=bool)
    src_mask = jnp.zeros((B, S_src), dtype=bool).at[1, S_src - 1].set(True)
    # causal additive attn mask; large finite negative instead of -inf so a fully
    # masked row can never turn the softmax into NaN
    trg_attn_mask = jnp.where(
        jnp.triu(jnp.ones((S_trg, S_trg), bool), k=1), -1e9, 0.0
    ).astype(jnp.float32)

    fwd = jax.jit(lambda p, t, e, sm, tm, am: decoder_forward(p, t, e, sm, tm, am, heads))
    out = jax.block_until_ready(
        fwd(params, trg, e_outputs, src_mask, trg_mask, trg_attn_mask))

    assert out.shape == (B, S_trg, d_model)
    assert bool(jnp.all(jnp.isfinite(out)))
    print("KERNEL_OK")
</pallas_src>

<mosaic_0001>
module attributes {stable_mosaic.version = 11 : i64} {
  func.func @_decoder_kernel(%arg0: memref<16x32xf32, #tpu.memory_space<vmem>>, %arg1: memref<16x32xf32, #tpu.memory_space<vmem>>, %arg2: memref<16x16xf32, #tpu.memory_space<vmem>>, %arg3: memref<16x16xf32, #tpu.memory_space<vmem>>, %arg4: memref<1x32xf32, #tpu.memory_space<vmem>>, %arg5: memref<1x32xf32, #tpu.memory_space<vmem>>, %arg6: memref<32x96xbf16, #tpu.memory_space<vmem>>, %arg7: memref<1x96xf32, #tpu.memory_space<vmem>>, %arg8: memref<32x32xbf16, #tpu.memory_space<vmem>>, %arg9: memref<1x32xf32, #tpu.memory_space<vmem>>, %arg10: memref<1x32xf32, #tpu.memory_space<vmem>>, %arg11: memref<1x32xf32, #tpu.memory_space<vmem>>, %arg12: memref<32x32xbf16, #tpu.memory_space<vmem>>, %arg13: memref<1x32xf32, #tpu.memory_space<vmem>>, %arg14: memref<32x64xbf16, #tpu.memory_space<vmem>>, %arg15: memref<1x64xf32, #tpu.memory_space<vmem>>, %arg16: memref<32x32xbf16, #tpu.memory_space<vmem>>, %arg17: memref<1x32xf32, #tpu.memory_space<vmem>>, %arg18: memref<1x32xf32, #tpu.memory_space<vmem>>, %arg19: memref<1x32xf32, #tpu.memory_space<vmem>>, %arg20: memref<32x64xbf16, #tpu.memory_space<vmem>>, %arg21: memref<1x64xf32, #tpu.memory_space<vmem>>, %arg22: memref<64x32xbf16, #tpu.memory_space<vmem>>, %arg23: memref<1x32xf32, #tpu.memory_space<vmem>>, %arg24: memref<1x32xf32, #tpu.memory_space<vmem>>, %arg25: memref<1x32xf32, #tpu.memory_space<vmem>>, %arg26: memref<32x96xbf16, #tpu.memory_space<vmem>>, %arg27: memref<1x96xf32, #tpu.memory_space<vmem>>, %arg28: memref<32x32xbf16, #tpu.memory_space<vmem>>, %arg29: memref<1x32xf32, #tpu.memory_space<vmem>>, %arg30: memref<1x32xf32, #tpu.memory_space<vmem>>, %arg31: memref<1x32xf32, #tpu.memory_space<vmem>>, %arg32: memref<32x32xbf16, #tpu.memory_space<vmem>>, %arg33: memref<1x32xf32, #tpu.memory_space<vmem>>, %arg34: memref<32x64xbf16, #tpu.memory_space<vmem>>, %arg35: memref<1x64xf32, #tpu.memory_space<vmem>>, %arg36: memref<32x32xbf16, #tpu.memory_space<vmem>>, %arg37: memref<1x32xf32, #tpu.memory_space<vmem>>, %arg38: memref<1x32xf32, #tpu.memory_space<vmem>>, %arg39: memref<1x32xf32, #tpu.memory_space<vmem>>, %arg40: memref<32x64xbf16, #tpu.memory_space<vmem>>, %arg41: memref<1x64xf32, #tpu.memory_space<vmem>>, %arg42: memref<64x32xbf16, #tpu.memory_space<vmem>>, %arg43: memref<1x32xf32, #tpu.memory_space<vmem>>, %arg44: memref<1x32xf32, #tpu.memory_space<vmem>>, %arg45: memref<1x32xf32, #tpu.memory_space<vmem>>, %arg46: memref<16x32xf32, #tpu.memory_space<vmem>>) attributes {dimension_semantics = [], scalar_prefetch = 0 : i64, scratch_operands = 0 : i64, tpu.core_type = #tpu.core_type<tc>} {
    %c0 = arith.constant 0 : index
    %c0_0 = arith.constant 0 : index
    %0 = vector.load %arg0[%c0, %c0_0] : memref<16x32xf32, #tpu.memory_space<vmem>>, vector<16x32xf32>
    %c0_1 = arith.constant 0 : index
    %c0_2 = arith.constant 0 : index
    %1 = vector.load %arg1[%c0_1, %c0_2] : memref<16x32xf32, #tpu.memory_space<vmem>>, vector<16x32xf32>
    %c0_3 = arith.constant 0 : index
    %c0_4 = arith.constant 0 : index
    %2 = vector.load %arg2[%c0_3, %c0_4] : memref<16x16xf32, #tpu.memory_space<vmem>>, vector<16x16xf32>
    %c0_5 = arith.constant 0 : index
    %c0_6 = arith.constant 0 : index
    %3 = vector.load %arg3[%c0_5, %c0_6] : memref<16x16xf32, #tpu.memory_space<vmem>>, vector<16x16xf32>
    %c0_7 = arith.constant 0 : index
    %c0_8 = arith.constant 0 : index
    %4 = vector.load %arg4[%c0_7, %c0_8] : memref<1x32xf32, #tpu.memory_space<vmem>>, vector<1x32xf32>
    %c0_9 = arith.constant 0 : index
    %c0_10 = arith.constant 0 : index
    %5 = vector.load %arg5[%c0_9, %c0_10] : memref<1x32xf32, #tpu.memory_space<vmem>>, vector<1x32xf32>
    %cst = arith.constant dense<0.000000e+00> : vector<16xf32>
    %6 = vector.multi_reduction <add>, %0, %cst [1] : vector<16x32xf32> to vector<16xf32>
    %7 = vector.shape_cast %6 : vector<16xf32> to vector<16x1xf32>
    %cst_11 = arith.constant 3.200000e+01 : f32
    %8 = vector.broadcast %cst_11 : f32 to vector<16x1xf32>
    %9 = arith.divf %7, %8 : vector<16x1xf32>
    %10 = vector.broadcast %9 : vector<16x1xf32> to vector<16x32xf32>
    %11 = arith.subf %0, %10 : vector<16x32xf32>
    %12 = arith.mulf %11, %11 : vector<16x32xf32>
    %cst_12 = arith.constant dense<0.000000e+00> : vector<16xf32>
    %13 = vector.multi_reduction <add>, %12, %cst_12 [1] : vector<16x32xf32> to vector<16xf32>
    %14 = vector.shape_cast %13 : vector<16xf32> to vector<16x1xf32>
    %cst_13 = arith.constant 3.200000e+01 : f32
    %15 = vector.broadcast %cst_13 : f32 to vector<16x1xf32>
    %16 = arith.divf %14, %15 : vector<16x1xf32>
    %17 = vector.broadcast %9 : vector<16x1xf32> to vector<16x32xf32>
    %18 = arith.subf %0, %17 : vector<16x32xf32>
    %cst_14 = arith.constant 9.99999974E-6 : f32
    %19 = vector.broadcast %cst_14 : f32 to vector<16x1xf32>
    %20 = arith.addf %16, %19 : vector<16x1xf32>
    %21 = math.rsqrt %20 : vector<16x1xf32>
    %22 = vector.broadcast %21 : vector<16x1xf32> to vector<16x32xf32>
    %23 = arith.mulf %18, %22 : vector<16x32xf32>
    %24 = vector.broadcast %4 : vector<1x32xf32> to vector<16x32xf32>
    %25 = arith.mulf %23, %24 : vector<16x32xf32>
    %26 = vector.broadcast %5 : vector<1x32xf32> to vector<16x32xf32>
    %27 = arith.addf %25, %26 : vector<16x32xf32>
    %28 = arith.truncf %27 : vector<16x32xf32> to vector<16x32xbf16>
    %c0_15 = arith.constant 0 : index
    %c0_16 = arith.constant 0 : index
    %29 = vector.load %arg6[%c0_15, %c0_16] : memref<32x96xbf16, #tpu.memory_space<vmem>>, vector<32x96xbf16>
    %cst_17 = arith.constant dense<0.000000e+00> : vector<16x96xf32>
    %30 = tpu.matmul %28, %29, %cst_17 {dimension_numbers = #tpu.dot_dimension_numbers<[1], [0], [0], [1], [0, 0, 1, 1], [], []>} : vector<16x32xbf16>, vector<32x96xbf16>, vector<16x96xf32> -> vector<16x96xf32>
    %c0_18 = arith.constant 0 : index
    %c0_19 = arith.constant 0 : index
    %31 = vector.load %arg7[%c0_18, %c0_19] : memref<1x96xf32, #tpu.memory_space<vmem>>, vector<1x96xf32>
    %32 = vector.broadcast %31 : vector<1x96xf32> to vector<16x96xf32>
    %33 = arith.addf %30, %32 : vector<16x96xf32>
    %34 = vector.extract_strided_slice %33 {offsets = [0, 0], sizes = [16, 32], strides = [1, 1]} : vector<16x96xf32> to vector<16x32xf32>
    %35 = vector.extract_strided_slice %33 {offsets = [0, 32], sizes = [16, 32], strides = [1, 1]} : vector<16x96xf32> to vector<16x32xf32>
    %36 = vector.extract_strided_slice %33 {offsets = [0, 64], sizes = [16, 32], strides = [1, 1]} : vector<16x96xf32> to vector<16x32xf32>
    %cst_20 = arith.constant 0.353553385 : f32
    %37 = vector.broadcast %cst_20 : f32 to vector<16x32xf32>
    %38 = arith.mulf %34, %37 : vector<16x32xf32>
    %39 = vector.extract_strided_slice %38 {offsets = [0, 0], sizes = [16, 8], strides = [1, 1]} : vector<16x32xf32> to vector<16x8xf32>
    %40 = vector.shape_cast %39 : vector<16x8xf32> to vector<1x16x8xf32>
    %41 = vector.extract_strided_slice %38 {offsets = [0, 8], sizes = [16, 8], strides = [1, 1]} : vector<16x32xf32> to vector<16x8xf32>
    %42 = vector.shape_cast %41 : vector<16x8xf32> to vector<1x16x8xf32>
    %43 = vector.extract_strided_slice %38 {offsets = [0, 16], sizes = [16, 8], strides = [1, 1]} : vector<16x32xf32> to vector<16x8xf32>
    %44 = vector.shape_cast %43 : vector<16x8xf32> to vector<1x16x8xf32>
    %45 = vector.extract_strided_slice %38 {offsets = [0, 24], sizes = [16, 8], strides = [1, 1]} : vector<16x32xf32> to vector<16x8xf32>
    %46 = vector.shape_cast %45 : vector<16x8xf32> to vector<1x16x8xf32>
    %47 = tpu.concatenate %40, %42, %44, %46 in 0 : vector<1x16x8xf32>, vector<1x16x8xf32>, vector<1x16x8xf32>, vector<1x16x8xf32> -> vector<4x16x8xf32>
    %48 = arith.truncf %47 : vector<4x16x8xf32> to vector<4x16x8xbf16>
    %49 = vector.extract_strided_slice %35 {offsets = [0, 0], sizes = [16, 8], strides = [1, 1]} : vector<16x32xf32> to vector<16x8xf32>
    %50 = vector.shape_cast %49 : vector<16x8xf32> to vector<1x16x8xf32>
    %51 = vector.extract_strided_slice %35 {offsets = [0, 8], sizes = [16, 8], strides = [1, 1]} : vector<16x32xf32> to vector<16x8xf32>
    %52 = vector.shape_cast %51 : vector<16x8xf32> to vector<1x16x8xf32>
    %53 = vector.extract_strided_slice %35 {offsets = [0, 16], sizes = [16, 8], strides = [1, 1]} : vector<16x32xf32> to vector<16x8xf32>
    %54 = vector.shape_cast %53 : vector<16x8xf32> to vector<1x16x8xf32>
    %55 = vector.extract_strided_slice %35 {offsets = [0, 24], sizes = [16, 8], strides = [1, 1]} : vector<16x32xf32> to vector<16x8xf32>
    %56 = vector.shape_cast %55 : vector<16x8xf32> to vector<1x16x8xf32>
    %57 = tpu.concatenate %50, %52, %54, %56 in 0 : vector<1x16x8xf32>, vector<1x16x8xf32>, vector<1x16x8xf32>, vector<1x16x8xf32> -> vector<4x16x8xf32>
    %58 = arith.truncf %57 : vector<4x16x8xf32> to vector<4x16x8xbf16>
    %59 = vector.extract_strided_slice %36 {offsets = [0, 0], sizes = [16, 8], strides = [1, 1]} : vector<16x32xf32> to vector<16x8xf32>
    %60 = vector.shape_cast %59 : vector<16x8xf32> to vector<1x16x8xf32>
    %61 = vector.extract_strided_slice %36 {offsets = [0, 8], sizes = [16, 8], strides = [1, 1]} : vector<16x32xf32> to vector<16x8xf32>
    %62 = vector.shape_cast %61 : vector<16x8xf32> to vector<1x16x8xf32>
    %63 = vector.extract_strided_slice %36 {offsets = [0, 16], sizes = [16, 8], strides = [1, 1]} : vector<16x32xf32> to vector<16x8xf32>
    %64 = vector.shape_cast %63 : vector<16x8xf32> to vector<1x16x8xf32>
    %65 = vector.extract_strided_slice %36 {offsets = [0, 24], sizes = [16, 8], strides = [1, 1]} : vector<16x32xf32> to vector<16x8xf32>
    %66 = vector.shape_cast %65 : vector<16x8xf32> to vector<1x16x8xf32>
    %67 = tpu.concatenate %60, %62, %64, %66 in 0 : vector<1x16x8xf32>, vector<1x16x8xf32>, vector<1x16x8xf32>, vector<1x16x8xf32> -> vector<4x16x8xf32>
    %68 = arith.truncf %67 : vector<4x16x8xf32> to vector<4x16x8xbf16>
    "tpu.trace_start"() <{level = 10 : i32, message = "hqd,hkd->hqk"}> : () -> ()
    %cst_21 = arith.constant dense<0.000000e+00> : vector<4x16x16xf32>
    %69 = tpu.matmul %48, %58, %cst_21 {dimension_numbers = #tpu.dot_dimension_numbers<[2], [2], [1], [1], [0, 0, 0, 1, 1, 1], [0], [0]>} : vector<4x16x8xbf16>, vector<4x16x8xbf16>, vector<4x16x16xf32> -> vector<4x16x16xf32>
    "tpu.trace_stop"() : () -> ()
    %70 = vector.shape_cast %2 : vector<16x16xf32> to vector<1x16x16xf32>
    %71 = vector.broadcast %70 : vector<1x16x16xf32> to vector<4x16x16xf32>
    %72 = arith.addf %69, %71 : vector<4x16x16xf32>
    %cst_22 = arith.constant dense<0xFF800000> : vector<4x16xf32>
    %73 = vector.multi_reduction <maximumf>, %72, %cst_22 [2] : vector<4x16x16xf32> to vector<4x16xf32>
    %74 = vector.shape_cast %73 : vector<4x16xf32> to vector<4x16x1xf32>
    %75 = vector.broadcast %74 : vector<4x16x1xf32> to vector<4x16x16xf32>
    %76 = arith.subf %72, %75 : vector<4x16x16xf32>
    %77 = math.exp %76 : vector<4x16x16xf32>
    %cst_23 = arith.constant dense<0.000000e+00> : vector<4x16xf32>
    %78 = vector.multi_reduction <add>, %77, %cst_23 [2] : vector<4x16x16xf32> to vector<4x16xf32>
    %79 = vector.shape_cast %78 : vector<4x16xf32> to vector<4x16x1xf32>
    %80 = arith.truncf %77 : vector<4x16x16xf32> to vector<4x16x16xbf16>
    "tpu.trace_start"() <{level = 10 : i32, message = "hqk,hkd->hqd"}> : () -> ()
    %cst_24 = arith.constant dense<0.000000e+00> : vector<4x16x8xf32>
    %81 = tpu.matmul %80, %68, %cst_24 {dimension_numbers = #tpu.dot_dimension_numbers<[2], [1], [1], [2], [0, 0, 0, 1, 1, 2], [0], [0]>} : vector<4x16x16xbf16>, vector<4x16x8xbf16>, vector<4x16x8xf32> -> vector<4x16x8xf32>
    "tpu.trace_stop"() : () -> ()
    %82 = tpu.reciprocal %79 {approx = true} : vector<4x16x1xf32> -> vector<4x16x1xf32>
    %83 = vector.broadcast %82 : vector<4x16x1xf32> to vector<4x16x8xf32>
    %84 = arith.mulf %81, %83 : vector<4x16x8xf32>
    %85 = vector.extract_strided_slice %84 {offsets = [0, 0, 0], sizes = [1, 16, 8], strides = [1, 1, 1]} : vector<4x16x8xf32> to vector<1x16x8xf32>
    %86 = vector.shape_cast %85 : vector<1x16x8xf32> to vector<16x8xf32>
    %87 = vector.extract_strided_slice %84 {offsets = [1, 0, 0], sizes = [1, 16, 8], strides = [1, 1, 1]} : vector<4x16x8xf32> to vector<1x16x8xf32>
    %88 = vector.shape_cast %87 : vector<1x16x8xf32> to vector<16x8xf32>
    %89 = vector.extract_strided_slice %84 {offsets = [2, 0, 0], sizes = [1, 16, 8], strides = [1, 1, 1]} : vector<4x16x8xf32> to vector<1x16x8xf32>
    %90 = vector.shape_cast %89 : vector<1x16x8xf32> to vector<16x8xf32>
    %91 = vector.extract_strided_slice %84 {offsets = [3, 0, 0], sizes = [1, 16, 8], strides = [1, 1, 1]} : vector<4x16x8xf32> to vector<1x16x8xf32>
    %92 = vector.shape_cast %91 : vector<1x16x8xf32> to vector<16x8xf32>
    %93 = tpu.concatenate %86, %88, %90, %92 in 1 : vector<16x8xf32>, vector<16x8xf32>, vector<16x8xf32>, vector<16x8xf32> -> vector<16x32xf32>
    %94 = arith.truncf %93 : vector<16x32xf32> to vector<16x32xbf16>
    %c0_25 = arith.constant 0 : index
    %c0_26 = arith.constant 0 : index
    %95 = vector.load %arg8[%c0_25, %c0_26] : memref<32x32xbf16, #tpu.memory_space<vmem>>, vector<32x32xbf16>
    %cst_27 = arith.constant dense<0.000000e+00> : vector<16x32xf32>
    %96 = tpu.matmul %94, %95, %cst_27 {dimension_numbers = #tpu.dot_dimension_numbers<[1], [0], [0], [1], [0, 0, 1, 1], [], []>} : vector<16x32xbf16>, vector<32x32xbf16>, vector<16x32xf32> -> vector<16x32xf32>
    %c0_28 = arith.constant 0 : index
    %c0_29 = arith.constant 0 : index
    %97 = vector.load %arg9[%c0_28, %c0_29] : memref<1x32xf32, #tpu.memory_space<vmem>>, vector<1x32xf32>
    %98 = vector.broadcast %97 : vector<1x32xf32> to vector<16x32xf32>
    %99 = arith.addf %96, %98 : vector<16x32xf32>
    %100 = arith.addf %0, %99 : vector<16x32xf32>
    %c0_30 = arith.constant 0 : index
    %c0_31 = arith.constant 0 : index
    %101 = vector.load %arg10[%c0_30, %c0_31] : memref<1x32xf32, #tpu.memory_space<vmem>>, vector<1x32xf32>
    %c0_32 = arith.constant 0 : index
    %c0_33 = arith.constant 0 : index
    %102 = vector.load %arg11[%c0_32, %c0_33] : memref<1x32xf32, #tpu.memory_space<vmem>>, vector<1x32xf32>
    %cst_34 = arith.constant dense<0.000000e+00> : vector<16xf32>
    %103 = vector.multi_reduction <add>, %100, %cst_34 [1] : vector<16x32xf32> to vector<16xf32>
    %104 = vector.shape_cast %103 : vector<16xf32> to vector<16x1xf32>
    %cst_35 = arith.constant 3.200000e+01 : f32
    %105 = vector.broadcast %cst_35 : f32 to vector<16x1xf32>
    %106 = arith.divf %104, %105 : vector<16x1xf32>
    %107 = vector.broadcast %106 : vector<16x1xf32> to vector<16x32xf32>
    %108 = arith.subf %100, %107 : vector<16x32xf32>
    %109 = arith.mulf %108, %108 : vector<16x32xf32>
    %cst_36 = arith.constant dense<0.000000e+00> : vector<16xf32>
    %110 = vector.multi_reduction <add>, %109, %cst_36 [1] : vector<16x32xf32> to vector<16xf32>
    %111 = vector.shape_cast %110 : vector<16xf32> to vector<16x1xf32>
    %cst_37 = arith.constant 3.200000e+01 : f32
    %112 = vector.broadcast %cst_37 : f32 to vector<16x1xf32>
    %113 = arith.divf %111, %112 : vector<16x1xf32>
    %114 = vector.broadcast %106 : vector<16x1xf32> to vector<16x32xf32>
    %115 = arith.subf %100, %114 : vector<16x32xf32>
    %cst_38 = arith.constant 9.99999974E-6 : f32
    %116 = vector.broadcast %cst_38 : f32 to vector<16x1xf32>
    %117 = arith.addf %113, %116 : vector<16x1xf32>
    %118 = math.rsqrt %117 : vector<16x1xf32>
    %119 = vector.broadcast %118 : vector<16x1xf32> to vector<16x32xf32>
    %120 = arith.mulf %115, %119 : vector<16x32xf32>
    %121 = vector.broadcast %101 : vector<1x32xf32> to vector<16x32xf32>
    %122 = arith.mulf %120, %121 : vector<16x32xf32>
    %123 = vector.broadcast %102 : vector<1x32xf32> to vector<16x32xf32>
    %124 = arith.addf %122, %123 : vector<16x32xf32>
    %125 = arith.truncf %124 : vector<16x32xf32> to vector<16x32xbf16>
    %c0_39 = arith.constant 0 : index
    %c0_40 = arith.constant 0 : index
    %126 = vector.load %arg12[%c0_39, %c0_40] : memref<32x32xbf16, #tpu.memory_space<vmem>>, vector<32x32xbf16>
    %cst_41 = arith.constant dense<0.000000e+00> : vector<16x32xf32>
    %127 = tpu.matmul %125, %126, %cst_41 {dimension_numbers = #tpu.dot_dimension_numbers<[1], [0], [0], [1], [0, 0, 1, 1], [], []>} : vector<16x32xbf16>, vector<32x32xbf16>, vector<16x32xf32> -> vector<16x32xf32>
    %c0_42 = arith.constant 0 : index
    %c0_43 = arith.constant 0 : index
    %128 = vector.load %arg13[%c0_42, %c0_43] : memref<1x32xf32, #tpu.memory_space<vmem>>, vector<1x32xf32>
    %129 = vector.broadcast %128 : vector<1x32xf32> to vector<16x32xf32>
    %130 = arith.addf %127, %129 : vector<16x32xf32>
    %131 = arith.truncf %1 : vector<16x32xf32> to vector<16x32xbf16>
    %c0_44 = arith.constant 0 : index
    %c0_45 = arith.constant 0 : index
    %132 = vector.load %arg14[%c0_44, %c0_45] : memref<32x64xbf16, #tpu.memory_space<vmem>>, vector<32x64xbf16>
    %cst_46 = arith.constant dense<0.000000e+00> : vector<16x64xf32>
    %133 = tpu.matmul %131, %132, %cst_46 {dimension_numbers = #tpu.dot_dimension_numbers<[1], [0], [0], [1], [0, 0, 1, 1], [], []>} : vector<16x32xbf16>, vector<32x64xbf16>, vector<16x64xf32> -> vector<16x64xf32>
    %c0_47 = arith.constant 0 : index
    %c0_48 = arith.constant 0 : index
    %134 = vector.load %arg15[%c0_47, %c0_48] : memref<1x64xf32, #tpu.memory_space<vmem>>, vector<1x64xf32>
    %135 = vector.broadcast %134 : vector<1x64xf32> to vector<16x64xf32>
    %136 = arith.addf %133, %135 : vector<16x64xf32>
    %137 = vector.extract_strided_slice %136 {offsets = [0, 0], sizes = [16, 32], strides = [1, 1]} : vector<16x64xf32> to vector<16x32xf32>
    %138 = vector.extract_strided_slice %136 {offsets = [0, 32], sizes = [16, 32], strides = [1, 1]} : vector<16x64xf32> to vector<16x32xf32>
    %cst_49 = arith.constant 0.353553385 : f32
    %139 = vector.broadcast %cst_49 : f32 to vector<16x32xf32>
    %140 = arith.mulf %130, %139 : vector<16x32xf32>
    %141 = vector.extract_strided_slice %140 {offsets = [0, 0], sizes = [16, 8], strides = [1, 1]} : vector<16x32xf32> to vector<16x8xf32>
    %142 = vector.shape_cast %141 : vector<16x8xf32> to vector<1x16x8xf32>
    %143 = vector.extract_strided_slice %140 {offsets = [0, 8], sizes = [16, 8], strides = [1, 1]} : vector<16x32xf32> to vector<16x8xf32>
    %144 = vector.shape_cast %143 : vector<16x8xf32> to vector<1x16x8xf32>
    %145 = vector.extract_strided_slice %140 {offsets = [0, 16], sizes = [16, 8], strides = [1, 1]} : vector<16x32xf32> to vector<16x8xf32>
    %146 = vector.shape_cast %145 : vector<16x8xf32> to vector<1x16x8xf32>
    %147 = vector.extract_strided_slice %140 {offsets = [0, 24], sizes = [16, 8], strides = [1, 1]} : vector<16x32xf32> to vector<16x8xf32>
    %148 = vector.shape_cast %147 : vector<16x8xf32> to vector<1x16x8xf32>
    %149 = tpu.concatenate %142, %144, %146, %148 in 0 : vector<1x16x8xf32>, vector<1x16x8xf32>, vector<1x16x8xf32>, vector<1x16x8xf32> -> vector<4x16x8xf32>
    %150 = arith.truncf %149 : vector<4x16x8xf32> to vector<4x16x8xbf16>
    %151 = vector.extract_strided_slice %137 {offsets = [0, 0], sizes = [16, 8], strides = [1, 1]} : vector<16x32xf32> to vector<16x8xf32>
    %152 = vector.shape_cast %151 : vector<16x8xf32> to vector<1x16x8xf32>
    %153 = vector.extract_strided_slice %137 {offsets = [0, 8], sizes = [16, 8], strides = [1, 1]} : vector<16x32xf32> to vector<16x8xf32>
    %154 = vector.shape_cast %153 : vector<16x8xf32> to vector<1x16x8xf32>
    %155 = vector.extract_strided_slice %137 {offsets = [0, 16], sizes = [16, 8], strides = [1, 1]} : vector<16x32xf32> to vector<16x8xf32>
    %156 = vector.shape_cast %155 : vector<16x8xf32> to vector<1x16x8xf32>
    %157 = vector.extract_strided_slice %137 {offsets = [0, 24], sizes = [16, 8], strides = [1, 1]} : vector<16x32xf32> to vector<16x8xf32>
    %158 = vector.shape_cast %157 : vector<16x8xf32> to vector<1x16x8xf32>
    %159 = tpu.concatenate %152, %154, %156, %158 in 0 : vector<1x16x8xf32>, vector<1x16x8xf32>, vector<1x16x8xf32>, vector<1x16x8xf32> -> vector<4x16x8xf32>
    %160 = arith.truncf %159 : vector<4x16x8xf32> to vector<4x16x8xbf16>
    %161 = vector.extract_strided_slice %138 {offsets = [0, 0], sizes = [16, 8], strides = [1, 1]} : vector<16x32xf32> to vector<16x8xf32>
    %162 = vector.shape_cast %161 : vector<16x8xf32> to vector<1x16x8xf32>
    %163 = vector.extract_strided_slice %138 {offsets = [0, 8], sizes = [16, 8], strides = [1, 1]} : vector<16x32xf32> to vector<16x8xf32>
    %164 = vector.shape_cast %163 : vector<16x8xf32> to vector<1x16x8xf32>
    %165 = vector.extract_strided_slice %138 {offsets = [0, 16], sizes = [16, 8], strides = [1, 1]} : vector<16x32xf32> to vector<16x8xf32>
    %166 = vector.shape_cast %165 : vector<16x8xf32> to vector<1x16x8xf32>
    %167 = vector.extract_strided_slice %138 {offsets = [0, 24], sizes = [16, 8], strides = [1, 1]} : vector<16x32xf32> to vector<16x8xf32>
    %168 = vector.shape_cast %167 : vector<16x8xf32> to vector<1x16x8xf32>
    %169 = tpu.concatenate %162, %164, %166, %168 in 0 : vector<1x16x8xf32>, vector<1x16x8xf32>, vector<1x16x8xf32>, vector<1x16x8xf32> -> vector<4x16x8xf32>
    %170 = arith.truncf %169 : vector<4x16x8xf32> to vector<4x16x8xbf16>
    "tpu.trace_start"() <{level = 10 : i32, message = "hqd,hkd->hqk"}> : () -> ()
    %cst_50 = arith.constant dense<0.000000e+00> : vector<4x16x16xf32>
    %171 = tpu.matmul %150, %160, %cst_50 {dimension_numbers = #tpu.dot_dimension_numbers<[2], [2], [1], [1], [0, 0, 0, 1, 1, 1], [0], [0]>} : vector<4x16x8xbf16>, vector<4x16x8xbf16>, vector<4x16x16xf32> -> vector<4x16x16xf32>
    "tpu.trace_stop"() : () -> ()
    %172 = vector.shape_cast %3 : vector<16x16xf32> to vector<1x16x16xf32>
    %173 = vector.broadcast %172 : vector<1x16x16xf32> to vector<4x16x16xf32>
    %174 = arith.addf %171, %173 : vector<4x16x16xf32>
    %cst_51 = arith.constant dense<0xFF800000> : vector<4x16xf32>
    %175 = vector.multi_reduction <maximumf>, %174, %cst_51 [2] : vector<4x16x16xf32> to vector<4x16xf32>
    %176 = vector.shape_cast %175 : vector<4x16xf32> to vector<4x16x1xf32>
    %177 = vector.broadcast %176 : vector<4x16x1xf32> to vector<4x16x16xf32>
    %178 = arith.subf %174, %177 : vector<4x16x16xf32>
    %179 = math.exp %178 : vector<4x16x16xf32>
    %cst_52 = arith.constant dense<0.000000e+00> : vector<4x16xf32>
    %180 = vector.multi_reduction <add>, %179, %cst_52 [2] : vector<4x16x16xf32> to vector<4x16xf32>
    %181 = vector.shape_cast %180 : vector<4x16xf32> to vector<4x16x1xf32>
    %182 = arith.truncf %179 : vector<4x16x16xf32> to vector<4x16x16xbf16>
    "tpu.trace_start"() <{level = 10 : i32, message = "hqk,hkd->hqd"}> : () -> ()
    %cst_53 = arith.constant dense<0.000000e+00> : vector<4x16x8xf32>
    %183 = tpu.matmul %182, %170, %cst_53 {dimension_numbers = #tpu.dot_dimension_numbers<[2], [1], [1], [2], [0, 0, 0, 1, 1, 2], [0], [0]>} : vector<4x16x16xbf16>, vector<4x16x8xbf16>, vector<4x16x8xf32> -> vector<4x16x8xf32>
    "tpu.trace_stop"() : () -> ()
    %184 = tpu.reciprocal %181 {approx = true} : vector<4x16x1xf32> -> vector<4x16x1xf32>
    %185 = vector.broadcast %184 : vector<4x16x1xf32> to vector<4x16x8xf32>
    %186 = arith.mulf %183, %185 : vector<4x16x8xf32>
    %187 = vector.extract_strided_slice %186 {offsets = [0, 0, 0], sizes = [1, 16, 8], strides = [1, 1, 1]} : vector<4x16x8xf32> to vector<1x16x8xf32>
    %188 = vector.shape_cast %187 : vector<1x16x8xf32> to vector<16x8xf32>
    %189 = vector.extract_strided_slice %186 {offsets = [1, 0, 0], sizes = [1, 16, 8], strides = [1, 1, 1]} : vector<4x16x8xf32> to vector<1x16x8xf32>
    %190 = vector.shape_cast %189 : vector<1x16x8xf32> to vector<16x8xf32>
    %191 = vector.extract_strided_slice %186 {offsets = [2, 0, 0], sizes = [1, 16, 8], strides = [1, 1, 1]} : vector<4x16x8xf32> to vector<1x16x8xf32>
    %192 = vector.shape_cast %191 : vector<1x16x8xf32> to vector<16x8xf32>
    %193 = vector.extract_strided_slice %186 {offsets = [3, 0, 0], sizes = [1, 16, 8], strides = [1, 1, 1]} : vector<4x16x8xf32> to vector<1x16x8xf32>
    %194 = vector.shape_cast %193 : vector<1x16x8xf32> to vector<16x8xf32>
    %195 = tpu.concatenate %188, %190, %192, %194 in 1 : vector<16x8xf32>, vector<16x8xf32>, vector<16x8xf32>, vector<16x8xf32> -> vector<16x32xf32>
    %196 = arith.truncf %195 : vector<16x32xf32> to vector<16x32xbf16>
    %c0_54 = arith.constant 0 : index
    %c0_55 = arith.constant 0 : index
    %197 = vector.load %arg16[%c0_54, %c0_55] : memref<32x32xbf16, #tpu.memory_space<vmem>>, vector<32x32xbf16>
    %cst_56 = arith.constant dense<0.000000e+00> : vector<16x32xf32>
    %198 = tpu.matmul %196, %197, %cst_56 {dimension_numbers = #tpu.dot_dimension_numbers<[1], [0], [0], [1], [0, 0, 1, 1], [], []>} : vector<16x32xbf16>, vector<32x32xbf16>, vector<16x32xf32> -> vector<16x32xf32>
    %c0_57 = arith.constant 0 : index
    %c0_58 = arith.constant 0 : index
    %199 = vector.load %arg17[%c0_57, %c0_58] : memref<1x32xf32, #tpu.memory_space<vmem>>, vector<1x32xf32>
    %200 = vector.broadcast %199 : vector<1x32xf32> to vector<16x32xf32>
    %201 = arith.addf %198, %200 : vector<16x32xf32>
    %202 = arith.addf %100, %201 : vector<16x32xf32>
    %c0_59 = arith.constant 0 : index
    %c0_60 = arith.constant 0 : index
    %203 = vector.load %arg18[%c0_59, %c0_60] : memref<1x32xf32, #tpu.memory_space<vmem>>, vector<1x32xf32>
    %c0_61 = arith.constant 0 : index
    %c0_62 = arith.constant 0 : index
    %204 = vector.load %arg19[%c0_61, %c0_62] : memref<1x32xf32, #tpu.memory_space<vmem>>, vector<1x32xf32>
    %cst_63 = arith.constant dense<0.000000e+00> : vector<16xf32>
    %205 = vector.multi_reduction <add>, %202, %cst_63 [1] : vector<16x32xf32> to vector<16xf32>
    %206 = vector.shape_cast %205 : vector<16xf32> to vector<16x1xf32>
    %cst_64 = arith.constant 3.200000e+01 : f32
    %207 = vector.broadcast %cst_64 : f32 to vector<16x1xf32>
    %208 = arith.divf %206, %207 : vector<16x1xf32>
    %209 = vector.broadcast %208 : vector<16x1xf32> to vector<16x32xf32>
    %210 = arith.subf %202, %209 : vector<16x32xf32>
    %211 = arith.mulf %210, %210 : vector<16x32xf32>
    %cst_65 = arith.constant dense<0.000000e+00> : vector<16xf32>
    %212 = vector.multi_reduction <add>, %211, %cst_65 [1] : vector<16x32xf32> to vector<16xf32>
    %213 = vector.shape_cast %212 : vector<16xf32> to vector<16x1xf32>
    %cst_66 = arith.constant 3.200000e+01 : f32
    %214 = vector.broadcast %cst_66 : f32 to vector<16x1xf32>
    %215 = arith.divf %213, %214 : vector<16x1xf32>
    %216 = vector.broadcast %208 : vector<16x1xf32> to vector<16x32xf32>
    %217 = arith.subf %202, %216 : vector<16x32xf32>
    %cst_67 = arith.constant 9.99999974E-6 : f32
    %218 = vector.broadcast %cst_67 : f32 to vector<16x1xf32>
    %219 = arith.addf %215, %218 : vector<16x1xf32>
    %220 = math.rsqrt %219 : vector<16x1xf32>
    %221 = vector.broadcast %220 : vector<16x1xf32> to vector<16x32xf32>
    %222 = arith.mulf %217, %221 : vector<16x32xf32>
    %223 = vector.broadcast %203 : vector<1x32xf32> to vector<16x32xf32>
    %224 = arith.mulf %222, %223 : vector<16x32xf32>
    %225 = vector.broadcast %204 : vector<1x32xf32> to vector<16x32xf32>
    %226 = arith.addf %224, %225 : vector<16x32xf32>
    %227 = arith.truncf %226 : vector<16x32xf32> to vector<16x32xbf16>
    %c0_68 = arith.constant 0 : index
    %c0_69 = arith.constant 0 : index
    %228 = vector.load %arg20[%c0_68, %c0_69] : memref<32x64xbf16, #tpu.memory_space<vmem>>, vector<32x64xbf16>
    %cst_70 = arith.constant dense<0.000000e+00> : vector<16x64xf32>
    %229 = tpu.matmul %227, %228, %cst_70 {dimension_numbers = #tpu.dot_dimension_numbers<[1], [0], [0], [1], [0, 0, 1, 1], [], []>} : vector<16x32xbf16>, vector<32x64xbf16>, vector<16x64xf32> -> vector<16x64xf32>
    %c0_71 = arith.constant 0 : index
    %c0_72 = arith.constant 0 : index
    %230 = vector.load %arg21[%c0_71, %c0_72] : memref<1x64xf32, #tpu.memory_space<vmem>>, vector<1x64xf32>
    %231 = vector.broadcast %230 : vector<1x64xf32> to vector<16x64xf32>
    %232 = arith.addf %229, %231 : vector<16x64xf32>
    %cst_73 = arith.constant 5.000000e-01 : f32
    %233 = vector.broadcast %cst_73 : f32 to vector<16x64xf32>
    %234 = arith.mulf %233, %232 : vector<16x64xf32>
    %cst_74 = arith.constant 0.707106769 : f32
    %235 = vector.broadcast %cst_74 : f32 to vector<16x64xf32>
    %236 = arith.mulf %232, %235 : vector<16x64xf32>
    %237 = math.absf %236 : vector<16x64xf32>
    %cst_75 = arith.constant 0.327591091 : f32
    %238 = vector.broadcast %cst_75 : f32 to vector<16x64xf32>
    %239 = arith.mulf %238, %237 : vector<16x64xf32>
    %cst_76 = arith.constant 1.000000e+00 : f32
    %240 = vector.broadcast %cst_76 : f32 to vector<16x64xf32>
    %241 = arith.addf %240, %239 : vector<16x64xf32>
    %cst_77 = arith.constant 1.000000e+00 : f32
    %242 = vector.broadcast %cst_77 : f32 to vector<16x64xf32>
    %243 = arith.divf %242, %241 : vector<16x64xf32>
    %cst_78 = arith.constant 1.06140542 : f32
    %244 = vector.broadcast %cst_78 : f32 to vector<16x64xf32>
    %245 = arith.mulf %244, %243 : vector<16x64xf32>
    %cst_79 = arith.constant -1.45315206 : f32
    %246 = vector.broadcast %cst_79 : f32 to vector<16x64xf32>
    %247 = arith.addf %245, %246 : vector<16x64xf32>
    %248 = arith.mulf %247, %243 : vector<16x64xf32>
    %cst_80 = arith.constant 1.42141378 : f32
    %249 = vector.broadcast %cst_80 : f32 to vector<16x64xf32>
    %250 = arith.addf %248, %249 : vector<16x64xf32>
    %251 = arith.mulf %250, %243 : vector<16x64xf32>
    %cst_81 = arith.constant -0.284496725 : f32
    %252 = vector.broadcast %cst_81 : f32 to vector<16x64xf32>
    %253 = arith.addf %251, %252 : vector<16x64xf32>
    %254 = arith.mulf %253, %243 : vector<16x64xf32>
    %cst_82 = arith.constant 0.254829586 : f32
    %255 = vector.broadcast %cst_82 : f32 to vector<16x64xf32>
    %256 = arith.addf %254, %255 : vector<16x64xf32>
    %257 = arith.mulf %256, %243 : vector<16x64xf32>
    %cst_83 = arith.constant 0.000000e+00 : f32
    %258 = vector.broadcast %cst_83 : f32 to vector<16x64xf32>
    %259 = arith.subf %258, %237 : vector<16x64xf32>
    %260 = arith.mulf %259, %237 : vector<16x64xf32>
    %261 = math.exp %260 : vector<16x64xf32>
    %262 = arith.mulf %257, %261 : vector<16x64xf32>
    %cst_84 = arith.constant 1.000000e+00 : f32
    %263 = vector.broadcast %cst_84 : f32 to vector<16x64xf32>
    %264 = arith.subf %263, %262 : vector<16x64xf32>
    %cst_85 = arith.constant 0.000000e+00 : f32
    %265 = vector.broadcast %cst_85 : f32 to vector<16x64xf32>
    %266 = arith.cmpf oge, %236, %265 : vector<16x64xf32>
    %cst_86 = arith.constant 0.000000e+00 : f32
    %267 = vector.broadcast %cst_86 : f32 to vector<16x64xf32>
    %268 = arith.subf %267, %264 : vector<16x64xf32>
    %269 = arith.select %266, %264, %268 : vector<16x64xi1>, vector<16x64xf32>
    %cst_87 = arith.constant 1.000000e+00 : f32
    %270 = vector.broadcast %cst_87 : f32 to vector<16x64xf32>
    %271 = arith.addf %270, %269 : vector<16x64xf32>
    %272 = arith.mulf %234, %271 : vector<16x64xf32>
    %273 = arith.truncf %272 : vector<16x64xf32> to vector<16x64xbf16>
    %c0_88 = arith.constant 0 : index
    %c0_89 = arith.constant 0 : index
    %274 = vector.load %arg22[%c0_88, %c0_89] : memref<64x32xbf16, #tpu.memory_space<vmem>>, vector<64x32xbf16>
    %cst_90 = arith.constant dense<0.000000e+00> : vector<16x32xf32>
    %275 = tpu.matmul %273, %274, %cst_90 {dimension_numbers = #tpu.dot_dimension_numbers<[1], [0], [0], [1], [0, 0, 1, 1], [], []>} : vector<16x64xbf16>, vector<64x32xbf16>, vector<16x32xf32> -> vector<16x32xf32>
    %c0_91 = arith.constant 0 : index
    %c0_92 = arith.constant 0 : index
    %276 = vector.load %arg23[%c0_91, %c0_92] : memref<1x32xf32, #tpu.memory_space<vmem>>, vector<1x32xf32>
    %277 = vector.broadcast %276 : vector<1x32xf32> to vector<16x32xf32>
    %278 = arith.addf %275, %277 : vector<16x32xf32>
    %279 = arith.addf %202, %278 : vector<16x32xf32>
    %c0_93 = arith.constant 0 : index
    %c0_94 = arith.constant 0 : index
    %280 = vector.load %arg24[%c0_93, %c0_94] : memref<1x32xf32, #tpu.memory_space<vmem>>, vector<1x32xf32>
    %c0_95 = arith.constant 0 : index
    %c0_96 = arith.constant 0 : index
    %281 = vector.load %arg25[%c0_95, %c0_96] : memref<1x32xf32, #tpu.memory_space<vmem>>, vector<1x32xf32>
    %cst_97 = arith.constant dense<0.000000e+00> : vector<16xf32>
    %282 = vector.multi_reduction <add>, %279, %cst_97 [1] : vector<16x32xf32> to vector<16xf32>
    %283 = vector.shape_cast %282 : vector<16xf32> to vector<16x1xf32>
    %cst_98 = arith.constant 3.200000e+01 : f32
    %284 = vector.broadcast %cst_98 : f32 to vector<16x1xf32>
    %285 = arith.divf %283, %284 : vector<16x1xf32>
    %286 = vector.broadcast %285 : vector<16x1xf32> to vector<16x32xf32>
    %287 = arith.subf %279, %286 : vector<16x32xf32>
    %288 = arith.mulf %287, %287 : vector<16x32xf32>
    %cst_99 = arith.constant dense<0.000000e+00> : vector<16xf32>
    %289 = vector.multi_reduction <add>, %288, %cst_99 [1] : vector<16x32xf32> to vector<16xf32>
    %290 = vector.shape_cast %289 : vector<16xf32> to vector<16x1xf32>
    %cst_100 = arith.constant 3.200000e+01 : f32
    %291 = vector.broadcast %cst_100 : f32 to vector<16x1xf32>
    %292 = arith.divf %290, %291 : vector<16x1xf32>
    %293 = vector.broadcast %285 : vector<16x1xf32> to vector<16x32xf32>
    %294 = arith.subf %279, %293 : vector<16x32xf32>
    %cst_101 = arith.constant 9.99999974E-6 : f32
    %295 = vector.broadcast %cst_101 : f32 to vector<16x1xf32>
    %296 = arith.addf %292, %295 : vector<16x1xf32>
    %297 = math.rsqrt %296 : vector<16x1xf32>
    %298 = vector.broadcast %297 : vector<16x1xf32> to vector<16x32xf32>
    %299 = arith.mulf %294, %298 : vector<16x32xf32>
    %300 = vector.broadcast %280 : vector<1x32xf32> to vector<16x32xf32>
    %301 = arith.mulf %299, %300 : vector<16x32xf32>
    %302 = vector.broadcast %281 : vector<1x32xf32> to vector<16x32xf32>
    %303 = arith.addf %301, %302 : vector<16x32xf32>
    %304 = arith.truncf %303 : vector<16x32xf32> to vector<16x32xbf16>
    %c0_102 = arith.constant 0 : index
    %c0_103 = arith.constant 0 : index
    %305 = vector.load %arg26[%c0_102, %c0_103] : memref<32x96xbf16, #tpu.memory_space<vmem>>, vector<32x96xbf16>
    %cst_104 = arith.constant dense<0.000000e+00> : vector<16x96xf32>
    %306 = tpu.matmul %304, %305, %cst_104 {dimension_numbers = #tpu.dot_dimension_numbers<[1], [0], [0], [1], [0, 0, 1, 1], [], []>} : vector<16x32xbf16>, vector<32x96xbf16>, vector<16x96xf32> -> vector<16x96xf32>
    %c0_105 = arith.constant 0 : index
    %c0_106 = arith.constant 0 : index
    %307 = vector.load %arg27[%c0_105, %c0_106] : memref<1x96xf32, #tpu.memory_space<vmem>>, vector<1x96xf32>
    %308 = vector.broadcast %307 : vector<1x96xf32> to vector<16x96xf32>
    %309 = arith.addf %306, %308 : vector<16x96xf32>
    %310 = vector.extract_strided_slice %309 {offsets = [0, 0], sizes = [16, 32], strides = [1, 1]} : vector<16x96xf32> to vector<16x32xf32>
    %311 = vector.extract_strided_slice %309 {offsets = [0, 32], sizes = [16, 32], strides = [1, 1]} : vector<16x96xf32> to vector<16x32xf32>
    %312 = vector.extract_strided_slice %309 {offsets = [0, 64], sizes = [16, 32], strides = [1, 1]} : vector<16x96xf32> to vector<16x32xf32>
    %cst_107 = arith.constant 0.353553385 : f32
    %313 = vector.broadcast %cst_107 : f32 to vector<16x32xf32>
    %314 = arith.mulf %310, %313 : vector<16x32xf32>
    %315 = vector.extract_strided_slice %314 {offsets = [0, 0], sizes = [16, 8], strides = [1, 1]} : vector<16x32xf32> to vector<16x8xf32>
    %316 = vector.shape_cast %315 : vector<16x8xf32> to vector<1x16x8xf32>
    %317 = vector.extract_strided_slice %314 {offsets = [0, 8], sizes = [16, 8], strides = [1, 1]} : vector<16x32xf32> to vector<16x8xf32>
    %318 = vector.shape_cast %317 : vector<16x8xf32> to vector<1x16x8xf32>
    %319 = vector.extract_strided_slice %314 {offsets = [0, 16], sizes = [16, 8], strides = [1, 1]} : vector<16x32xf32> to vector<16x8xf32>
    %320 = vector.shape_cast %319 : vector<16x8xf32> to vector<1x16x8xf32>
    %321 = vector.extract_strided_slice %314 {offsets = [0, 24], sizes = [16, 8], strides = [1, 1]} : vector<16x32xf32> to vector<16x8xf32>
    %322 = vector.shape_cast %321 : vector<16x8xf32> to vector<1x16x8xf32>
    %323 = tpu.concatenate %316, %318, %320, %322 in 0 : vector<1x16x8xf32>, vector<1x16x8xf32>, vector<1x16x8xf32>, vector<1x16x8xf32> -> vector<4x16x8xf32>
    %324 = arith.truncf %323 : vector<4x16x8xf32> to vector<4x16x8xbf16>
    %325 = vector.extract_strided_slice %311 {offsets = [0, 0], sizes = [16, 8], strides = [1, 1]} : vector<16x32xf32> to vector<16x8xf32>
    %326 = vector.shape_cast %325 : vector<16x8xf32> to vector<1x16x8xf32>
    %327 = vector.extract_strided_slice %311 {offsets = [0, 8], sizes = [16, 8], strides = [1, 1]} : vector<16x32xf32> to vector<16x8xf32>
    %328 = vector.shape_cast %327 : vector<16x8xf32> to vector<1x16x8xf32>
    %329 = vector.extract_strided_slice %311 {offsets = [0, 16], sizes = [16, 8], strides = [1, 1]} : vector<16x32xf32> to vector<16x8xf32>
    %330 = vector.shape_cast %329 : vector<16x8xf32> to vector<1x16x8xf32>
    %331 = vector.extract_strided_slice %311 {offsets = [0, 24], sizes = [16, 8], strides = [1, 1]} : vector<16x32xf32> to vector<16x8xf32>
    %332 = vector.shape_cast %331 : vector<16x8xf32> to vector<1x16x8xf32>
    %333 = tpu.concatenate %326, %328, %330, %332 in 0 : vector<1x16x8xf32>, vector<1x16x8xf32>, vector<1x16x8xf32>, vector<1x16x8xf32> -> vector<4x16x8xf32>
    %334 = arith.truncf %333 : vector<4x16x8xf32> to vector<4x16x8xbf16>
    %335 = vector.extract_strided_slice %312 {offsets = [0, 0], sizes = [16, 8], strides = [1, 1]} : vector<16x32xf32> to vector<16x8xf32>
    %336 = vector.shape_cast %335 : vector<16x8xf32> to vector<1x16x8xf32>
    %337 = vector.extract_strided_slice %312 {offsets = [0, 8], sizes = [16, 8], strides = [1, 1]} : vector<16x32xf32> to vector<16x8xf32>
    %338 = vector.shape_cast %337 : vector<16x8xf32> to vector<1x16x8xf32>
    %339 = vector.extract_strided_slice %312 {offsets = [0, 16], sizes = [16, 8], strides = [1, 1]} : vector<16x32xf32> to vector<16x8xf32>
    %340 = vector.shape_cast %339 : vector<16x8xf32> to vector<1x16x8xf32>
    %341 = vector.extract_strided_slice %312 {offsets = [0, 24], sizes = [16, 8], strides = [1, 1]} : vector<16x32xf32> to vector<16x8xf32>
    %342 = vector.shape_cast %341 : vector<16x8xf32> to vector<1x16x8xf32>
    %343 = tpu.concatenate %336, %338, %340, %342 in 0 : vector<1x16x8xf32>, vector<1x16x8xf32>, vector<1x16x8xf32>, vector<1x16x8xf32> -> vector<4x16x8xf32>
    %344 = arith.truncf %343 : vector<4x16x8xf32> to vector<4x16x8xbf16>
    "tpu.trace_start"() <{level = 10 : i32, message = "hqd,hkd->hqk"}> : () -> ()
    %cst_108 = arith.constant dense<0.000000e+00> : vector<4x16x16xf32>
    %345 = tpu.matmul %324, %334, %cst_108 {dimension_numbers = #tpu.dot_dimension_numbers<[2], [2], [1], [1], [0, 0, 0, 1, 1, 1], [0], [0]>} : vector<4x16x8xbf16>, vector<4x16x8xbf16>, vector<4x16x16xf32> -> vector<4x16x16xf32>
    "tpu.trace_stop"() : () -> ()
    %346 = vector.shape_cast %2 : vector<16x16xf32> to vector<1x16x16xf32>
    %347 = vector.broadcast %346 : vector<1x16x16xf32> to vector<4x16x16xf32>
    %348 = arith.addf %345, %347 : vector<4x16x16xf32>
    %cst_109 = arith.constant dense<0xFF800000> : vector<4x16xf32>
    %349 = vector.multi_reduction <maximumf>, %348, %cst_109 [2] : vector<4x16x16xf32> to vector<4x16xf32>
    %350 = vector.shape_cast %349 : vector<4x16xf32> to vector<4x16x1xf32>
    %351 = vector.broadcast %350 : vector<4x16x1xf32> to vector<4x16x16xf32>
    %352 = arith.subf %348, %351 : vector<4x16x16xf32>
    %353 = math.exp %352 : vector<4x16x16xf32>
    %cst_110 = arith.constant dense<0.000000e+00> : vector<4x16xf32>
    %354 = vector.multi_reduction <add>, %353, %cst_110 [2] : vector<4x16x16xf32> to vector<4x16xf32>
    %355 = vector.shape_cast %354 : vector<4x16xf32> to vector<4x16x1xf32>
    %356 = arith.truncf %353 : vector<4x16x16xf32> to vector<4x16x16xbf16>
    "tpu.trace_start"() <{level = 10 : i32, message = "hqk,hkd->hqd"}> : () -> ()
    %cst_111 = arith.constant dense<0.000000e+00> : vector<4x16x8xf32>
    %357 = tpu.matmul %356, %344, %cst_111 {dimension_numbers = #tpu.dot_dimension_numbers<[2], [1], [1], [2], [0, 0, 0, 1, 1, 2], [0], [0]>} : vector<4x16x16xbf16>, vector<4x16x8xbf16>, vector<4x16x8xf32> -> vector<4x16x8xf32>
    "tpu.trace_stop"() : () -> ()
    %358 = tpu.reciprocal %355 {approx = true} : vector<4x16x1xf32> -> vector<4x16x1xf32>
    %359 = vector.broadcast %358 : vector<4x16x1xf32> to vector<4x16x8xf32>
    %360 = arith.mulf %357, %359 : vector<4x16x8xf32>
    %361 = vector.extract_strided_slice %360 {offsets = [0, 0, 0], sizes = [1, 16, 8], strides = [1, 1, 1]} : vector<4x16x8xf32> to vector<1x16x8xf32>
    %362 = vector.shape_cast %361 : vector<1x16x8xf32> to vector<16x8xf32>
    %363 = vector.extract_strided_slice %360 {offsets = [1, 0, 0], sizes = [1, 16, 8], strides = [1, 1, 1]} : vector<4x16x8xf32> to vector<1x16x8xf32>
    %364 = vector.shape_cast %363 : vector<1x16x8xf32> to vector<16x8xf32>
    %365 = vector.extract_strided_slice %360 {offsets = [2, 0, 0], sizes = [1, 16, 8], strides = [1, 1, 1]} : vector<4x16x8xf32> to vector<1x16x8xf32>
    %366 = vector.shape_cast %365 : vector<1x16x8xf32> to vector<16x8xf32>
    %367 = vector.extract_strided_slice %360 {offsets = [3, 0, 0], sizes = [1, 16, 8], strides = [1, 1, 1]} : vector<4x16x8xf32> to vector<1x16x8xf32>
    %368 = vector.shape_cast %367 : vector<1x16x8xf32> to vector<16x8xf32>
    %369 = tpu.concatenate %362, %364, %366, %368 in 1 : vector<16x8xf32>, vector<16x8xf32>, vector<16x8xf32>, vector<16x8xf32> -> vector<16x32xf32>
    %370 = arith.truncf %369 : vector<16x32xf32> to vector<16x32xbf16>
    %c0_112 = arith.constant 0 : index
    %c0_113 = arith.constant 0 : index
    %371 = vector.load %arg28[%c0_112, %c0_113] : memref<32x32xbf16, #tpu.memory_space<vmem>>, vector<32x32xbf16>
    %cst_114 = arith.constant dense<0.000000e+00> : vector<16x32xf32>
    %372 = tpu.matmul %370, %371, %cst_114 {dimension_numbers = #tpu.dot_dimension_numbers<[1], [0], [0], [1], [0, 0, 1, 1], [], []>} : vector<16x32xbf16>, vector<32x32xbf16>, vector<16x32xf32> -> vector<16x32xf32>
    %c0_115 = arith.constant 0 : index
    %c0_116 = arith.constant 0 : index
    %373 = vector.load %arg29[%c0_115, %c0_116] : memref<1x32xf32, #tpu.memory_space<vmem>>, vector<1x32xf32>
    %374 = vector.broadcast %373 : vector<1x32xf32> to vector<16x32xf32>
    %375 = arith.addf %372, %374 : vector<16x32xf32>
    %376 = arith.addf %279, %375 : vector<16x32xf32>
    %c0_117 = arith.constant 0 : index
    %c0_118 = arith.constant 0 : index
    %377 = vector.load %arg30[%c0_117, %c0_118] : memref<1x32xf32, #tpu.memory_space<vmem>>, vector<1x32xf32>
    %c0_119 = arith.constant 0 : index
    %c0_120 = arith.constant 0 : index
    %378 = vector.load %arg31[%c0_119, %c0_120] : memref<1x32xf32, #tpu.memory_space<vmem>>, vector<1x32xf32>
    %cst_121 = arith.constant dense<0.000000e+00> : vector<16xf32>
    %379 = vector.multi_reduction <add>, %376, %cst_121 [1] : vector<16x32xf32> to vector<16xf32>
    %380 = vector.shape_cast %379 : vector<16xf32> to vector<16x1xf32>
    %cst_122 = arith.constant 3.200000e+01 : f32
    %381 = vector.broadcast %cst_122 : f32 to vector<16x1xf32>
    %382 = arith.divf %380, %381 : vector<16x1xf32>
    %383 = vector.broadcast %382 : vector<16x1xf32> to vector<16x32xf32>
    %384 = arith.subf %376, %383 : vector<16x32xf32>
    %385 = arith.mulf %384, %384 : vector<16x32xf32>
    %cst_123 = arith.constant dense<0.000000e+00> : vector<16xf32>
    %386 = vector.multi_reduction <add>, %385, %cst_123 [1] : vector<16x32xf32> to vector<16xf32>
    %387 = vector.shape_cast %386 : vector<16xf32> to vector<16x1xf32>
    %cst_124 = arith.constant 3.200000e+01 : f32
    %388 = vector.broadcast %cst_124 : f32 to vector<16x1xf32>
    %389 = arith.divf %387, %388 : vector<16x1xf32>
    %390 = vector.broadcast %382 : vector<16x1xf32> to vector<16x32xf32>
    %391 = arith.subf %376, %390 : vector<16x32xf32>
    %cst_125 = arith.constant 9.99999974E-6 : f32
    %392 = vector.broadcast %cst_125 : f32 to vector<16x1xf32>
    %393 = arith.addf %389, %392 : vector<16x1xf32>
    %394 = math.rsqrt %393 : vector<16x1xf32>
    %395 = vector.broadcast %394 : vector<16x1xf32> to vector<16x32xf32>
    %396 = arith.mulf %391, %395 : vector<16x32xf32>
    %397 = vector.broadcast %377 : vector<1x32xf32> to vector<16x32xf32>
    %398 = arith.mulf %396, %397 : vector<16x32xf32>
    %399 = vector.broadcast %378 : vector<1x32xf32> to vector<16x32xf32>
    %400 = arith.addf %398, %399 : vector<16x32xf32>
    %401 = arith.truncf %400 : vector<16x32xf32> to vector<16x32xbf16>
    %c0_126 = arith.constant 0 : index
    %c0_127 = arith.constant 0 : index
    %402 = vector.load %arg32[%c0_126, %c0_127] : memref<32x32xbf16, #tpu.memory_space<vmem>>, vector<32x32xbf16>
    %cst_128 = arith.constant dense<0.000000e+00> : vector<16x32xf32>
    %403 = tpu.matmul %401, %402, %cst_128 {dimension_numbers = #tpu.dot_dimension_numbers<[1], [0], [0], [1], [0, 0, 1, 1], [], []>} : vector<16x32xbf16>, vector<32x32xbf16>, vector<16x32xf32> -> vector<16x32xf32>
    %c0_129 = arith.constant 0 : index
    %c0_130 = arith.constant 0 : index
    %404 = vector.load %arg33[%c0_129, %c0_130] : memref<1x32xf32, #tpu.memory_space<vmem>>, vector<1x32xf32>
    %405 = vector.broadcast %404 : vector<1x32xf32> to vector<16x32xf32>
    %406 = arith.addf %403, %405 : vector<16x32xf32>
    %407 = arith.truncf %1 : vector<16x32xf32> to vector<16x32xbf16>
    %c0_131 = arith.constant 0 : index
    %c0_132 = arith.constant 0 : index
    %408 = vector.load %arg34[%c0_131, %c0_132] : memref<32x64xbf16, #tpu.memory_space<vmem>>, vector<32x64xbf16>
    %cst_133 = arith.constant dense<0.000000e+00> : vector<16x64xf32>
    %409 = tpu.matmul %407, %408, %cst_133 {dimension_numbers = #tpu.dot_dimension_numbers<[1], [0], [0], [1], [0, 0, 1, 1], [], []>} : vector<16x32xbf16>, vector<32x64xbf16>, vector<16x64xf32> -> vector<16x64xf32>
    %c0_134 = arith.constant 0 : index
    %c0_135 = arith.constant 0 : index
    %410 = vector.load %arg35[%c0_134, %c0_135] : memref<1x64xf32, #tpu.memory_space<vmem>>, vector<1x64xf32>
    %411 = vector.broadcast %410 : vector<1x64xf32> to vector<16x64xf32>
    %412 = arith.addf %409, %411 : vector<16x64xf32>
    %413 = vector.extract_strided_slice %412 {offsets = [0, 0], sizes = [16, 32], strides = [1, 1]} : vector<16x64xf32> to vector<16x32xf32>
    %414 = vector.extract_strided_slice %412 {offsets = [0, 32], sizes = [16, 32], strides = [1, 1]} : vector<16x64xf32> to vector<16x32xf32>
    %cst_136 = arith.constant 0.353553385 : f32
    %415 = vector.broadcast %cst_136 : f32 to vector<16x32xf32>
    %416 = arith.mulf %406, %415 : vector<16x32xf32>
    %417 = vector.extract_strided_slice %416 {offsets = [0, 0], sizes = [16, 8], strides = [1, 1]} : vector<16x32xf32> to vector<16x8xf32>
    %418 = vector.shape_cast %417 : vector<16x8xf32> to vector<1x16x8xf32>
    %419 = vector.extract_strided_slice %416 {offsets = [0, 8], sizes = [16, 8], strides = [1, 1]} : vector<16x32xf32> to vector<16x8xf32>
    %420 = vector.shape_cast %419 : vector<16x8xf32> to vector<1x16x8xf32>
    %421 = vector.extract_strided_slice %416 {offsets = [0, 16], sizes = [16, 8], strides = [1, 1]} : vector<16x32xf32> to vector<16x8xf32>
    %422 = vector.shape_cast %421 : vector<16x8xf32> to vector<1x16x8xf32>
    %423 = vector.extract_strided_slice %416 {offsets = [0, 24], sizes = [16, 8], strides = [1, 1]} : vector<16x32xf32> to vector<16x8xf32>
    %424 = vector.shape_cast %423 : vector<16x8xf32> to vector<1x16x8xf32>
    %425 = tpu.concatenate %418, %420, %422, %424 in 0 : vector<1x16x8xf32>, vector<1x16x8xf32>, vector<1x16x8xf32>, vector<1x16x8xf32> -> vector<4x16x8xf32>
    %426 = arith.truncf %425 : vector<4x16x8xf32> to vector<4x16x8xbf16>
    %427 = vector.extract_strided_slice %413 {offsets = [0, 0], sizes = [16, 8], strides = [1, 1]} : vector<16x32xf32> to vector<16x8xf32>
    %428 = vector.shape_cast %427 : vector<16x8xf32> to vector<1x16x8xf32>
    %429 = vector.extract_strided_slice %413 {offsets = [0, 8], sizes = [16, 8], strides = [1, 1]} : vector<16x32xf32> to vector<16x8xf32>
    %430 = vector.shape_cast %429 : vector<16x8xf32> to vector<1x16x8xf32>
    %431 = vector.extract_strided_slice %413 {offsets = [0, 16], sizes = [16, 8], strides = [1, 1]} : vector<16x32xf32> to vector<16x8xf32>
    %432 = vector.shape_cast %431 : vector<16x8xf32> to vector<1x16x8xf32>
    %433 = vector.extract_strided_slice %413 {offsets = [0, 24], sizes = [16, 8], strides = [1, 1]} : vector<16x32xf32> to vector<16x8xf32>
    %434 = vector.shape_cast %433 : vector<16x8xf32> to vector<1x16x8xf32>
    %435 = tpu.concatenate %428, %430, %432, %434 in 0 : vector<1x16x8xf32>, vector<1x16x8xf32>, vector<1x16x8xf32>, vector<1x16x8xf32> -> vector<4x16x8xf32>
    %436 = arith.truncf %435 : vector<4x16x8xf32> to vector<4x16x8xbf16>
    %437 = vector.extract_strided_slice %414 {offsets = [0, 0], sizes = [16, 8], strides = [1, 1]} : vector<16x32xf32> to vector<16x8xf32>
    %438 = vector.shape_cast %437 : vector<16x8xf32> to vector<1x16x8xf32>
    %439 = vector.extract_strided_slice %414 {offsets = [0, 8], sizes = [16, 8], strides = [1, 1]} : vector<16x32xf32> to vector<16x8xf32>
    %440 = vector.shape_cast %439 : vector<16x8xf32> to vector<1x16x8xf32>
    %441 = vector.extract_strided_slice %414 {offsets = [0, 16], sizes = [16, 8], strides = [1, 1]} : vector<16x32xf32> to vector<16x8xf32>
    %442 = vector.shape_cast %441 : vector<16x8xf32> to vector<1x16x8xf32>
    %443 = vector.extract_strided_slice %414 {offsets = [0, 24], sizes = [16, 8], strides = [1, 1]} : vector<16x32xf32> to vector<16x8xf32>
    %444 = vector.shape_cast %443 : vector<16x8xf32> to vector<1x16x8xf32>
    %445 = tpu.concatenate %438, %440, %442, %444 in 0 : vector<1x16x8xf32>, vector<1x16x8xf32>, vector<1x16x8xf32>, vector<1x16x8xf32> -> vector<4x16x8xf32>
    %446 = arith.truncf %445 : vector<4x16x8xf32> to vector<4x16x8xbf16>
    "tpu.trace_start"() <{level = 10 : i32, message = "hqd,hkd->hqk"}> : () -> ()
    %cst_137 = arith.constant dense<0.000000e+00> : vector<4x16x16xf32>
    %447 = tpu.matmul %426, %436, %cst_137 {dimension_numbers = #tpu.dot_dimension_numbers<[2], [2], [1], [1], [0, 0, 0, 1, 1, 1], [0], [0]>} : vector<4x16x8xbf16>, vector<4x16x8xbf16>, vector<4x16x16xf32> -> vector<4x16x16xf32>
    "tpu.trace_stop"() : () -> ()
    %448 = vector.shape_cast %3 : vector<16x16xf32> to vector<1x16x16xf32>
    %449 = vector.broadcast %448 : vector<1x16x16xf32> to vector<4x16x16xf32>
    %450 = arith.addf %447, %449 : vector<4x16x16xf32>
    %cst_138 = arith.constant dense<0xFF800000> : vector<4x16xf32>
    %451 = vector.multi_reduction <maximumf>, %450, %cst_138 [2] : vector<4x16x16xf32> to vector<4x16xf32>
    %452 = vector.shape_cast %451 : vector<4x16xf32> to vector<4x16x1xf32>
    %453 = vector.broadcast %452 : vector<4x16x1xf32> to vector<4x16x16xf32>
    %454 = arith.subf %450, %453 : vector<4x16x16xf32>
    %455 = math.exp %454 : vector<4x16x16xf32>
    %cst_139 = arith.constant dense<0.000000e+00> : vector<4x16xf32>
    %456 = vector.multi_reduction <add>, %455, %cst_139 [2] : vector<4x16x16xf32> to vector<4x16xf32>
    %457 = vector.shape_cast %456 : vector<4x16xf32> to vector<4x16x1xf32>
    %458 = arith.truncf %455 : vector<4x16x16xf32> to vector<4x16x16xbf16>
    "tpu.trace_start"() <{level = 10 : i32, message = "hqk,hkd->hqd"}> : () -> ()
    %cst_140 = arith.constant dense<0.000000e+00> : vector<4x16x8xf32>
    %459 = tpu.matmul %458, %446, %cst_140 {dimension_numbers = #tpu.dot_dimension_numbers<[2], [1], [1], [2], [0, 0, 0, 1, 1, 2], [0], [0]>} : vector<4x16x16xbf16>, vector<4x16x8xbf16>, vector<4x16x8xf32> -> vector<4x16x8xf32>
    "tpu.trace_stop"() : () -> ()
    %460 = tpu.reciprocal %457 {approx = true} : vector<4x16x1xf32> -> vector<4x16x1xf32>
    %461 = vector.broadcast %460 : vector<4x16x1xf32> to vector<4x16x8xf32>
    %462 = arith.mulf %459, %461 : vector<4x16x8xf32>
    %463 = vector.extract_strided_slice %462 {offsets = [0, 0, 0], sizes = [1, 16, 8], strides = [1, 1, 1]} : vector<4x16x8xf32> to vector<1x16x8xf32>
    %464 = vector.shape_cast %463 : vector<1x16x8xf32> to vector<16x8xf32>
    %465 = vector.extract_strided_slice %462 {offsets = [1, 0, 0], sizes = [1, 16, 8], strides = [1, 1, 1]} : vector<4x16x8xf32> to vector<1x16x8xf32>
    %466 = vector.shape_cast %465 : vector<1x16x8xf32> to vector<16x8xf32>
    %467 = vector.extract_strided_slice %462 {offsets = [2, 0, 0], sizes = [1, 16, 8], strides = [1, 1, 1]} : vector<4x16x8xf32> to vector<1x16x8xf32>
    %468 = vector.shape_cast %467 : vector<1x16x8xf32> to vector<16x8xf32>
    %469 = vector.extract_strided_slice %462 {offsets = [3, 0, 0], sizes = [1, 16, 8], strides = [1, 1, 1]} : vector<4x16x8xf32> to vector<1x16x8xf32>
    %470 = vector.shape_cast %469 : vector<1x16x8xf32> to vector<16x8xf32>
    %471 = tpu.concatenate %464, %466, %468, %470 in 1 : vector<16x8xf32>, vector<16x8xf32>, vector<16x8xf32>, vector<16x8xf32> -> vector<16x32xf32>
    %472 = arith.truncf %471 : vector<16x32xf32> to vector<16x32xbf16>
    %c0_141 = arith.constant 0 : index
    %c0_142 = arith.constant 0 : index
    %473 = vector.load %arg36[%c0_141, %c0_142] : memref<32x32xbf16, #tpu.memory_space<vmem>>, vector<32x32xbf16>
    %cst_143 = arith.constant dense<0.000000e+00> : vector<16x32xf32>
    %474 = tpu.matmul %472, %473, %cst_143 {dimension_numbers = #tpu.dot_dimension_numbers<[1], [0], [0], [1], [0, 0, 1, 1], [], []>} : vector<16x32xbf16>, vector<32x32xbf16>, vector<16x32xf32> -> vector<16x32xf32>
    %c0_144 = arith.constant 0 : index
    %c0_145 = arith.constant 0 : index
    %475 = vector.load %arg37[%c0_144, %c0_145] : memref<1x32xf32, #tpu.memory_space<vmem>>, vector<1x32xf32>
    %476 = vector.broadcast %475 : vector<1x32xf32> to vector<16x32xf32>
    %477 = arith.addf %474, %476 : vector<16x32xf32>
    %478 = arith.addf %376, %477 : vector<16x32xf32>
    %c0_146 = arith.constant 0 : index
    %c0_147 = arith.constant 0 : index
    %479 = vector.load %arg38[%c0_146, %c0_147] : memref<1x32xf32, #tpu.memory_space<vmem>>, vector<1x32xf32>
    %c0_148 = arith.constant 0 : index
    %c0_149 = arith.constant 0 : index
    %480 = vector.load %arg39[%c0_148, %c0_149] : memref<1x32xf32, #tpu.memory_space<vmem>>, vector<1x32xf32>
    %cst_150 = arith.constant dense<0.000000e+00> : vector<16xf32>
    %481 = vector.multi_reduction <add>, %478, %cst_150 [1] : vector<16x32xf32> to vector<16xf32>
    %482 = vector.shape_cast %481 : vector<16xf32> to vector<16x1xf32>
    %cst_151 = arith.constant 3.200000e+01 : f32
    %483 = vector.broadcast %cst_151 : f32 to vector<16x1xf32>
    %484 = arith.divf %482, %483 : vector<16x1xf32>
    %485 = vector.broadcast %484 : vector<16x1xf32> to vector<16x32xf32>
    %486 = arith.subf %478, %485 : vector<16x32xf32>
    %487 = arith.mulf %486, %486 : vector<16x32xf32>
    %cst_152 = arith.constant dense<0.000000e+00> : vector<16xf32>
    %488 = vector.multi_reduction <add>, %487, %cst_152 [1] : vector<16x32xf32> to vector<16xf32>
    %489 = vector.shape_cast %488 : vector<16xf32> to vector<16x1xf32>
    %cst_153 = arith.constant 3.200000e+01 : f32
    %490 = vector.broadcast %cst_153 : f32 to vector<16x1xf32>
    %491 = arith.divf %489, %490 : vector<16x1xf32>
    %492 = vector.broadcast %484 : vector<16x1xf32> to vector<16x32xf32>
    %493 = arith.subf %478, %492 : vector<16x32xf32>
    %cst_154 = arith.constant 9.99999974E-6 : f32
    %494 = vector.broadcast %cst_154 : f32 to vector<16x1xf32>
    %495 = arith.addf %491, %494 : vector<16x1xf32>
    %496 = math.rsqrt %495 : vector<16x1xf32>
    %497 = vector.broadcast %496 : vector<16x1xf32> to vector<16x32xf32>
    %498 = arith.mulf %493, %497 : vector<16x32xf32>
    %499 = vector.broadcast %479 : vector<1x32xf32> to vector<16x32xf32>
    %500 = arith.mulf %498, %499 : vector<16x32xf32>
    %501 = vector.broadcast %480 : vector<1x32xf32> to vector<16x32xf32>
    %502 = arith.addf %500, %501 : vector<16x32xf32>
    %503 = arith.truncf %502 : vector<16x32xf32> to vector<16x32xbf16>
    %c0_155 = arith.constant 0 : index
    %c0_156 = arith.constant 0 : index
    %504 = vector.load %arg40[%c0_155, %c0_156] : memref<32x64xbf16, #tpu.memory_space<vmem>>, vector<32x64xbf16>
    %cst_157 = arith.constant dense<0.000000e+00> : vector<16x64xf32>
    %505 = tpu.matmul %503, %504, %cst_157 {dimension_numbers = #tpu.dot_dimension_numbers<[1], [0], [0], [1], [0, 0, 1, 1], [], []>} : vector<16x32xbf16>, vector<32x64xbf16>, vector<16x64xf32> -> vector<16x64xf32>
    %c0_158 = arith.constant 0 : index
    %c0_159 = arith.constant 0 : index
    %506 = vector.load %arg41[%c0_158, %c0_159] : memref<1x64xf32, #tpu.memory_space<vmem>>, vector<1x64xf32>
    %507 = vector.broadcast %506 : vector<1x64xf32> to vector<16x64xf32>
    %508 = arith.addf %505, %507 : vector<16x64xf32>
    %cst_160 = arith.constant 5.000000e-01 : f32
    %509 = vector.broadcast %cst_160 : f32 to vector<16x64xf32>
    %510 = arith.mulf %509, %508 : vector<16x64xf32>
    %cst_161 = arith.constant 0.707106769 : f32
    %511 = vector.broadcast %cst_161 : f32 to vector<16x64xf32>
    %512 = arith.mulf %508, %511 : vector<16x64xf32>
    %513 = math.absf %512 : vector<16x64xf32>
    %cst_162 = arith.constant 0.327591091 : f32
    %514 = vector.broadcast %cst_162 : f32 to vector<16x64xf32>
    %515 = arith.mulf %514, %513 : vector<16x64xf32>
    %cst_163 = arith.constant 1.000000e+00 : f32
    %516 = vector.broadcast %cst_163 : f32 to vector<16x64xf32>
    %517 = arith.addf %516, %515 : vector<16x64xf32>
    %cst_164 = arith.constant 1.000000e+00 : f32
    %518 = vector.broadcast %cst_164 : f32 to vector<16x64xf32>
    %519 = arith.divf %518, %517 : vector<16x64xf32>
    %cst_165 = arith.constant 1.06140542 : f32
    %520 = vector.broadcast %cst_165 : f32 to vector<16x64xf32>
    %521 = arith.mulf %520, %519 : vector<16x64xf32>
    %cst_166 = arith.constant -1.45315206 : f32
    %522 = vector.broadcast %cst_166 : f32 to vector<16x64xf32>
    %523 = arith.addf %521, %522 : vector<16x64xf32>
    %524 = arith.mulf %523, %519 : vector<16x64xf32>
    %cst_167 = arith.constant 1.42141378 : f32
    %525 = vector.broadcast %cst_167 : f32 to vector<16x64xf32>
    %526 = arith.addf %524, %525 : vector<16x64xf32>
    %527 = arith.mulf %526, %519 : vector<16x64xf32>
    %cst_168 = arith.constant -0.284496725 : f32
    %528 = vector.broadcast %cst_168 : f32 to vector<16x64xf32>
    %529 = arith.addf %527, %528 : vector<16x64xf32>
    %530 = arith.mulf %529, %519 : vector<16x64xf32>
    %cst_169 = arith.constant 0.254829586 : f32
    %531 = vector.broadcast %cst_169 : f32 to vector<16x64xf32>
    %532 = arith.addf %530, %531 : vector<16x64xf32>
    %533 = arith.mulf %532, %519 : vector<16x64xf32>
    %cst_170 = arith.constant 0.000000e+00 : f32
    %534 = vector.broadcast %cst_170 : f32 to vector<16x64xf32>
    %535 = arith.subf %534, %513 : vector<16x64xf32>
    %536 = arith.mulf %535, %513 : vector<16x64xf32>
    %537 = math.exp %536 : vector<16x64xf32>
    %538 = arith.mulf %533, %537 : vector<16x64xf32>
    %cst_171 = arith.constant 1.000000e+00 : f32
    %539 = vector.broadcast %cst_171 : f32 to vector<16x64xf32>
    %540 = arith.subf %539, %538 : vector<16x64xf32>
    %cst_172 = arith.constant 0.000000e+00 : f32
    %541 = vector.broadcast %cst_172 : f32 to vector<16x64xf32>
    %542 = arith.cmpf oge, %512, %541 : vector<16x64xf32>
    %cst_173 = arith.constant 0.000000e+00 : f32
    %543 = vector.broadcast %cst_173 : f32 to vector<16x64xf32>
    %544 = arith.subf %543, %540 : vector<16x64xf32>
    %545 = arith.select %542, %540, %544 : vector<16x64xi1>, vector<16x64xf32>
    %cst_174 = arith.constant 1.000000e+00 : f32
    %546 = vector.broadcast %cst_174 : f32 to vector<16x64xf32>
    %547 = arith.addf %546, %545 : vector<16x64xf32>
    %548 = arith.mulf %510, %547 : vector<16x64xf32>
    %549 = arith.truncf %548 : vector<16x64xf32> to vector<16x64xbf16>
    %c0_175 = arith.constant 0 : index
    %c0_176 = arith.constant 0 : index
    %550 = vector.load %arg42[%c0_175, %c0_176] : memref<64x32xbf16, #tpu.memory_space<vmem>>, vector<64x32xbf16>
    %cst_177 = arith.constant dense<0.000000e+00> : vector<16x32xf32>
    %551 = tpu.matmul %549, %550, %cst_177 {dimension_numbers = #tpu.dot_dimension_numbers<[1], [0], [0], [1], [0, 0, 1, 1], [], []>} : vector<16x64xbf16>, vector<64x32xbf16>, vector<16x32xf32> -> vector<16x32xf32>
    %c0_178 = arith.constant 0 : index
    %c0_179 = arith.constant 0 : index
    %552 = vector.load %arg43[%c0_178, %c0_179] : memref<1x32xf32, #tpu.memory_space<vmem>>, vector<1x32xf32>
    %553 = vector.broadcast %552 : vector<1x32xf32> to vector<16x32xf32>
    %554 = arith.addf %551, %553 : vector<16x32xf32>
    %555 = arith.addf %478, %554 : vector<16x32xf32>
    %c0_180 = arith.constant 0 : index
    %c0_181 = arith.constant 0 : index
    %556 = vector.load %arg44[%c0_180, %c0_181] : memref<1x32xf32, #tpu.memory_space<vmem>>, vector<1x32xf32>
    %c0_182 = arith.constant 0 : index
    %c0_183 = arith.constant 0 : index
    %557 = vector.load %arg45[%c0_182, %c0_183] : memref<1x32xf32, #tpu.memory_space<vmem>>, vector<1x32xf32>
    %cst_184 = arith.constant dense<0.000000e+00> : vector<16xf32>
    %558 = vector.multi_reduction <add>, %555, %cst_184 [1] : vector<16x32xf32> to vector<16xf32>
    %559 = vector.shape_cast %558 : vector<16xf32> to vector<16x1xf32>
    %cst_185 = arith.constant 3.200000e+01 : f32
    %560 = vector.broadcast %cst_185 : f32 to vector<16x1xf32>
    %561 = arith.divf %559, %560 : vector<16x1xf32>
    %562 = vector.broadcast %561 : vector<16x1xf32> to vector<16x32xf32>
    %563 = arith.subf %555, %562 : vector<16x32xf32>
    %564 = arith.mulf %563, %563 : vector<16x32xf32>
    %cst_186 = arith.constant dense<0.000000e+00> : vector<16xf32>
    %565 = vector.multi_reduction <add>, %564, %cst_186 [1] : vector<16x32xf32> to vector<16xf32>
    %566 = vector.shape_cast %565 : vector<16xf32> to vector<16x1xf32>
    %cst_187 = arith.constant 3.200000e+01 : f32
    %567 = vector.broadcast %cst_187 : f32 to vector<16x1xf32>
    %568 = arith.divf %566, %567 : vector<16x1xf32>
    %569 = vector.broadcast %561 : vector<16x1xf32> to vector<16x32xf32>
    %570 = arith.subf %555, %569 : vector<16x32xf32>
    %cst_188 = arith.constant 9.99999974E-6 : f32
    %571 = vector.broadcast %cst_188 : f32 to vector<16x1xf32>
    %572 = arith.addf %568, %571 : vector<16x1xf32>
    %573 = math.rsqrt %572 : vector<16x1xf32>
    %574 = vector.broadcast %573 : vector<16x1xf32> to vector<16x32xf32>
    %575 = arith.mulf %570, %574 : vector<16x32xf32>
    %576 = vector.broadcast %556 : vector<1x32xf32> to vector<16x32xf32>
    %577 = arith.mulf %575, %576 : vector<16x32xf32>
    %578 = vector.broadcast %557 : vector<1x32xf32> to vector<16x32xf32>
    %579 = arith.addf %577, %578 : vector<16x32xf32>
    %c0_189 = arith.constant 0 : index
    %c0_190 = arith.constant 0 : index
    %580 = vector.load %arg46[%c0_189, %c0_190] : memref<16x32xf32, #tpu.memory_space<vmem>>, vector<16x32xf32>
    tpu.vector_store %arg46[%c0_189, %c0_190], %579 {strides = array<i32>} : memref<16x32xf32, #tpu.memory_space<vmem>>, vector<16x32xf32>,
    return
  }
}

</mosaic_0001>

<bundles_post_ra>
// kernel: _lambda_.1
= control target key start
LH: loop header
LB: loop body
LE: loop exit
PB: predicated region body
PF: predicated region fallthrough
CT: control target
= control target key end

     0   :  { %s5048_s6 = smov 1   ;;  %s5049_s10 = smov 2   ;;  %s5983_s0 = inlined_call_operand.smem [shape: u32[47], index: -1, kind: input, shape index: {}] }
   0x1   :  { %s5118_s5 = sld [smem:[%s5983_s0]]   ;;  %s5050_s14 = smov 3  }
   0x2   :  { %s5123_s9 = sld [smem:[%s5983_s0 + %s5048_s6]]   ;;  %s5051_s18 = smov 4  }
   0x3   :  { %s5128_s13 = sld [smem:[%s5983_s0 + %s5049_s10]]   ;;  %s5052_s22 = smov 5  }
   0x4   :  { %s5133_s17 = sld [smem:[%s5983_s0 + %s5050_s14]]   ;;  %s5053_s26 = smov 6  }
   0x5   :  { %s5138_s21 = sld [smem:[%s5983_s0 + %s5051_s18]]   ;;  %s5054_s30 = smov 7  }
   0x6   :  { %s5143_s25 = sld [smem:[%s5983_s0 + %s5052_s22]]   ;;  %s5055_s4 = smov 8  }
   0x7   :  { %s5148_s29 = sld [smem:[%s5983_s0 + %s5053_s26]]   ;;  %s5056_s10 = smov 9  }
   0x8   :  { %s5153_s3 = sld [smem:[%s5983_s0 + %s5054_s30]]   ;;  %s5057_s15 = smov 10  }
   0x9   :  { %s5158_s8 = sld [smem:[%s5983_s0 + %s5055_s4]]   ;;  %s5058_s20 = smov 11  }
   0xa   :  { %5995 = sst [smem:[#allocation15_spill]] %s5133_s17  ;;  %s5059_s26 = smov 12  }
   0xb   :  { %s5163_s14 = sld [smem:[%s5983_s0 + %s5056_s10]]   ;;  %s5060_s1 = smov 13  }
   0xc   :  { %s5168_s19 = sld [smem:[%s5983_s0 + %s5057_s15]]   ;;  %s5061_s7 = smov 14  }
   0xd   :  { %s5173_s24 = sld [smem:[%s5983_s0 + %s5058_s20]]   ;;  %s5062_s15 = smov 15  }
   0xe   :  { %s5178_s30 = sld [smem:[%s5983_s0 + %s5059_s26]]   ;;  %s5063_s22 = smov 16  }
   0xf   :  { %s5183_s6 = sld [smem:[%s5983_s0 + %s5060_s1]]   ;;  %s5064_s28 = smov 17  }
  0x10   :  { %s5188_s12 = sld [smem:[%s5983_s0 + %s5061_s7]]   ;;  %s5065_s7 = smov 18  }
  0x11   :  { %s5193_s20 = sld [smem:[%s5983_s0 + %s5062_s15]]   ;;  %s5066_s15 = smov 19  }
  0x12   :  { %s5198_s27 = sld [smem:[%s5983_s0 + %s5063_s22]]   ;;  %s5067_s22 = smov 20  }
  0x13   :  { %s5203_s4 = sld [smem:[%s5983_s0 + %s5064_s28]]   ;;  %s5068_s28 = smov 21  }
  0x14   :  { %s5208_s17 = sld [smem:[%s5983_s0 + %s5065_s7]]   ;;  %s5069_s7 = smov 22  }
  0x15   :  { %5996 = sst [smem:[#allocation16_spill]] %s5183_s6 }
  0x16   :  { %s5213_s6 = sld [smem:[%s5983_s0 + %s5066_s15]]   ;;  %s5070_s15 = smov 23  }
  0x17   :  { %5997 = sst [smem:[#allocation17_spill]] %s5193_s20 }
  0x18   :  { %5998 = sst [smem:[#allocation18_spill]] %s5198_s27 }
  0x19   :  { %5999 = sst [smem:[#allocation19_spill]] %s5203_s4 }
  0x1a   :  { %6000 = sst [smem:[#allocation20_spill]] %s5208_s17 }
  0x1b   :  { %s5218_s27 = sld [smem:[%s5983_s0 + %s5067_s22]]   ;;  %s5071_s22 = smov 24  }
  0x1c   :  { %6001 = sst [smem:[#allocation21_spill]] %s5213_s6 }
  0x1d   :  { %s5223_s4 = sld [smem:[%s5983_s0 + %s5068_s28]]   ;;  %s5072_s28 = smov 25  }
  0x1e   :  { %s5228_s17 = sld [smem:[%s5983_s0 + %s5069_s7]]   ;;  %s5073_s7 = smov 26  }
  0x1f   :  { %s5233_s6 = sld [smem:[%s5983_s0 + %s5070_s15]]   ;;  %s5074_s15 = smov 27  }
  0x21   :  { %6002 = sst [smem:[#allocation22_spill]] %s5218_s27 }
  0x22   :  { %s5238_s27 = sld [smem:[%s5983_s0 + %s5071_s22]]   ;;  %s5075_s22 = smov 28  }
  0x23   :  { %6003 = sst [smem:[#allocation23_spill]] %s5223_s4 }
  0x24   :  { %6004 = sst [smem:[#allocation24_spill]] %s5228_s17 }
  0x25   :  { %6005 = sst [smem:[#allocation25_spill]] %s5233_s6 }
  0x26   :  { %s5243_s4 = sld [smem:[%s5983_s0 + %s5072_s28]]   ;;  %s5076_s28 = smov 29  }
  0x27   :  { %s5248_s17 = sld [smem:[%s5983_s0 + %s5073_s7]]   ;;  %s5077_s7 = smov 30  }
  0x28   :  { %6006 = sst [smem:[#allocation26_spill]] %s5238_s27 }
  0x29   :  { %s5253_s6 = sld [smem:[%s5983_s0 + %s5074_s15]]   ;;  %s5078_s15 = smov 31  }
  0x2a   :  { %s5258_s27 = sld [smem:[%s5983_s0 + %s5075_s22]]   ;;  %s5079_s22 = smov 32  }
  0x2c   :  { %6007 = sst [smem:[#allocation27_spill]] %s5243_s4 }
  0x2d   :  { %6008 = sst [smem:[#allocation28_spill]] %s5248_s17 }
  0x2e   :  { %s5263_s4 = sld [smem:[%s5983_s0 + %s5076_s28]]   ;;  %s5080_s28 = smov 33  }
  0x2f   :  { %6009 = sst [smem:[#allocation29_spill]] %s5253_s6 }
  0x30   :  { %6010 = sst [smem:[#allocation30_spill]] %s5258_s27 }
  0x31   :  { %s5268_s17 = sld [smem:[%s5983_s0 + %s5077_s7]]   ;;  %s5081_s7 = smov 34  }
  0x32   :  { %s5273_s6 = sld [smem:[%s5983_s0 + %s5078_s15]]   ;;  %s5082_s15 = smov 35  }
  0x33   :  { %s5278_s27 = sld [smem:[%s5983_s0 + %s5079_s22]]   ;;  %s5083_s22 = smov 36  }
  0x34   :  { %6011 = sst [smem:[#allocation31_spill]] %s5263_s4 }
  0x35   :  { %s5283_s4 = sld [smem:[%s5983_s0 + %s5080_s28]]   ;;  %s5084_s28 = smov 37  }
  0x37   :  { %6012 = sst [smem:[#allocation32_spill]] %s5268_s17 }
  0x38   :  { %6013 = sst [smem:[#allocation33_spill]] %s5273_s6 }
  0x39   :  { %6014 = sst [smem:[#allocation34_spill]] %s5278_s27 }
  0x3a   :  { %s5288_s17 = sld [smem:[%s5983_s0 + %s5081_s7]]   ;;  %s5085_s7 = smov 38  }
  0x3b   :  { %6015 = sst [smem:[#allocation35_spill]] %s5283_s4 }
  0x3c   :  { %s5293_s6 = sld [smem:[%s5983_s0 + %s5082_s15]]   ;;  %s5086_s15 = smov 39  }
  0x3d   :  { %s5298_s27 = sld [smem:[%s5983_s0 + %s5083_s22]]   ;;  %s5087_s22 = smov 40  }
  0x3e   :  { %s5303_s4 = sld [smem:[%s5983_s0 + %s5084_s28]]   ;;  %s5088_s28 = smov 41  }
  0x40   :  { %6016 = sst [smem:[#allocation36_spill]] %s5288_s17 }
  0x41   :  { %s5308_s17 = sld [smem:[%s5983_s0 + %s5085_s7]]   ;;  %s5089_s7 = smov 42  }
  0x42   :  { %6017 = sst [smem:[#allocation37_spill]] %s5293_s6 }
  0x43   :  { %6018 = sst [smem:[#allocation38_spill]] %s5298_s27 }
  0x44   :  { %6019 = sst [smem:[#allocation39_spill]] %s5303_s4 }
  0x45   :  { %s5313_s6 = sld [smem:[%s5983_s0 + %s5086_s15]]   ;;  %s5090_s15 = smov 43  }
  0x46   :  { %s5318_s27 = sld [smem:[%s5983_s0 + %s5087_s22]]   ;;  %s5091_s22 = smov 44  }
  0x47   :  { %6020 = sst [smem:[#allocation40_spill]] %s5308_s17 }
  0x48   :  { %s5323_s4 = sld [smem:[%s5983_s0 + %s5088_s28]]   ;;  %s5092_s28 = smov 45  }
  0x49   :  { %s5328_s17 = sld [smem:[%s5983_s0 + %s5089_s7]]   ;;  %s5093_s7 = smov 46  }
  0x4a   :  { %s5343_s20 = sld [smem:[%s5983_s0 + %s5092_s28]]  }
  0x4b   :  { %6021 = sst [smem:[#allocation41_spill]] %s5313_s6 }
  0x4c   :  { %6022 = sst [smem:[#allocation42_spill]] %s5318_s27 }
  0x4d   :  { %s5333_s6 = sld [smem:[%s5983_s0 + %s5090_s15]]  }
  0x4e   :  { %s5338_s27 = sld [smem:[%s5983_s0 + %s5091_s22]]  }
  0x4f   :  { %6023 = sst [smem:[#allocation43_spill]] %s5328_s17 }
  0x50   :  { %s5348_s17 = sld [smem:[%s5983_s0 + %s5093_s7]]  }
  0x51   :  { %98 = vsyncpa [#allocation3], 0 }
  0x52   :  { %99 = vsyncpa [#allocation6], 0 }
  0x53   :  { %100 = vsyncpa [#allocation9], 0 }
  0x54   :  { %101 = vsyncpa [#allocation4], 0  ;;  %s5094_s15 = smov [#allocation5]   ;;  %s5095_s18 = smov [#allocation2]  }
  0x55   :  { %s202_s16 = sshll.u32 %s5094_s15, 4  ;;  %s190_s22 = sshll.u32 %s5095_s18, 4  ;;  %s203_s16 = int_to_ptr.vmem [resolvable:$true] %s202_s16  ;;  %s191_s22 = int_to_ptr.vmem [resolvable:$true] %s190_s22 }
  0x56   :  { %s4930_s23 = scalar_lea.hbm %s5333_s6, 16 }
  0x57   :  { %p4931_p0 = scmp.ne.s32.totalorder %s5333_s6, %s4930_s23  ;;  %p4934_p1 = scmp.lt.u32.totalorder %s4930_s23, %s5333_s6 }
  0x59   :  { %p4936_p2 = pnand %p4934_p1, %p4931_p0 }
  0x5b   :  { %4939 = shalt.err (!%p4936_p2)
}
  0x5c   :  { %s4940_s0 = scalar_lea.vmem %s203_s16, 16  ;;  %s4944_s26 = scalar_lea.vmem %s203_s16, 32 }
  0x5d   :  { %p4941_p3 = scmp.ne.s32.totalorder %s203_s16, %s4940_s0  ;;  %p4945_p4 = scmp.lt.s32.totalorder %s203_s16, %s203_s16 }
  0x5e   :  { %p4946_p5 = scmp.lt.s32.totalorder %s4944_s26, %s4940_s0 }
  0x60   :  { %p4947_p6 = por %p4946_p5, %p4945_p4 }
  0x62   :  { %p4948_p7 = pnand %p4947_p6, %p4941_p3 }
  0x64   :  { %4951 = shalt.err (!%p4948_p7)
}
  0x65   :  { %205 = dma.hbm_to_vmem [thread:$0]  %s5333_s6, 16, %s203_s16, [#allocation6]  }
  0x66   :  { %s4952_s28 = scalar_lea.hbm %s5323_s4, 16 }
  0x67   :  { %p4953_p8 = scmp.ne.s32.totalorder %s5323_s4, %s4952_s28  ;;  %p4956_p9 = scmp.lt.u32.totalorder %s4952_s28, %s5323_s4 }
  0x69   :  { %p4958_p10 = pnand %p4956_p9, %p4953_p8 }
  0x6b   :  { %4961 = shalt.err (!%p4958_p10)
}
  0x6c   :  { %s4962_s1 = scalar_lea.vmem %s191_s22, 16  ;;  %s4966_s2 = scalar_lea.vmem %s191_s22, 32 }
  0x6d   :  { %p4963_p11 = scmp.ne.s32.totalorder %s191_s22, %s4962_s1  ;;  %p4967_p12 = scmp.lt.s32.totalorder %s191_s22, %s191_s22 }
  0x6e   :  { %p4968_p13 = scmp.lt.s32.totalorder %s4966_s2, %s4962_s1 }
  0x70   :  { %p4969_p0 = por %p4968_p13, %p4967_p12 }
  0x72   :  { %p4970_p1 = pnand %p4969_p0, %p4963_p11 }
  0x74   :  { %4973 = shalt.err (!%p4970_p1)
}
  0x75   :  { %193 = dma.hbm_to_vmem [thread:$0]  %s5323_s4, 16, %s191_s22, [#allocation3]  }
  0x76   :  { %s5096_s7 = smov [#allocation7]   ;;  %s5097_s10 = smov [#allocation8]  }
  0x77   :  { %s212_s6 = sshll.u32 %s5096_s7, 4  ;;  %s222_s11 = sshll.u32 %s5097_s10, 4  ;;  %s213_s6 = int_to_ptr.vmem [resolvable:$true] %s212_s6  ;;  %s223_s11 = int_to_ptr.vmem [resolvable:$true] %s222_s11 }
  0x78   :  { %s4974_s15 = scalar_lea.hbm %s5338_s27, 16 }
  0x79   :  { %p4975_p2 = scmp.ne.s32.totalorder %s5338_s27, %s4974_s15  ;;  %p4978_p3 = scmp.lt.u32.totalorder %s4974_s15, %s5338_s27 }
  0x7b   :  { %p4980_p4 = pnand %p4978_p3, %p4975_p2 }
  0x7d   :  { %4983 = shalt.err (!%p4980_p4)
}
  0x7e   :  { %s4984_s16 = scalar_lea.vmem %s213_s6, 16  ;;  %s4988_s18 = scalar_lea.vmem %s213_s6, 32 }
  0x7f   :  { %p4985_p5 = scmp.ne.s32.totalorder %s213_s6, %s4984_s16  ;;  %p4989_p6 = scmp.lt.s32.totalorder %s213_s6, %s213_s6 }
  0x80   :  { %p4990_p7 = scmp.lt.s32.totalorder %s4988_s18, %s4984_s16 }
  0x82   :  { %p4991_p8 = por %p4990_p7, %p4989_p6 }
  0x84   :  { %p4992_p9 = pnand %p4991_p8, %p4985_p5 }
  0x86   :  { %4995 = shalt.err (!%p4992_p9)
}
  0x87   :  { %215 = dma.hbm_to_vmem [thread:$0]  %s5338_s27, 16, %s213_s6, [#allocation6]  }
  0x88   :  { %s4996_s4 = scalar_lea.hbm %s5343_s20, 16 }
  0x89   :  { %p4997_p10 = scmp.ne.s32.totalorder %s5343_s20, %s4996_s4  ;;  %p5000_p11 = scmp.lt.u32.totalorder %s4996_s4, %s5343_s20 }
  0x8b   :  { %p5002_p12 = pnand %p5000_p11, %p4997_p10 }
  0x8d   :  { %5005 = shalt.err (!%p5002_p12)
}
  0x8e   :  { %s5006_s22 = scalar_lea.vmem %s223_s11, 16  ;;  %s5010_s23 = scalar_lea.vmem %s223_s11, 32 }
  0x8f   :  { %p5007_p13 = scmp.ne.s32.totalorder %s223_s11, %s5006_s22  ;;  %p5011_p0 = scmp.lt.s32.totalorder %s223_s11, %s223_s11 }
  0x90   :  { %p5012_p1 = scmp.lt.s32.totalorder %s5010_s23, %s5006_s22 }
  0x92   :  { %p5013_p2 = por %p5012_p1, %p5011_p0 }
  0x94   :  { %p5014_p3 = pnand %p5013_p2, %p5007_p13 }
  0x96   :  { %5017 = shalt.err (!%p5014_p3)
}
  0x97   :  { %225 = dma.hbm_to_vmem [thread:$0]  %s5343_s20, 16, %s223_s11, [#allocation9]  }
  0x98   :  { %5040 = dma.done.wait [#allocation3], 16  }
  0x99   :  { %5041 = vsyncadd [#allocation3], 4294967280 }
  0x9a   :  { %5042 = dma.done.wait [#allocation6], 32  }
  0x9b   :  { %5043 = vsyncadd [#allocation6], 4294967264 }
  0x9c   :  { %5044 = dma.done.wait [#allocation9], 16  }
  0x9d   :  { %5045 = vsyncadd [#allocation9], 4294967280  ;;  %vm249_vm0 = vcmask 261120   ;;  %v5367_v0 = vld [vmem:[%s5118_s5] sm:$0xff]  ;;  %v5370_v1 = vld [vmem:[%s5118_s5 + $0x8] sm:$0xff]  ;;  %v5098_v15 = vmov 0.0  }
  0x9e   :  { %v250_v2 = vsel %vm249_vm0, %v5367_v0, 0.0  ;;  %v253_v3 = vsel %vm249_vm0, %v5370_v1, 0.0  ;;  %v4722_v14 = vld [vmem:[%s5148_s29] sm:$0xff]   ;;  %4168 = vmatprep.subr.bf16.mxu1 %v5098_v15  ;;  %vm5099_vm1 = vmmov 0   ;;  %v4723_v16 = vld [vmem:[%s5148_s29 + $0x8] sm:$0xff]   ;;  %4182 = vmatprep.subr.bf16.mxu0 %v5098_v15  ;;  %s5100_s5 = smov 112  }
  0x9f   :  { %251 = vadd.xlane.f32.xlu0 %v250_v2  ;;  %4172 = vmatprep.mubr.msk.bf16.mxu1 %vm5099_vm1, %v5098_v15  ;;  %v3952_v25 = vld [vmem:[%s5138_s21] ss:$0 sm:$0xff]  ;;  %s5101_s21 = smov 120   ;;  %s5103_s29 = smov 96   ;;  %vm414_vm2 = vcmask 64512   ;;  %vm612_vm3 = vcmask 130048  }
  0xa0   :  { %4169 = vmatpush3.bf16.msra.mxu1 %v4722_v14  ;;  %4184 = vmatprep.mubr.msk.bf16.mxu0 %vm5099_vm1, %v5098_v15  ;;  %v3953_v29 = vld [vmem:[%s5143_s25] ss:$0 sm:$0xff]  ;;  %s5102_s25 = smov 104   ;;  %s5105_s20 = smov 8   ;;  %vm921_vm4 = vcmask 195584   ;;  %vm2002_vm7 = vcmask 523264  }
  0xa1   :  { %4170 = vmatprep.subr.bf16.mxu1 %v5098_v15  ;;  %v3954_v34 = vld [vmem:[%s5153_s3] ss:$0 sm:$0xff]  ;;  %s5104_s3 = smov 64   ;;  %s5106_s27 = smov 16  }
  0xa2   :  { %s5107_s0 = smov 24   ;;  %s6031_s26 = sld [smem:[#allocation21_spill]] }
  0xa3   :  { %254 = vadd.xlane.f32.xlu0 %v253_v3  ;;  %s6032_s28 = sld [smem:[#allocation24_spill]]  ;;  %s6033_s1 = sld [smem:[#allocation23_spill]] }
  0xa4   :  { %4171 = vmatpush3.bf16.msra.mxu1 %v4723_v16  ;;  %s6034_s2 = sld [smem:[#allocation25_spill]]  ;;  %s6035_s7 = sld [smem:[#allocation28_spill]] }
  0xa5   :  { %4176 = vmatprep.subr.bf16.mxu1 %v5098_v15  ;;  %s6036_s6 = sld [smem:[#allocation26_spill]]  ;;  %s6037_s10 = sld [smem:[#allocation27_spill]] }
  0xa6   :  { %s6038_s11 = sld [smem:[#allocation29_spill]]  ;;  %s6040_s15 = sld [smem:[#allocation31_spill]] }
  0xa7   :  { %s6041_s16 = sld [smem:[#allocation36_spill]]  ;;  %s6042_s18 = sld [smem:[#allocation34_spill]] }
  0xa8   :  { %s6043_s4 = sld [smem:[#allocation32_spill]]  ;;  %s6044_s22 = sld [smem:[#allocation33_spill]] }
  0xa9   :  { %s6045_s23 = sld [smem:[#allocation37_spill]] }
 0x12c   :  { %v252_v4 = vpop.xlane.xlu0 %251 }
 0x12d   :  { %v257_v5 = vmul.f32 0.03125, %v252_v4 }
 0x12f   :  { %v259_v6 = vsub.f32 %v5367_v0, %v257_v5 }
 0x130   :  { %v255_v7 = vpop.xlane.xlu0 %254 }
 0x131   :  { %v258_v8 = vmul.f32 0.03125, %v255_v7  ;;  %v261_v9 = vmul.f32 %v259_v6, %v259_v6 }
 0x133   :  { %v260_v10 = vsub.f32 %v5370_v1, %v258_v8  ;;  %v263_v11 = vsel %vm249_vm0, %v261_v9, 0.0 }
 0x134   :  { %264 = vadd.xlane.f32.xlu1 %v263_v11 }
 0x135   :  { %v262_v12 = vmul.f32 %v260_v10, %v260_v10 }
 0x137   :  { %v266_v13 = vsel %vm249_vm0, %v262_v12, 0.0 }
 0x138   :  { %267 = vadd.xlane.f32.xlu1 %v266_v13 }
 0x1c1   :  { %v265_v17 = vpop.xlane.xlu1 %264 }
 0x1c2   :  { %v269_v18 = vmul.f32 0.03125, %v265_v17 }
 0x1c4   :  { %v271_v19 = vadd.f32 1e-05, %v269_v18  ;;  %v243_v18 = vld [vmem:[%s5128_s13] sm:$0xff] }
 0x1c5   :  { %v268_v20 = vpop.xlane.xlu1 %267 }
 0x1c6   :  { %4754 = vrsqrt.f32 %v271_v19  ;;  %v270_v21 = vmul.f32 0.03125, %v268_v20  ;;  %v244_v20 = vld [vmem:[%s5128_s13 + $0x8] sm:$0xff] }
 0x1c8   :  { %v272_v22 = vadd.f32 1e-05, %v270_v21 }
 0x1ca   :  { %4756 = vrsqrt.f32 %v272_v22 }
 0x1d0   :  { %v4755_v23 = vpop.eup %4754 }
 0x1d1   :  { %v275_v24 = vmul.f32 %v4755_v23, %v259_v6 }
 0x1d3   :  { %v283_v28 = vmul.f32 %v3952_v25, %v275_v24 }
 0x1d4   :  { %v4757_v26 = vpop.eup %4756 }
 0x1d5   :  { %v276_v27 = vmul.f32 %v4757_v26, %v260_v10  ;;  %v291_v31 = vadd.f32 %v3953_v29, %v283_v28 }
 0x1d7   :  { %v284_v30 = vmul.f32 %v3952_v25, %v276_v27 }
 0x1d9   :  { %v292_v32 = vadd.f32 %v3953_v29, %v284_v30 }
 0x1db   :  { %v293_v33 = vpack.c.bf16 %v292_v32, %v291_v31 }
 0x1dd   :  { %4173 = vmatmul.mubr.msk.bf16.vlgmr.msra.gmra.mrb[0].mxu1 %vm249_vm0, %v293_v33 }
 0x1de   :  { %4178 = vmatprep.mubr.msk.bf16.mxu1 %vm5099_vm1, %v5098_v15 }
 0x2b0   :  { %v354_v35 = vpop.f32.mrb[0].mxu1 }
 0x2b1   :  { %v4174_v36 = vpop.f32.mrb[1].mxu1  ;;  %v355_v37 = vadd.f32 %v3954_v34, %v354_v35 }
 0x2b2   :  { %v357_v38 = vpop.f32.mrb[2].mxu1 }
 0x2b3   :  { %v358_v39 = vadd.f32 %v3954_v34, %v357_v38  ;;  %v4175_v40 = vpop.f32.mrb[3].mxu1  ;;  %v361_v43 = vmul.f32 0.35355338, %v355_v37 }
 0x2b5   :  { %v4547_v41 = vpack.i.bf16 %v358_v39, %v355_v37  ;;  %v5396_v42 = vpack.c.bf16 %v358_v39, %v355_v37  ;;  %v362_v44 = vmul.f32 0.35355338, %v358_v39 }
 0x2b7   :  { %4548 = vrot.lane.b32.xlu1 %v4547_v41, %s5100_s5  ;;  %4543 = vrot.lane.b32.xlu0 %v4547_v41, %s5101_s21  ;;  %v4557_v45 = vpack.i.bf16 %v362_v44, %v361_v43  ;;  %v383_v46 = vpack.c.bf16 %v362_v44, %v361_v43 }
 0x2bb   :  { %4553 = vrot.lane.b32.xlu1 %v4547_v41, %s5102_s25 }
 0x2bf   :  { %412 = vrot.lane.b32.xlu1 %v5396_v42, %s5103_s29 }
 0x2c3   :  { %4558 = vrot.lane.b32.xlu1 %v4557_v45, %s5101_s21 }
 0x329   :  { %v4549_v47 = vpop.permute.xlu1 %4548  ;;  %v4544_v48 = vpop.permute.xlu0 %4543 }
 0x32a   :  { %v4546_v49 = vunpack.i.h.bf16 %v4544_v48  ;;  %v4545_v50 = vunpack.i.l.bf16 %v4544_v48  ;;  %v4551_v51 = vunpack.i.h.bf16 %v4549_v47  ;;  %v4550_v52 = vunpack.i.l.bf16 %v4549_v47 }
 0x32c   :  { %v5404_v53 = vpack.c.bf16 %v4546_v49, %v4545_v50  ;;  %v5408_v57 = vpack.c.bf16 %v4551_v51, %v4550_v52 }
 0x32d   :  { %v4554_v54 = vpop.permute.xlu1 %4553 }
 0x32e   :  { %v4556_v55 = vunpack.i.h.bf16 %v4554_v54  ;;  %v4555_v56 = vunpack.i.l.bf16 %v4554_v54  ;;  %463 = vrot.lane.b32.xlu0 %v5404_v53, %s5103_s29 }
 0x330   :  { %v5410_v58 = vpack.c.bf16 %v4556_v55, %v4555_v56 }
 0x331   :  { %v413_v59 = vpop.permute.xlu1 %412 }
 0x332   :  { %v419_v60 = vsel %vm414_vm2, %v413_v59, 0  ;;  %513 = vrot.lane.b32.xlu0 %v5408_v57, %s5103_s29  ;;  %563 = vrot.lane.b32.xlu1 %v5410_v58, %s5103_s29 }
 0x333   :  { %4177 = vmatpush3.bf16.xpose.msra.mxu1 %v419_v60 }
 0x334   :  { %4188 = vmatprep.subr.bf16.mxu1 %v5098_v15 }
 0x335   :  { %v4559_v61 = vpop.permute.xlu1 %4558 }
 0x336   :  { %4563 = vrot.lane.b32.xlu0 %v4557_v45, %s5100_s5  ;;  %4568 = vrot.lane.b32.xlu1 %v4557_v45, %s5102_s25  ;;  %v4561_v2 = vunpack.i.h.bf16 %v4559_v61  ;;  %v4560_v3 = vunpack.i.l.bf16 %v4559_v61 }
 0x338   :  { %v384_v7 = vpack.c.bf16 %v4561_v2, %v4560_v3 }
 0x33a   :  { %4179 = vmatmul.mubr.msk.bf16.vlgmr.msra.gmra.mrb[4].mxu1 %vm414_vm2, %v383_v46 }
 0x33b   :  { %4190 = vmatprep.mubr.msk.bf16.mxu1 %vm5099_vm1, %v5098_v15 }
 0x3a0   :  { %v464_v62 = vpop.permute.xlu0 %463 }
 0x3a1   :  { %v469_v63 = vsel %vm414_vm2, %v464_v62, 0 }
 0x3a2   :  { %4183 = vmatpush3.bf16.xpose.msra.mxu0 %v469_v63 }
 0x3a3   :  { %4194 = vmatprep.subr.bf16.mxu0 %v5098_v15 }
 0x3a4   :  { %v514_v4 = vpop.permute.xlu0 %513  ;;  %v564_v5 = vpop.permute.xlu1 %563 }
 0x3a5   :  { %v519_v6 = vsel %vm414_vm2, %v514_v4, 0  ;;  %v569_v10 = vsel %vm414_vm2, %v564_v5, 0 }
 0x3a6   :  { %4189 = vmatpush3.bf16.xpose.msra.mxu1 %v519_v6 }
 0x3a7   :  { %4200 = vmatprep.subr.bf16.mxu1 %v5098_v15 }
 0x3a8   :  { %v4564_v8 = vpop.permute.xlu0 %4563  ;;  %v4569_v9 = vpop.permute.xlu1 %4568 }
 0x3a9   :  { %v4566_v11 = vunpack.i.h.bf16 %v4564_v8  ;;  %v4565_v12 = vunpack.i.l.bf16 %v4564_v8  ;;  %4185 = vmatmul.mubr.msk.bf16.vlgmr.msra.gmra.mrb[0].mxu0 %vm414_vm2, %v384_v7  ;;  %v4571_v14 = vunpack.i.h.bf16 %v4569_v9  ;;  %v4570_v16 = vunpack.i.l.bf16 %v4569_v9 }
 0x3aa   :  { %4195 = vmatpush3.bf16.xpose.msra.mxu0 %v569_v10  ;;  %4196 = vmatprep.mubr.msk.bf16.mxu0 %vm5099_vm1, %v5098_v15 }
 0x3ab   :  { %v385_v13 = vpack.c.bf16 %v4566_v11, %v4565_v12  ;;  %4206 = vmatprep.subr.bf16.mxu0 %v5098_v15  ;;  %v386_v17 = vpack.c.bf16 %v4571_v14, %v4570_v16 }
 0x3ad   :  { %4191 = vmatmul.mubr.msk.bf16.vlgmr.msra.gmra.mrb[8].mxu1 %vm414_vm2, %v385_v13 }
 0x3ae   :  { %4202 = vmatprep.mubr.msk.bf16.mxu1 %vm5099_vm1, %v5098_v15 }
 0x3b1   :  { %4197 = vmatmul.mubr.msk.bf16.vlgmr.msra.gmra.mrb[4].mxu0 %vm414_vm2, %v386_v17 }
 0x3b2   :  { %4208 = vmatprep.mubr.msk.bf16.mxu0 %vm5099_vm1, %v5098_v15 }
 0x40d   :  { %v455_v19 = vpop.f32.mrb[4].mxu1 }
 0x40e   :  { %v456_v21 = vadd.f32 %v455_v19, %v243_v18  ;;  %v4180_v22 = vpop.f32.mrb[5].mxu1 }
 0x40f   :  { %v458_v23 = vpop.f32.mrb[6].mxu1 }
 0x410   :  { %v459_v24 = vadd.f32 %v458_v23, %v244_v20  ;;  %v4181_v25 = vpop.f32.mrb[7].mxu1  ;;  %v613_v26 = vsel %vm612_vm3, %v456_v21, -inf }
 0x411   :  { %614 = vmax.xlane.f32.xlu0 %v613_v26 }
 0x412   :  { %v616_v27 = vsel %vm612_vm3, %v459_v24, -inf }
 0x413   :  { %617 = vmax.xlane.f32.xlu1 %v616_v27 }
 0x47c   :  { %v505_v28 = vpop.f32.mrb[0].mxu0 }
 0x47d   :  { %v506_v29 = vadd.f32 %v505_v28, %v243_v18  ;;  %v4186_v30 = vpop.f32.mrb[1].mxu0 }
 0x47e   :  { %v508_v31 = vpop.f32.mrb[2].mxu0 }
 0x47f   :  { %v4187_v32 = vpop.f32.mrb[3].mxu0  ;;  %v619_v33 = vsel %vm612_vm3, %v506_v29, -inf  ;;  %v509_v38 = vadd.f32 %v508_v31, %v244_v20 }
 0x480   :  { %620 = vmax.xlane.f32.xlu0 %v619_v33  ;;  %v555_v34 = vpop.f32.mrb[8].mxu1 }
 0x481   :  { %v556_v35 = vadd.f32 %v555_v34, %v243_v18  ;;  %v4192_v36 = vpop.f32.mrb[9].mxu1  ;;  %v622_v49 = vsel %vm612_vm3, %v509_v38, -inf }
 0x482   :  { %v558_v37 = vpop.f32.mrb[10].mxu1 }
 0x483   :  { %v559_v39 = vadd.f32 %v558_v37, %v244_v20  ;;  %v4193_v40 = vpop.f32.mrb[11].mxu1  ;;  %v625_v41 = vsel %vm612_vm3, %v556_v35, -inf }
 0x484   :  { %v605_v43 = vpop.f32.mrb[4].mxu0  ;;  %626 = vmax.xlane.f32.xlu0 %v625_v41 }
 0x485   :  { %v4198_v44 = vpop.f32.mrb[5].mxu0  ;;  %v628_v45 = vsel %vm612_vm3, %v559_v39, -inf  ;;  %v606_v47 = vadd.f32 %v605_v43, %v243_v18 }
 0x486   :  { %v608_v46 = vpop.f32.mrb[6].mxu0  ;;  %629 = vmax.xlane.f32.xlu1 %v628_v45 }
 0x487   :  { %v4199_v48 = vpop.f32.mrb[7].mxu0  ;;  %v631_v50 = vsel %vm612_vm3, %v606_v47, -inf  ;;  %v5453_v51 = vadd.f32 %v608_v46, %v244_v20 }
 0x488   :  { %623 = vmax.xlane.f32.xlu0 %v622_v49  ;;  %v4724_v48 = vld [vmem:[%s5158_s8] sm:$0xff]  }
 0x489   :  { %v634_v52 = vsel %vm612_vm3, %v5453_v51, -inf }
 0x48c   :  { %632 = vmax.xlane.f32.xlu0 %v631_v50 }
 0x497   :  { %736 = vrot.lane.b32.xlu1 %v5404_v53, %s5104_s3 }
 0x49b   :  { %783 = vrot.lane.b32.xlu1 %v5408_v57, %s5104_s3 }
 0x49e   :  { %v615_v55 = vpop.xlane.xlu0 %614 }
 0x49f   :  { %v637_v59 = vsub.f32 %v456_v21, %v615_v55 }
 0x4a0   :  { %v618_v54 = vpop.xlane.xlu1 %617 }
 0x4a1   :  { %v638_v56 = vsub.f32 %v459_v24, %v618_v54  ;;  %v645_v57 = vmul.f32 1.442695, %v637_v59 }
 0x4a2   :  { %689 = vrot.lane.b32.xlu0 %v5396_v42, %s5104_s3 }
 0x4a3   :  { %v647_v53 = vmul.f32 1.442695, %v638_v56 }
 0x4a5   :  { %4758 = vpow2.f32 %v647_v53 }
 0x4af   :  { %v4759_v11 = vpop.eup %4758 }
 0x4bf   :  { %635 = vmax.xlane.f32.xlu1 %v634_v52 }
 0x4d0   :  { %830 = vrot.lane.b32.xlu1 %v5410_v58, %s5104_s3 }
 0x50d   :  { %v621_v60 = vpop.xlane.xlu0 %620 }
 0x50e   :  { %v639_v61 = vsub.f32 %v506_v29, %v621_v60 }
 0x510   :  { %v649_v62 = vmul.f32 1.442695, %v639_v61 }
 0x511   :  { %v627_v42 = vpop.xlane.xlu0 %626 }
 0x512   :  { %4760 = vpow2.f32 %v649_v62  ;;  %v641_v63 = vsub.f32 %v556_v35, %v627_v42 }
 0x513   :  { %v630_v2 = vpop.xlane.xlu1 %629  ;;  %4762 = vpow2.f32 %v645_v57 }
 0x514   :  { %v653_v3 = vmul.f32 1.442695, %v641_v63  ;;  %v642_v4 = vsub.f32 %v559_v39, %v630_v2 }
 0x515   :  { %v624_v5 = vpop.xlane.xlu0 %623 }
 0x516   :  { %4764 = vpow2.f32 %v653_v3  ;;  %v655_v58 = vmul.f32 1.442695, %v642_v4  ;;  %v640_v6 = vsub.f32 %v509_v38, %v624_v5  ;;  %v664_v38 = vsel %vm612_vm3, %v4759_v11, 0.0 }
 0x517   :  { %v737_v7 = vpop.permute.xlu1 %736 }
 0x518   :  { %4766 = vpow2.f32 %v655_v58  ;;  %v651_v8 = vmul.f32 1.442695, %v640_v6  ;;  %4207 = vmatpush3.bf16.msra.mxu0 %v737_v7  ;;  %v4725_v6 = vld [vmem:[%s5158_s8 + $0x8] sm:$0xff]   ;;  %s6025_s8 = sld [smem:[#allocation16_spill]] }
 0x519   :  { %v633_v9 = vpop.xlane.xlu0 %632  ;;  %4218 = vmatprep.subr.bf16.mxu0 %v5098_v15 }
 0x51a   :  { %4768 = vpow2.f32 %v651_v8  ;;  %v643_v10 = vsub.f32 %v606_v47, %v633_v9 }
 0x51b   :  { %v784_v20 = vpop.permute.xlu1 %783 }
 0x51c   :  { %v4761_v12 = vpop.eup %4760  ;;  %v657_v13 = vmul.f32 1.442695, %v643_v10 }
 0x51d   :  { %v690_v14 = vpop.permute.xlu0 %689  ;;  %v667_v16 = vsel %vm612_vm3, %v4761_v12, 0.0  ;;  %v4763_v17 = vpop.eup %4762 }
 0x51e   :  { %4770 = vpow2.f32 %v657_v13  ;;  %668 = vadd.xlane.f32.xlu0 %v667_v16  ;;  %4201 = vmatpush3.bf16.msra.mxu1 %v690_v14  ;;  %v685_v18 = vpack.c.bf16 %v4759_v11, %v4763_v17  ;;  %v661_v30 = vsel %vm612_vm3, %v4763_v17, 0.0 }
 0x51f   :  { %4212 = vmatprep.subr.bf16.mxu1 %v5098_v15 }
 0x520   :  { %v4765_v19 = vpop.eup %4764 }
 0x521   :  { %4203 = vmatmul.mubr.msk.bf16.vlgmr.msra.gmra.mrb[12].mxu1 %vm612_vm3, %v685_v18  ;;  %v673_v21 = vsel %vm612_vm3, %v4765_v19, 0.0 }
 0x522   :  { %v4767_v22 = vpop.eup %4766  ;;  %674 = vadd.xlane.f32.xlu0 %v673_v21  ;;  %4213 = vmatpush3.bf16.msra.mxu1 %v784_v20 }
 0x523   :  { %4214 = vmatprep.mubr.msk.bf16.mxu1 %vm5099_vm1, %v5098_v15  ;;  %4224 = vmatprep.subr.bf16.mxu1 %v5098_v15  ;;  %v676_v25 = vsel %vm612_vm3, %v4767_v22, 0.0  ;;  %v687_v27 = vpack.c.bf16 %v4767_v22, %v4765_v19 }
 0x524   :  { %v4769_v23 = vpop.eup %4768 }
 0x525   :  { %v670_v24 = vsel %vm612_vm3, %v4769_v23, 0.0  ;;  %v686_v26 = vpack.c.bf16 %v4769_v23, %v4761_v12 }
 0x526   :  { %671 = vadd.xlane.f32.xlu1 %v670_v24  ;;  %677 = vadd.xlane.f32.xlu0 %v676_v25 }
 0x527   :  { %4209 = vmatmul.mubr.msk.bf16.vlgmr.msra.gmra.mrb[8].mxu0 %vm612_vm3, %v686_v26 }
 0x528   :  { %v4771_v28 = vpop.eup %4770  ;;  %4220 = vmatprep.mubr.msk.bf16.mxu0 %vm5099_vm1, %v5098_v15 }
 0x529   :  { %4215 = vmatmul.mubr.msk.bf16.vlgmr.msra.gmra.mrb[16].mxu1 %vm612_vm3, %v687_v27  ;;  %v679_v29 = vsel %vm612_vm3, %v4771_v28, 0.0 }
 0x52a   :  { %680 = vadd.xlane.f32.xlu0 %v679_v29  ;;  %4228 = vmatprep.mubr.msk.bf16.mxu1 %vm5099_vm1, %v5098_v15 }
 0x52b   :  { %4225 = vmatpush3.bf16.msra.mxu1 %v4724_v48 }
 0x52c   :  { %4226 = vmatprep.subr.bf16.mxu1 %v5098_v15 }
 0x52e   :  { %662 = vadd.xlane.f32.xlu0 %v661_v30 }
 0x52f   :  { %4227 = vmatpush3.bf16.msra.mxu1 %v4725_v6 }
 0x530   :  { %4240 = vmatprep.subr.bf16.mxu1 %v5098_v15 }
 0x54c   :  { %v636_v31 = vpop.xlane.xlu1 %635 }
 0x54d   :  { %v644_v32 = vsub.f32 %v5453_v51, %v636_v31 }
 0x54f   :  { %v659_v33 = vmul.f32 1.442695, %v644_v32 }
 0x550   :  { %v831_v34 = vpop.permute.xlu1 %830 }
 0x551   :  { %4772 = vpow2.f32 %v659_v33  ;;  %4219 = vmatpush3.bf16.msra.mxu0 %v831_v34 }
 0x552   :  { %4232 = vmatprep.subr.bf16.mxu0 %v5098_v15 }
 0x55b   :  { %v4773_v35 = vpop.eup %4772 }
 0x55c   :  { %v682_v36 = vsel %vm612_vm3, %v4773_v35, 0.0  ;;  %v688_v37 = vpack.c.bf16 %v4773_v35, %v4771_v28 }
 0x55d   :  { %683 = vadd.xlane.f32.xlu1 %v682_v36 }
 0x55e   :  { %4221 = vmatmul.mubr.msk.bf16.vlgmr.msra.gmra.mrb[12].mxu0 %vm612_vm3, %v688_v37 }
 0x55f   :  { %4236 = vmatprep.mubr.msk.bf16.mxu0 %vm5099_vm1, %v5098_v15 }
 0x561   :  { %665 = vadd.xlane.f32.xlu1 %v664_v38 }
 0x5ab   :  { %v669_v39 = vpop.xlane.xlu0 %668 }
 0x5ac   :  { %4774 = vrcp.f32 %v669_v39  ;;  %v3966_v39 = vld [vmem:[%s5163_s14] ss:$0 sm:$0xff]  ;;  %s6026_s14 = sld [smem:[#allocation15_spill]] }
 0x5af   :  { %v675_v40 = vpop.xlane.xlu0 %674 }
 0x5b3   :  { %v672_v41 = vpop.xlane.xlu1 %671  ;;  %v678_v43 = vpop.xlane.xlu0 %677 }
 0x5b4   :  { %4776 = vrcp.f32 %v672_v41 }
 0x5b5   :  { %4778 = vrcp.f32 %v675_v40 }
 0x5b6   :  { %4780 = vrcp.f32 %v678_v43  ;;  %v4775_v50 = vpop.eup %4774 }
 0x5b7   :  { %v681_v5 = vpop.xlane.xlu0 %680 }
 0x5b8   :  { %4782 = vrcp.f32 %v681_v5 }
 0x5bb   :  { %v663_v18 = vpop.xlane.xlu0 %662 }
 0x5be   :  { %v4777_v52 = vpop.eup %4776 }
 0x5bf   :  { %v4779_v56 = vpop.eup %4778 }
 0x5c0   :  { %v4781_v57 = vpop.eup %4780 }
 0x5c2   :  { %v4783_v8 = vpop.eup %4782 }
 0x5ea   :  { %v684_v58 = vpop.xlane.xlu1 %683 }
 0x5eb   :  { %4784 = vrcp.f32 %v684_v58 }
 0x5ee   :  { %v666_v17 = vpop.xlane.xlu1 %665 }
 0x5ef   :  { %4786 = vrcp.f32 %v666_v17 }
 0x5f0   :  { %4788 = vrcp.f32 %v663_v18 }
 0x5f4   :  { %v729_v44 = vpop.f32.mrb[12].mxu1 }
 0x5f5   :  { %v4204_v45 = vpop.f32.mrb[13].mxu1  ;;  %v4785_v10 = vpop.eup %4784 }
 0x5f6   :  { %v732_v46 = vpop.f32.mrb[14].mxu1 }
 0x5f7   :  { %v4205_v47 = vpop.f32.mrb[15].mxu1 }
 0x5f9   :  { %v4787_v20 = vpop.eup %4786 }
 0x5fa   :  { %v776_v49 = vpop.f32.mrb[8].mxu0  ;;  %v4789_v24 = vpop.eup %4788  ;;  %v886_v26 = vmul.f32 %v4787_v20, %v732_v46 }
 0x5fb   :  { %v4210_v51 = vpop.f32.mrb[9].mxu0  ;;  %v887_v59 = vmul.f32 %v4775_v50, %v776_v49  ;;  %v885_v25 = vmul.f32 %v4789_v24, %v729_v44 }
 0x5fc   :  { %v779_v54 = vpop.f32.mrb[10].mxu0  ;;  %v823_v55 = vpop.f32.mrb[16].mxu1 }
 0x5fd   :  { %v888_v53 = vmul.f32 %v4777_v52, %v779_v54  ;;  %v4211_v60 = vpop.f32.mrb[11].mxu0  ;;  %v4216_v61 = vpop.f32.mrb[17].mxu1  ;;  %v889_v63 = vmul.f32 %v4779_v56, %v823_v55 }
 0x5fe   :  { %v826_v62 = vpop.f32.mrb[18].mxu1  ;;  %v4726_v61 = vld [vmem:[%s5188_s12] sm:$0xff]  }
 0x5ff   :  { %v4572_v42 = vpack.i.bf16 %v888_v53, %v887_v59  ;;  %v890_v2 = vmul.f32 %v4781_v57, %v826_v62  ;;  %v4217_v3 = vpop.f32.mrb[19].mxu1  ;;  %v4727_v57 = vld [vmem:[%s5188_s12 + $0x8] sm:$0xff]   ;;  %v241_v62 = vld [vmem:[%s5123_s9] sm:$0xff]  ;;  %s6030_s12 = sld [smem:[#allocation20_spill]] }
 0x600   :  { %v4729_v3 = vld [vmem:[%s5178_s30 + $0x8] sm:$0xff]  }
 0x601   :  { %v4577_v4 = vpack.i.bf16 %v890_v2, %v889_v63  ;;  %4573 = vrot.lane.b32.xlu0 %v4572_v42, %s5105_s20  ;;  %v242_v42 = vld [vmem:[%s5123_s9 + $0x8] sm:$0xff]  ;;  %v4728_v63 = vld [vmem:[%s5178_s30] sm:$0xff]   ;;  %s6024_s9 = sld [smem:[#allocation17_spill]]  ;;  %s6029_s30 = sld [smem:[#allocation22_spill]] }
 0x602   :  { %v5521_v2 = vpack.c.bf16 %v242_v42, %v241_v62  ;;  %4233 = vmatpush3.bf16.msra.mxu0 %v4728_v63 }
 0x603   :  { %4578 = vrot.lane.b32.xlu1 %v4577_v4, %s5106_s27  ;;  %4234 = vmatprep.subr.bf16.mxu0 %v5098_v15 }
 0x606   :  { %4235 = vmatpush3.bf16.msra.mxu0 %v4729_v3 }
 0x607   :  { %4248 = vmatprep.subr.bf16.mxu0 %v5098_v15 }
 0x631   :  { %v870_v7 = vpop.f32.mrb[12].mxu0 }
 0x632   :  { %v4222_v9 = vpop.f32.mrb[13].mxu0  ;;  %v891_v12 = vmul.f32 %v4783_v8, %v870_v7 }
 0x633   :  { %v873_v11 = vpop.f32.mrb[14].mxu0 }
 0x634   :  { %v892_v13 = vmul.f32 %v4785_v10, %v873_v11  ;;  %v4223_v14 = vpop.f32.mrb[15].mxu0  ;;  %v3970_v11 = vld [vmem:[%s5168_s19] ss:$0 sm:$0xff]  ;;  %s6027_s19 = sld [smem:[#allocation18_spill]] }
 0x636   :  { %v4582_v16 = vpack.i.bf16 %v892_v13, %v891_v12 }
 0x638   :  { %4583 = vrot.lane.b32.xlu1 %v4582_v16, %s5107_s0  ;;  %v3971_v16 = vld [vmem:[%s5173_s24] ss:$0 sm:$0xff]  ;;  %s6028_s24 = sld [smem:[#allocation19_spill]] }
 0x673   :  { %v4574_v19 = vpop.permute.xlu0 %4573 }
 0x674   :  { %v4576_v21 = vunpack.i.h.bf16 %v4574_v19  ;;  %v4575_v22 = vunpack.i.l.bf16 %v4574_v19 }
 0x675   :  { %v4579_v23 = vpop.permute.xlu1 %4578 }
 0x676   :  { %v4581_v27 = vunpack.i.h.bf16 %v4579_v23  ;;  %v4580_v28 = vunpack.i.l.bf16 %v4579_v23  ;;  %v917_v29 = vsel %vm414_vm2, %v885_v25, %v4575_v22  ;;  %v918_v30 = vsel %vm414_vm2, %v886_v26, %v4576_v21  ;;  %v3976_v21 = vld [vmem:[%s6024_s9] ss:$0 sm:$0xff]  ;;  %s5108_s9 = smov [#allocation10]  }
 0x678   :  { %v920_v34 = vsel %vm612_vm3, %v918_v30, %v4581_v27  ;;  %v919_v35 = vsel %vm612_vm3, %v917_v29, %v4580_v28 }
 0x6aa   :  { %v4584_v31 = vpop.permute.xlu1 %4583 }
 0x6ab   :  { %v4586_v32 = vunpack.i.h.bf16 %v4584_v31  ;;  %v4585_v33 = vunpack.i.l.bf16 %v4584_v31 }
 0x6ad   :  { %v922_v36 = vsel %vm921_vm4, %v919_v35, %v4585_v33  ;;  %v923_v37 = vsel %vm921_vm4, %v920_v34, %v4586_v32 }
 0x6ae   :  { %v924_v38 = vpack.c.bf16 %v923_v37, %v922_v36  ;;  %v3972_v37 = vld [vmem:[%s6025_s8] ss:$0 sm:$0xff]  ;;  %s3892_s8 = sshll.u32 %s5108_s9, 4  ;;  %s3893_s8 = int_to_ptr.vmem [resolvable:$true] %s3892_s8 }
 0x6af   :  { %p5023_p5 = scmp.lt.s32.totalorder %s3893_s8, %s3893_s8 }
 0x6b0   :  { %4229 = vmatmul.mubr.msk.bf16.vlgmr.msra.gmra.mrb[20].mxu1 %vm249_vm0, %v924_v38 }
 0x6b1   :  { %4244 = vmatprep.mubr.msk.bf16.mxu1 %vm5099_vm1, %v5098_v15  ;;  %4241 = vmatpush3.bf16.msra.mxu1 %v4726_v61 }
 0x6b2   :  { %4242 = vmatprep.subr.bf16.mxu1 %v5098_v15 }
 0x6b5   :  { %4243 = vmatpush3.bf16.msra.mxu1 %v4727_v57 }
 0x6b6   :  { %4254 = vmatprep.subr.bf16.mxu1 %v5098_v15 }
 0x6b8   :  { %4245 = vmatmul.mubr.msk.bf16.vlgmr.msra.gmra.mrb[24].mxu1 %vm249_vm0, %v5521_v2 }
 0x6b9   :  { %4256 = vmatprep.mubr.msk.bf16.mxu1 %vm5099_vm1, %v5098_v15 }
 0x783   :  { %v985_v40 = vpop.f32.mrb[20].mxu1 }
 0x784   :  { %v986_v41 = vadd.f32 %v3966_v39, %v985_v40  ;;  %v4230_v43 = vpop.f32.mrb[21].mxu1 }
 0x785   :  { %v988_v44 = vpop.f32.mrb[22].mxu1 }
 0x786   :  { %v5502_v45 = vadd.f32 %v986_v41, %v5367_v0  ;;  %v989_v46 = vadd.f32 %v3966_v39, %v988_v44  ;;  %v4231_v47 = vpop.f32.mrb[23].mxu1 }
 0x788   :  { %v5505_v48 = vadd.f32 %v989_v46, %v5370_v1  ;;  %v996_v49 = vsel %vm249_vm0, %v5502_v45, 0.0 }
 0x789   :  { %997 = vadd.xlane.f32.xlu1 %v996_v49 }
 0x78a   :  { %v999_v50 = vsel %vm249_vm0, %v5505_v48, 0.0 }
 0x78b   :  { %1000 = vadd.xlane.f32.xlu0 %v999_v50  ;;  %v1167_v22 = vpop.f32.mrb[24].mxu1 }
 0x78c   :  { %v4246_v23 = vpop.f32.mrb[25].mxu1  ;;  %v1168_v24 = vadd.f32 %v3976_v21, %v1167_v22 }
 0x78d   :  { %v1170_v25 = vpop.f32.mrb[26].mxu1 }
 0x78e   :  { %v1171_v26 = vadd.f32 %v3976_v21, %v1170_v25  ;;  %v4247_v27 = vpop.f32.mrb[27].mxu1 }
 0x790   :  { %v4592_v28 = vpack.i.bf16 %v1171_v26, %v1168_v24  ;;  %v1220_v29 = vpack.c.bf16 %v1171_v26, %v1168_v24 }
 0x792   :  { %v1228_v30 = vsel %vm414_vm2, %v1220_v29, 0 }
 0x79a   :  { %4588 = vrot.lane.b32.xlu1 %v4592_v28, %s5101_s21 }
 0x816   :  { %v998_v51 = vpop.xlane.xlu1 %997 }
 0x817   :  { %v1002_v52 = vmul.f32 0.03125, %v998_v51 }
 0x818   :  { %v1001_v0 = vpop.xlane.xlu0 %1000 }
 0x819   :  { %v1004_v54 = vsub.f32 %v5502_v45, %v1002_v52  ;;  %v1003_v1 = vmul.f32 0.03125, %v1001_v0 }
 0x81a   :  { %v4589_v31 = vpop.permute.xlu1 %4588 }
 0x81b   :  { %v1005_v55 = vsub.f32 %v5505_v48, %v1003_v1  ;;  %v1006_v56 = vmul.f32 %v1004_v54, %v1004_v54  ;;  %v4591_v32 = vunpack.i.h.bf16 %v4589_v31  ;;  %v4590_v33 = vunpack.i.l.bf16 %v4589_v31 }
 0x81d   :  { %v1008_v59 = vsel %vm249_vm0, %v1006_v56, 0.0  ;;  %v1007_v53 = vmul.f32 %v1005_v55, %v1005_v55  ;;  %v5541_v34 = vpack.c.bf16 %v4591_v32, %v4590_v33 }
 0x81e   :  { %1009 = vadd.xlane.f32.xlu0 %v1008_v59 }
 0x81f   :  { %v1011_v60 = vsel %vm249_vm0, %v1007_v53, 0.0  ;;  %v1275_v35 = vsel %vm414_vm2, %v5541_v34, 0 }
 0x820   :  { %4255 = vmatpush3.bf16.xpose.msra.mxu1 %v1275_v35 }
 0x821   :  { %4266 = vmatprep.subr.bf16.mxu1 %v5098_v15 }
 0x822   :  { %1012 = vadd.xlane.f32.xlu0 %v1011_v60 }
 0x838   :  { %4593 = vrot.lane.b32.xlu0 %v4592_v28, %s5100_s5 }
 0x8ab   :  { %v1010_v4 = vpop.xlane.xlu0 %1009 }
 0x8ac   :  { %v1014_v5 = vmul.f32 0.03125, %v1010_v4 }
 0x8ae   :  { %v1016_v58 = vadd.f32 1e-05, %v1014_v5 }
 0x8af   :  { %v1013_v6 = vpop.xlane.xlu0 %1012 }
 0x8b0   :  { %4790 = vrsqrt.f32 %v1016_v58  ;;  %v1015_v7 = vmul.f32 0.03125, %v1013_v6 }
 0x8b2   :  { %v1017_v8 = vadd.f32 1e-05, %v1015_v7 }
 0x8b3   :  { %v4594_v36 = vpop.permute.xlu0 %4593 }
 0x8b4   :  { %4792 = vrsqrt.f32 %v1017_v8  ;;  %v4596_v39 = vunpack.i.h.bf16 %v4594_v36  ;;  %v4595_v40 = vunpack.i.l.bf16 %v4594_v36 }
 0x8b6   :  { %v5547_v49 = vpack.c.bf16 %v4596_v39, %v4595_v40 }
 0x8ba   :  { %v4791_v9 = vpop.eup %4790 }
 0x8bb   :  { %v1020_v10 = vmul.f32 %v4791_v9, %v1004_v54  ;;  %v1322_v54 = vsel %vm414_vm2, %v5547_v49, 0  ;;  %v245_v9 = vld [vmem:[%s6026_s14] sm:$0xff] }
 0x8bd   :  { %v1028_v13 = vmul.f32 %v3970_v11, %v1020_v10 }
 0x8be   :  { %v4793_v12 = vpop.eup %4792 }
 0x8bf   :  { %v1021_v14 = vmul.f32 %v4793_v12, %v1005_v55  ;;  %v1036_v18 = vadd.f32 %v3971_v16, %v1028_v13 }
 0x8c1   :  { %v1029_v17 = vmul.f32 %v3970_v11, %v1021_v14  ;;  %v246_v11 = vld [vmem:[%s6026_s14 + $0x8] sm:$0xff] }
 0x8c3   :  { %v1037_v19 = vadd.f32 %v3971_v16, %v1029_v17 }
 0x8c5   :  { %v1038_v20 = vpack.c.bf16 %v1037_v19, %v1036_v18 }
 0x8c7   :  { %4237 = vmatmul.mubr.msk.bf16.vlgmr.msra.gmra.mrb[16].mxu0 %vm249_vm0, %v1038_v20 }
 0x8c8   :  { %4250 = vmatprep.mubr.msk.bf16.mxu0 %vm5099_vm1, %v5098_v15  ;;  %4249 = vmatpush3.bf16.xpose.msra.mxu0 %v1228_v30 }
 0x8c9   :  { %4260 = vmatprep.subr.bf16.mxu0 %v5098_v15 }
 0x99a   :  { %v1099_v38 = vpop.f32.mrb[16].mxu0 }
 0x99b   :  { %v1100_v41 = vadd.f32 %v3972_v37, %v1099_v38  ;;  %v4238_v43 = vpop.f32.mrb[17].mxu0 }
 0x99c   :  { %v1102_v44 = vpop.f32.mrb[18].mxu0 }
 0x99d   :  { %v1103_v46 = vadd.f32 %v3972_v37, %v1102_v44  ;;  %v4239_v47 = vpop.f32.mrb[19].mxu0  ;;  %v1174_v50 = vmul.f32 0.35355338, %v1100_v41 }
 0x99f   :  { %v1175_v51 = vmul.f32 0.35355338, %v1103_v46 }
 0x9a1   :  { %v1196_v52 = vpack.c.bf16 %v1175_v51, %v1174_v50  ;;  %v4612_v0 = vpack.i.bf16 %v1175_v51, %v1174_v50 }
 0x9a3   :  { %4613 = vrot.lane.b32.xlu0 %v4612_v0, %s5102_s25  ;;  %4598 = vrot.lane.b32.xlu1 %v4612_v0, %s5101_s21 }
 0x9a4   :  { %4251 = vmatmul.mubr.msk.bf16.vlgmr.msra.gmra.mrb[20].mxu0 %vm414_vm2, %v1196_v52 }
 0x9a5   :  { %4261 = vmatpush3.bf16.xpose.msra.mxu0 %v1322_v54  ;;  %4262 = vmatprep.mubr.msk.bf16.mxu0 %vm5099_vm1, %v5098_v15 }
 0x9a6   :  { %4272 = vmatprep.subr.bf16.mxu0 %v5098_v15 }
 0x9a7   :  { %4603 = vrot.lane.b32.xlu1 %v4592_v28, %s5102_s25 }
 0x9ab   :  { %4608 = vrot.lane.b32.xlu1 %v4612_v0, %s5100_s5 }
 0x9af   :  { %1489 = vrot.lane.b32.xlu1 %v1220_v29, %s5103_s29 }
 0xa15   :  { %v4599_v1 = vpop.permute.xlu1 %4598  ;;  %v4614_v62 = vpop.permute.xlu0 %4613 }
 0xa16   :  { %v4601_v55 = vunpack.i.h.bf16 %v4599_v1  ;;  %v4600_v56 = vunpack.i.l.bf16 %v4599_v1  ;;  %v4616_v5 = vunpack.i.h.bf16 %v4614_v62  ;;  %v4615_v58 = vunpack.i.l.bf16 %v4614_v62 }
 0xa18   :  { %v1197_v59 = vpack.c.bf16 %v4601_v55, %v4600_v56  ;;  %v1199_v8 = vpack.c.bf16 %v4616_v5, %v4615_v58 }
 0xa19   :  { %v4604_v53 = vpop.permute.xlu1 %4603 }
 0xa1a   :  { %v4606_v60 = vunpack.i.h.bf16 %v4604_v53  ;;  %v4605_v61 = vunpack.i.l.bf16 %v4604_v53  ;;  %4257 = vmatmul.mubr.msk.bf16.vlgmr.msra.gmra.mrb[28].mxu1 %vm414_vm2, %v1197_v59 }
 0xa1b   :  { %4268 = vmatprep.mubr.msk.bf16.mxu1 %vm5099_vm1, %v5098_v15 }
 0xa1c   :  { %v5563_v57 = vpack.c.bf16 %v4606_v60, %v4605_v61 }
 0xa1d   :  { %v4609_v42 = vpop.permute.xlu1 %4608 }
 0xa1e   :  { %v4611_v63 = vunpack.i.h.bf16 %v4609_v42  ;;  %v4610_v3 = vunpack.i.l.bf16 %v4609_v42  ;;  %v1369_v4 = vsel %vm414_vm2, %v5563_v57, 0 }
 0xa1f   :  { %4267 = vmatpush3.bf16.xpose.msra.mxu1 %v1369_v4 }
 0xa20   :  { %v1198_v6 = vpack.c.bf16 %v4611_v63, %v4610_v3  ;;  %4278 = vmatprep.subr.bf16.mxu1 %v5098_v15 }
 0xa21   :  { %v1490_v7 = vpop.permute.xlu1 %1489 }
 0xa22   :  { %4263 = vmatmul.mubr.msk.bf16.vlgmr.msra.gmra.mrb[24].mxu0 %vm414_vm2, %v1198_v6 }
 0xa23   :  { %4273 = vmatpush3.bf16.msra.mxu0 %v1490_v7  ;;  %4274 = vmatprep.mubr.msk.bf16.mxu0 %vm5099_vm1, %v5098_v15 }
 0xa24   :  { %4284 = vmatprep.subr.bf16.mxu0 %v5098_v15 }
 0xa26   :  { %4269 = vmatmul.mubr.msk.bf16.vlgmr.msra.gmra.mrb[32].mxu1 %vm414_vm2, %v1199_v8 }
 0xa27   :  { %4280 = vmatprep.mubr.msk.bf16.mxu1 %vm5099_vm1, %v5098_v15 }
 0xa77   :  { %v1264_v10 = vpop.f32.mrb[20].mxu0 }
 0xa78   :  { %v1265_v12 = vadd.f32 %v1264_v10, %v245_v9  ;;  %v4252_v13 = vpop.f32.mrb[21].mxu0 }
 0xa79   :  { %v1267_v14 = vpop.f32.mrb[22].mxu0 }
 0xa7a   :  { %v1268_v16 = vadd.f32 %v1267_v14, %v246_v11  ;;  %v4253_v17 = vpop.f32.mrb[23].mxu0  ;;  %v1412_v18 = vsel %vm612_vm3, %v1265_v12, -inf }
 0xa7b   :  { %1413 = vmax.xlane.f32.xlu1 %v1412_v18 }
 0xa7c   :  { %v1415_v19 = vsel %vm612_vm3, %v1268_v16, -inf }
 0xa7d   :  { %1416 = vmax.xlane.f32.xlu0 %v1415_v19 }
 0xaed   :  { %v1311_v20 = vpop.f32.mrb[28].mxu1 }
 0xaee   :  { %v1312_v21 = vadd.f32 %v1311_v20, %v245_v9  ;;  %v4258_v22 = vpop.f32.mrb[29].mxu1 }
 0xaef   :  { %v1314_v23 = vpop.f32.mrb[30].mxu1 }
 0xaf0   :  { %v1315_v24 = vadd.f32 %v1314_v23, %v246_v11  ;;  %v4259_v25 = vpop.f32.mrb[31].mxu1  ;;  %v1418_v26 = vsel %vm612_vm3, %v1312_v21, -inf }
 0xaf1   :  { %1419 = vmax.xlane.f32.xlu0 %v1418_v26 }
 0xaf2   :  { %v1421_v27 = vsel %vm612_vm3, %v1315_v24, -inf }
 0xaf5   :  { %v1358_v28 = vpop.f32.mrb[24].mxu0  ;;  %1422 = vmax.xlane.f32.xlu0 %v1421_v27 }
 0xaf6   :  { %v1359_v29 = vadd.f32 %v1358_v28, %v245_v9  ;;  %v4264_v30 = vpop.f32.mrb[25].mxu0 }
 0xaf7   :  { %v1361_v31 = vpop.f32.mrb[26].mxu0 }
 0xaf8   :  { %v1362_v32 = vadd.f32 %v1361_v31, %v246_v11  ;;  %v4265_v33 = vpop.f32.mrb[27].mxu0  ;;  %v1424_v35 = vsel %vm612_vm3, %v1359_v29, -inf }
 0xaf9   :  { %1425 = vmax.xlane.f32.xlu1 %v1424_v35  ;;  %v1405_v36 = vpop.f32.mrb[32].mxu1 }
 0xafa   :  { %v1406_v37 = vadd.f32 %v1405_v36, %v245_v9  ;;  %v4270_v38 = vpop.f32.mrb[33].mxu1  ;;  %v1427_v39 = vsel %vm612_vm3, %v1362_v32, -inf }
 0xafb   :  { %1428 = vmax.xlane.f32.xlu0 %v1427_v39  ;;  %v1408_v40 = vpop.f32.mrb[34].mxu1 }
 0xafc   :  { %v1409_v41 = vadd.f32 %v1408_v40, %v246_v11  ;;  %v4271_v43 = vpop.f32.mrb[35].mxu1  ;;  %v1430_v44 = vsel %vm612_vm3, %v1406_v37, -inf }
 0xafd   :  { %1431 = vmax.xlane.f32.xlu1 %v1430_v44 }
 0xafe   :  { %v1433_v46 = vsel %vm612_vm3, %v1409_v41, -inf }
 0xaff   :  { %1434 = vmax.xlane.f32.xlu0 %v1433_v46 }
 0xb08   :  { %v1414_v47 = vpop.xlane.xlu1 %1413 }
 0xb09   :  { %v1436_v50 = vsub.f32 %v1265_v12, %v1414_v47  ;;  %v4730_v47 = vld [vmem:[%s6027_s19] sm:$0xff]  }
 0xb0a   :  { %v1417_v51 = vpop.xlane.xlu0 %1416 }
 0xb0b   :  { %v1444_v52 = vmul.f32 1.442695, %v1436_v50  ;;  %v1437_v0 = vsub.f32 %v1268_v16, %v1417_v51 }
 0xb0d   :  { %v1446_v54 = vmul.f32 1.442695, %v1437_v0  ;;  %4794 = vpow2.f32 %v1444_v52 }
 0xb0e   :  { %1585 = vrot.lane.b32.xlu1 %v5547_v49, %s5103_s29 }
 0xb0f   :  { %4796 = vpow2.f32 %v1446_v54 }
 0xb12   :  { %1633 = vrot.lane.b32.xlu1 %v5563_v57, %s5103_s29 }
 0xb15   :  { %1537 = vrot.lane.b32.xlu0 %v5541_v34, %s5103_s29 }
 0xb17   :  { %v4795_v1 = vpop.eup %4794 }
 0xb18   :  { %v1460_v27 = vsel %vm612_vm3, %v4795_v1, 0.0 }
 0xb19   :  { %v5591_v55 = vpop.eup %4796 }
 0xb1a   :  { %v1484_v56 = vpack.c.bf16 %v5591_v55, %v4795_v1  ;;  %v1463_v30 = vsel %vm612_vm3, %v5591_v55, 0.0  ;;  %v4731_v55 = vld [vmem:[%s6027_s19 + $0x8] sm:$0xff]  }
 0xb1c   :  { %4275 = vmatmul.mubr.msk.bf16.vlgmr.msra.gmra.mrb[28].mxu0 %vm612_vm3, %v1484_v56 }
 0xb1d   :  { %4286 = vmatprep.mubr.msk.bf16.mxu0 %vm5099_vm1, %v5098_v15 }
 0xb7e   :  { %v1420_v59 = vpop.xlane.xlu0 %1419 }
 0xb7f   :  { %v1438_v53 = vsub.f32 %v1312_v21, %v1420_v59 }
 0xb81   :  { %v1448_v49 = vmul.f32 1.442695, %v1438_v53 }
 0xb82   :  { %v1423_v60 = vpop.xlane.xlu0 %1422 }
 0xb83   :  { %4798 = vpow2.f32 %v1448_v49  ;;  %v1439_v61 = vsub.f32 %v1315_v24, %v1423_v60 }
 0xb85   :  { %v1450_v57 = vmul.f32 1.442695, %v1439_v61 }
 0xb86   :  { %v1426_v62 = vpop.xlane.xlu1 %1425 }
 0xb87   :  { %4800 = vpow2.f32 %v1450_v57  ;;  %v1440_v34 = vsub.f32 %v1359_v29, %v1426_v62 }
 0xb88   :  { %v1429_v42 = vpop.xlane.xlu0 %1428 }
 0xb89   :  { %v1452_v63 = vmul.f32 1.442695, %v1440_v34  ;;  %v1441_v3 = vsub.f32 %v1362_v32, %v1429_v42 }
 0xb8a   :  { %v1432_v4 = vpop.xlane.xlu1 %1431 }
 0xb8b   :  { %4802 = vpow2.f32 %v1452_v63  ;;  %v1454_v5 = vmul.f32 1.442695, %v1441_v3  ;;  %v1442_v58 = vsub.f32 %v1406_v37, %v1432_v4 }
 0xb8c   :  { %v1435_v6 = vpop.xlane.xlu0 %1434 }
 0xb8d   :  { %v4799_v7 = vpop.eup %4798  ;;  %4804 = vpow2.f32 %v1454_v5  ;;  %v1456_v8 = vmul.f32 1.442695, %v1442_v58  ;;  %v1443_v9 = vsub.f32 %v1409_v41, %v1435_v6 }
 0xb8e   :  { %v1586_v10 = vpop.permute.xlu1 %1585  ;;  %v1466_v11 = vsel %vm612_vm3, %v4799_v7, 0.0 }
 0xb8f   :  { %4806 = vpow2.f32 %v1456_v8  ;;  %v1458_v12 = vmul.f32 1.442695, %v1443_v9  ;;  %1467 = vadd.xlane.f32.xlu1 %v1466_v11  ;;  %4285 = vmatpush3.bf16.msra.mxu0 %v1586_v10 }
 0xb90   :  { %v1538_v13 = vpop.permute.xlu0 %1537  ;;  %4296 = vmatprep.subr.bf16.mxu0 %v5098_v15 }
 0xb91   :  { %v4801_v14 = vpop.eup %4800  ;;  %4808 = vpow2.f32 %v1458_v12  ;;  %4279 = vmatpush3.bf16.msra.mxu1 %v1538_v13 }
 0xb92   :  { %v1485_v16 = vpack.c.bf16 %v4801_v14, %v4799_v7  ;;  %4290 = vmatprep.subr.bf16.mxu1 %v5098_v15  ;;  %v1634_v17 = vpop.permute.xlu1 %1633  ;;  %v1469_v24 = vsel %vm612_vm3, %v4801_v14, 0.0 }
 0xb94   :  { %4281 = vmatmul.mubr.msk.bf16.vlgmr.msra.gmra.mrb[36].mxu1 %vm612_vm3, %v1485_v16 }
 0xb95   :  { %v4803_v18 = vpop.eup %4802  ;;  %4291 = vmatpush3.bf16.msra.mxu1 %v1634_v17  ;;  %4292 = vmatprep.mubr.msk.bf16.mxu1 %vm5099_vm1, %v5098_v15 }
 0xb96   :  { %v1472_v19 = vsel %vm612_vm3, %v4803_v18, 0.0  ;;  %4304 = vmatprep.subr.bf16.mxu1 %v5098_v15 }
 0xb97   :  { %v4805_v20 = vpop.eup %4804  ;;  %1473 = vadd.xlane.f32.xlu0 %v1472_v19 }
 0xb98   :  { %v1486_v21 = vpack.c.bf16 %v4805_v20, %v4803_v18  ;;  %v1475_v28 = vsel %vm612_vm3, %v4805_v20, 0.0 }
 0xb99   :  { %v4807_v22 = vpop.eup %4806 }
 0xb9a   :  { %4287 = vmatmul.mubr.msk.bf16.vlgmr.msra.gmra.mrb[32].mxu0 %vm612_vm3, %v1486_v21  ;;  %v1478_v23 = vsel %vm612_vm3, %v4807_v22, 0.0 }
 0xb9b   :  { %v4809_v25 = vpop.eup %4808  ;;  %1479 = vadd.xlane.f32.xlu1 %v1478_v23  ;;  %1470 = vadd.xlane.f32.xlu0 %v1469_v24 }
 0xb9c   :  { %v1487_v26 = vpack.c.bf16 %v4809_v25, %v4807_v22  ;;  %4300 = vmatprep.mubr.msk.bf16.mxu0 %vm5099_vm1, %v5098_v15  ;;  %v1481_v29 = vsel %vm612_vm3, %v4809_v25, 0.0  ;;  %4297 = vmatpush3.bf16.msra.mxu0 %v4730_v47 }
 0xb9d   :  { %4298 = vmatprep.subr.bf16.mxu0 %v5098_v15 }
 0xb9e   :  { %4293 = vmatmul.mubr.msk.bf16.vlgmr.msra.gmra.mrb[40].mxu1 %vm612_vm3, %v1487_v26 }
 0xb9f   :  { %1461 = vadd.xlane.f32.xlu1 %v1460_v27  ;;  %1476 = vadd.xlane.f32.xlu0 %v1475_v28 }
 0xba0   :  { %4308 = vmatprep.mubr.msk.bf16.mxu1 %vm5099_vm1, %v5098_v15  ;;  %4299 = vmatpush3.bf16.msra.mxu0 %v4731_v55  ;;  %v4732_v55 = vld [vmem:[%s6029_s30] sm:$0xff]  }
 0xba1   :  { %4312 = vmatprep.subr.bf16.mxu0 %v5098_v15  ;;  %4305 = vmatpush3.bf16.msra.mxu1 %v4732_v55 }
 0xba2   :  { %4306 = vmatprep.subr.bf16.mxu1 %v5098_v15 }
 0xba3   :  { %1482 = vadd.xlane.f32.xlu0 %v1481_v29 }
 0xba7   :  { %1464 = vadd.xlane.f32.xlu0 %v1463_v30 }
 0xbef   :  { %v5618_v31 = vpop.f32.mrb[28].mxu0 }
 0xbf0   :  { %v4276_v32 = vpop.f32.mrb[29].mxu0 }
 0xbf1   :  { %v5620_v33 = vpop.f32.mrb[30].mxu0 }
 0xbf2   :  { %v4277_v35 = vpop.f32.mrb[31].mxu0 }
 0xc1c   :  { %v1468_v38 = vpop.xlane.xlu1 %1467 }
 0xc1d   :  { %4810 = vrcp.f32 %v1468_v38 }
 0xc24   :  { %v1474_v36 = vpop.xlane.xlu0 %1473 }
 0xc27   :  { %v4811_v44 = vpop.eup %4810 }
 0xc28   :  { %v1471_v37 = vpop.xlane.xlu0 %1470  ;;  %v1480_v40 = vpop.xlane.xlu1 %1479 }
 0xc29   :  { %4812 = vrcp.f32 %v1471_v37 }
 0xc2a   :  { %4814 = vrcp.f32 %v1474_v36 }
 0xc2c   :  { %v1477_v39 = vpop.xlane.xlu0 %1476  ;;  %v1462_v9 = vpop.xlane.xlu1 %1461 }
 0xc2d   :  { %4816 = vrcp.f32 %v1477_v39 }
 0xc2e   :  { %4818 = vrcp.f32 %v1480_v40 }
 0xc30   :  { %v1483_v41 = vpop.xlane.xlu0 %1482 }
 0xc31   :  { %4820 = vrcp.f32 %v1483_v41 }
 0xc32   :  { %4822 = vrcp.f32 %v1462_v9  ;;  %v4734_v9 = vld [vmem:[%s6032_s28] sm:$0xff]  }
 0xc33   :  { %v4813_v50 = vpop.eup %4812 }
 0xc34   :  { %v4815_v59 = vpop.eup %4814  ;;  %v1465_v10 = vpop.xlane.xlu0 %1464 }
 0xc35   :  { %4824 = vrcp.f32 %v1465_v10  ;;  %v4735_v10 = vld [vmem:[%s6032_s28 + $0x8] sm:$0xff]  }
 0xc37   :  { %v4817_v49 = vpop.eup %4816 }
 0xc38   :  { %v4819_v42 = vpop.eup %4818 }
 0xc3b   :  { %v4821_v4 = vpop.eup %4820 }
 0xc3c   :  { %v4823_v12 = vpop.eup %4822 }
 0xc3d   :  { %v1688_v20 = vmul.f32 %v4823_v12, %v5618_v31  ;;  %v3988_v31 = vld [vmem:[%s6028_s24] ss:$0 sm:$0xff]  ;;  %v4737_v12 = vld [vmem:[%s6032_s28 + $0x18] sm:$0xff]  }
 0xc3f   :  { %v4825_v13 = vpop.eup %4824 }
 0xc40   :  { %v1689_v21 = vmul.f32 %v4825_v13, %v5620_v33  ;;  %v3994_v13 = vld [vmem:[%s6033_s1] ss:$0 sm:$0xff] }
 0xc67   :  { %v1577_v43 = vpop.f32.mrb[36].mxu1 }
 0xc68   :  { %v4282_v46 = vpop.f32.mrb[37].mxu1  ;;  %v1690_v52 = vmul.f32 %v4811_v44, %v1577_v43 }
 0xc69   :  { %v1580_v51 = vpop.f32.mrb[38].mxu1 }
 0xc6a   :  { %v1691_v0 = vmul.f32 %v4813_v50, %v1580_v51  ;;  %v4283_v54 = vpop.f32.mrb[39].mxu1 }
 0xc6c   :  { %v4617_v1 = vpack.i.bf16 %v1691_v0, %v1690_v52 }
 0xc6d   :  { %v1625_v56 = vpop.f32.mrb[32].mxu0 }
 0xc6e   :  { %v4288_v53 = vpop.f32.mrb[33].mxu0  ;;  %4618 = vrot.lane.b32.xlu1 %v4617_v1, %s5105_s20  ;;  %v1692_v61 = vmul.f32 %v4815_v59, %v1625_v56  ;;  %v4733_v56 = vld [vmem:[%s6029_s30 + $0x8] sm:$0xff]  }
 0xc6f   :  { %v1628_v60 = vpop.f32.mrb[34].mxu0  ;;  %4307 = vmatpush3.bf16.msra.mxu1 %v4733_v56 }
 0xc70   :  { %v1693_v57 = vmul.f32 %v4817_v49, %v1628_v60  ;;  %v4289_v62 = vpop.f32.mrb[35].mxu0  ;;  %4324 = vmatprep.subr.bf16.mxu1 %v5098_v15 }
 0xc71   :  { %v1673_v34 = vpop.f32.mrb[40].mxu1 }
 0xc72   :  { %v4622_v63 = vpack.i.bf16 %v1693_v57, %v1692_v61  ;;  %v4294_v3 = vpop.f32.mrb[41].mxu1  ;;  %v1694_v58 = vmul.f32 %v4819_v42, %v1673_v34  ;;  %v3992_v34 = vld [vmem:[%s6030_s12] ss:$0 sm:$0xff] }
 0xc73   :  { %v1676_v5 = vpop.f32.mrb[42].mxu1 }
 0xc74   :  { %v1695_v6 = vmul.f32 %v4821_v4, %v1676_v5  ;;  %4623 = vrot.lane.b32.xlu0 %v4622_v63, %s5106_s27  ;;  %v4295_v7 = vpop.f32.mrb[43].mxu1  ;;  %v3993_v5 = vld [vmem:[%s6031_s26] ss:$0 sm:$0xff] }
 0xc76   :  { %v4627_v8 = vpack.i.bf16 %v1695_v6, %v1694_v58 }
 0xc78   :  { %4628 = vrot.lane.b32.xlu1 %v4627_v8, %s5107_s0 }
 0xce0   :  { %v4619_v11 = vpop.permute.xlu1 %4618 }
 0xce1   :  { %v4621_v16 = vunpack.i.h.bf16 %v4619_v11  ;;  %v4620_v17 = vunpack.i.l.bf16 %v4619_v11  ;;  %v4736_v11 = vld [vmem:[%s6032_s28 + $0x10] sm:$0xff]  }
 0xce3   :  { %v1721_v23 = vsel %vm414_vm2, %v1689_v21, %v4621_v16  ;;  %v1720_v24 = vsel %vm414_vm2, %v1688_v20, %v4620_v17 }
 0xce6   :  { %v4624_v14 = vpop.permute.xlu0 %4623 }
 0xce7   :  { %v4626_v18 = vunpack.i.h.bf16 %v4624_v14  ;;  %v4625_v19 = vunpack.i.l.bf16 %v4624_v14 }
 0xce9   :  { %v1722_v27 = vsel %vm612_vm3, %v1720_v24, %v4625_v19  ;;  %v1723_v28 = vsel %vm612_vm3, %v1721_v23, %v4626_v18 }
 0xcea   :  { %v4629_v22 = vpop.permute.xlu1 %4628 }
 0xceb   :  { %v4631_v25 = vunpack.i.h.bf16 %v4629_v22  ;;  %v4630_v26 = vunpack.i.l.bf16 %v4629_v22 }
 0xced   :  { %v1725_v29 = vsel %vm921_vm4, %v1723_v28, %v4631_v25  ;;  %v1724_v30 = vsel %vm921_vm4, %v1722_v27, %v4630_v26 }
 0xcee   :  { %v1726_v32 = vpack.c.bf16 %v1725_v29, %v1724_v30 }
 0xcf0   :  { %4301 = vmatmul.mubr.msk.bf16.vlgmr.msra.gmra.mrb[36].mxu0 %vm249_vm0, %v1726_v32 }
 0xcf1   :  { %4320 = vmatprep.mubr.msk.bf16.mxu0 %vm5099_vm1, %v5098_v15  ;;  %4313 = vmatpush3.bf16.msra.mxu0 %v4734_v9 }
 0xcf2   :  { %4314 = vmatprep.subr.bf16.mxu0 %v5098_v15 }
 0xcf5   :  { %4315 = vmatpush3.bf16.msra.mxu0 %v4735_v10 }
 0xcf6   :  { %4316 = vmatprep.subr.bf16.mxu0 %v5098_v15 }
 0xcf9   :  { %4317 = vmatpush3.bf16.msra.mxu0 %v4736_v11  ;;  %v3998_v11 = vld [vmem:[%s6034_s2] ss:$0 sm:$0xff] }
 0xcfa   :  { %4318 = vmatprep.subr.bf16.mxu0 %v5098_v15 }
 0xcfd   :  { %4319 = vmatpush3.bf16.msra.mxu0 %v4737_v12 }
 0xcfe   :  { %4338 = vmatprep.subr.bf16.mxu0 %v5098_v15 }
 0xdc3   :  { %v1787_v33 = vpop.f32.mrb[36].mxu0 }
 0xdc4   :  { %v1788_v35 = vadd.f32 %v3988_v31, %v1787_v33  ;;  %v4302_v36 = vpop.f32.mrb[37].mxu0 }
 0xdc5   :  { %v1790_v37 = vpop.f32.mrb[38].mxu0 }
 0xdc6   :  { %v5642_v38 = vadd.f32 %v1788_v35, %v5502_v45  ;;  %v1791_v39 = vadd.f32 %v3988_v31, %v1790_v37  ;;  %v4303_v40 = vpop.f32.mrb[39].mxu0 }
 0xdc8   :  { %v5645_v41 = vadd.f32 %v1791_v39, %v5505_v48  ;;  %v1798_v43 = vsel %vm249_vm0, %v5642_v38, 0.0 }
 0xdc9   :  { %1799 = vadd.xlane.f32.xlu1 %v1798_v43 }
 0xdca   :  { %v1801_v44 = vsel %vm249_vm0, %v5645_v41, 0.0 }
 0xdcb   :  { %1802 = vadd.xlane.f32.xlu0 %v1801_v44 }
 0xe56   :  { %v1800_v46 = vpop.xlane.xlu1 %1799 }
 0xe57   :  { %v1804_v47 = vmul.f32 0.03125, %v1800_v46 }
 0xe58   :  { %v1803_v50 = vpop.xlane.xlu0 %1802 }
 0xe59   :  { %v1806_v45 = vsub.f32 %v5642_v38, %v1804_v47  ;;  %v1805_v51 = vmul.f32 0.03125, %v1803_v50 }
 0xe5b   :  { %v1807_v52 = vsub.f32 %v5645_v41, %v1805_v51  ;;  %v1808_v48 = vmul.f32 %v1806_v45, %v1806_v45 }
 0xe5d   :  { %v1810_v0 = vsel %vm249_vm0, %v1808_v48, 0.0  ;;  %v1809_v54 = vmul.f32 %v1807_v52, %v1807_v52 }
 0xe5e   :  { %1811 = vadd.xlane.f32.xlu0 %v1810_v0 }
 0xe5f   :  { %v1813_v1 = vsel %vm249_vm0, %v1809_v54, 0.0 }
 0xe60   :  { %1814 = vadd.xlane.f32.xlu1 %v1813_v1 }
 0xeeb   :  { %v1812_v59 = vpop.xlane.xlu0 %1811 }
 0xeec   :  { %v1816_v53 = vmul.f32 0.03125, %v1812_v59 }
 0xeed   :  { %v1815_v49 = vpop.xlane.xlu1 %1814 }
 0xeee   :  { %v1818_v60 = vadd.f32 1e-05, %v1816_v53  ;;  %v1817_v61 = vmul.f32 0.03125, %v1815_v49 }
 0xef0   :  { %4826 = vrsqrt.f32 %v1818_v60  ;;  %v1819_v57 = vadd.f32 1e-05, %v1817_v61 }
 0xef2   :  { %4828 = vrsqrt.f32 %v1819_v57 }
 0xefa   :  { %v4827_v62 = vpop.eup %4826 }
 0xefb   :  { %v1822_v42 = vmul.f32 %v4827_v62, %v1806_v45 }
 0xefc   :  { %v4829_v63 = vpop.eup %4828 }
 0xefd   :  { %v1830_v3 = vmul.f32 %v3992_v34, %v1822_v42  ;;  %v1823_v4 = vmul.f32 %v4829_v63, %v1807_v52 }
 0xeff   :  { %v1831_v58 = vmul.f32 %v3992_v34, %v1823_v4  ;;  %v1838_v6 = vadd.f32 %v3993_v5, %v1830_v3 }
 0xf01   :  { %v1839_v7 = vadd.f32 %v3993_v5, %v1831_v58 }
 0xf03   :  { %v1840_v8 = vpack.c.bf16 %v1839_v7, %v1838_v6 }
 0xf05   :  { %4309 = vmatmul.mubr.msk.bf16.vlgmr.msra.gmra.mrb[44].mxu1 %vm249_vm0, %v1840_v8 }
 0xf06   :  { %4328 = vmatprep.mubr.msk.bf16.mxu1 %vm5099_vm1, %v5098_v15 }
 0xfd8   :  { %v1901_v14 = vpop.f32.mrb[44].mxu1 }
 0xfd9   :  { %v1902_v16 = vadd.f32 %v3994_v13, %v1901_v14  ;;  %v4310_v17 = vpop.f32.mrb[45].mxu1 }
 0xfda   :  { %v1904_v18 = vpop.f32.mrb[46].mxu1 }
 0xfdb   :  { %v1910_v19 = vmul.f32 0.70710677, %v1902_v16  ;;  %v1905_v20 = vadd.f32 %v3994_v13, %v1904_v18  ;;  %v4311_v21 = vpop.f32.mrb[47].mxu1  ;;  %v1908_v58 = vmul.f32 0.5, %v1902_v16 }
 0xfdd   :  { %v1912_v22 = vand.u32 2147483647, %v1910_v19  ;;  %v1911_v23 = vmul.f32 0.70710677, %v1905_v20  ;;  %vm1952_vm5 = vcmp.ge.f32.partialorder %v1910_v19, 0.0  ;;  %v1909_v6 = vmul.f32 0.5, %v1905_v20 }
 0xfdf   :  { %v1914_v24 = vmul.f32 0.3275911, %v1912_v22  ;;  %v1913_v25 = vand.u32 2147483647, %v1911_v23  ;;  %v1940_v29 = vsub.f32 0.0, %v1912_v22  ;;  %vm1953_vm6 = vcmp.ge.f32.partialorder %v1911_v23, 0.0 }
 0xfe1   :  { %v1916_v26 = vadd.f32 1.0, %v1914_v24  ;;  %v1915_v27 = vmul.f32 0.3275911, %v1913_v25  ;;  %v1941_v30 = vsub.f32 0.0, %v1913_v25  ;;  %v1942_v31 = vmul.f32 %v1940_v29, %v1912_v22 }
 0xfe3   :  { %4830 = vrcp.f32 %v1916_v26  ;;  %v1917_v28 = vadd.f32 1.0, %v1915_v27  ;;  %v1943_v37 = vmul.f32 %v1941_v30, %v1913_v25  ;;  %v1944_v39 = vmul.f32 1.442695, %v1942_v31  ;;  %v4739_v31 = vld [vmem:[%s6035_s7 + $0x8] sm:$0xff]  }
 0xfe5   :  { %4832 = vrcp.f32 %v1917_v28  ;;  %v1946_v47 = vmul.f32 1.442695, %v1943_v37 }
 0xfe6   :  { %4834 = vpow2.f32 %v1944_v39 }
 0xfe7   :  { %4836 = vpow2.f32 %v1946_v47 }
 0xfed   :  { %v4831_v32 = vpop.eup %4830 }
 0xfee   :  { %v1922_v33 = vmul.f32 1.0614054, %v4831_v32 }
 0xfef   :  { %v4833_v35 = vpop.eup %4832 }
 0xff0   :  { %v1924_v36 = vadd.f32 -1.4531521, %v1922_v33  ;;  %v1923_v40 = vmul.f32 1.0614054, %v4833_v35  ;;  %v4835_v59 = vpop.eup %4834 }
 0xff1   :  { %v4837_v61 = vpop.eup %4836 }
 0xff2   :  { %v1926_v43 = vmul.f32 %v4831_v32, %v1924_v36  ;;  %v1925_v44 = vadd.f32 -1.4531521, %v1923_v40 }
 0xff4   :  { %v1928_v46 = vadd.f32 1.4214138, %v1926_v43  ;;  %v1927_v50 = vmul.f32 %v4833_v35, %v1925_v44  ;;  %v4004_v44 = vld [vmem:[%s6036_s6] ss:$0 sm:$0xff] }
 0xff6   :  { %v1930_v45 = vmul.f32 %v4831_v32, %v1928_v46  ;;  %v1929_v51 = vadd.f32 1.4214138, %v1927_v50 }
 0xff8   :  { %v1932_v52 = vadd.f32 -0.28449672, %v1930_v45  ;;  %v1931_v48 = vmul.f32 %v4833_v35, %v1929_v51  ;;  %v4005_v51 = vld [vmem:[%s6037_s10] ss:$0 sm:$0xff] }
 0xffa   :  { %v1934_v0 = vmul.f32 %v4831_v32, %v1932_v52  ;;  %v1933_v54 = vadd.f32 -0.28449672, %v1931_v48 }
 0xffc   :  { %v1936_v1 = vadd.f32 0.2548296, %v1934_v0  ;;  %v1935_v55 = vmul.f32 %v4833_v35, %v1933_v54 }
 0xffe   :  { %v1938_v56 = vmul.f32 %v4831_v32, %v1936_v1  ;;  %v1937_v53 = vadd.f32 0.2548296, %v1935_v55  ;;  %v4738_v32 = vld [vmem:[%s6035_s7] sm:$0xff]  }
 0xfff   :  { %4325 = vmatpush3.bf16.msra.mxu1 %v4738_v32  ;;  %v4006_v1 = vld [vmem:[%s6038_s11] ss:$0 sm:$0xff] }
0x1000   :  { %v1948_v49 = vmul.f32 %v4835_v59, %v1938_v56  ;;  %v1939_v60 = vmul.f32 %v4833_v35, %v1937_v53  ;;  %4326 = vmatprep.subr.bf16.mxu1 %v5098_v15 }
0x1002   :  { %v1950_v57 = vsub.f32 1.0, %v1948_v49  ;;  %v1949_v62 = vmul.f32 %v4837_v61, %v1939_v60 }
0x1003   :  { %4327 = vmatpush3.bf16.msra.mxu1 %v4739_v31 }
0x1004   :  { %v1954_v34 = vsub.f32 0.0, %v1950_v57  ;;  %v1951_v42 = vsub.f32 1.0, %v1949_v62  ;;  %4332 = vmatprep.subr.bf16.mxu1 %v5098_v15 }
0x1006   :  { %v1956_v63 = vsel %vm1952_vm5, %v1950_v57, %v1954_v34  ;;  %v1955_v3 = vsub.f32 0.0, %v1951_v42 }
0x1007   :  { %v1958_v4 = vadd.f32 1.0, %v1956_v63 }
0x1008   :  { %v1957_v5 = vsel %vm1953_vm6, %v1951_v42, %v1955_v3 }
0x1009   :  { %v1959_v7 = vadd.f32 1.0, %v1957_v5  ;;  %v1960_v8 = vmul.f32 %v1958_v4, %v1908_v58 }
0x100b   :  { %v1961_v9 = vmul.f32 %v1959_v7, %v1909_v6 }
0x100d   :  { %v1962_v10 = vpack.c.bf16 %v1961_v9, %v1960_v8 }
0x100f   :  { %4321 = vmatmul.mubr.msk.bf16.vlgmr.msra.gmra.mrb[40].mxu0 %vm2002_vm7, %v1962_v10 }
0x1010   :  { %4340 = vmatprep.mubr.msk.bf16.mxu0 %vm5099_vm1, %v5098_v15 }
0x10e2   :  { %v2040_v12 = vpop.f32.mrb[40].mxu0 }
0x10e3   :  { %v2041_v13 = vadd.f32 %v3998_v11, %v2040_v12  ;;  %v4322_v14 = vpop.f32.mrb[41].mxu0 }
0x10e4   :  { %v2043_v17 = vpop.f32.mrb[42].mxu0 }
0x10e5   :  { %v5678_v18 = vadd.f32 %v2041_v13, %v5642_v38  ;;  %v2044_v16 = vadd.f32 %v3998_v11, %v2043_v17  ;;  %v4323_v19 = vpop.f32.mrb[43].mxu0 }
0x10e7   :  { %v5681_v20 = vadd.f32 %v2044_v16, %v5645_v41  ;;  %v2051_v21 = vsel %vm249_vm0, %v5678_v18, 0.0 }
0x10e8   :  { %2052 = vadd.xlane.f32.xlu0 %v2051_v21 }
0x10e9   :  { %v2054_v22 = vsel %vm249_vm0, %v5681_v20, 0.0 }
0x10ea   :  { %2055 = vadd.xlane.f32.xlu1 %v2054_v22 }
0x1175   :  { %v2053_v23 = vpop.xlane.xlu0 %2052 }
0x1176   :  { %v2057_v24 = vmul.f32 0.03125, %v2053_v23 }
0x1177   :  { %v2056_v25 = vpop.xlane.xlu1 %2055 }
0x1178   :  { %v2059_v38 = vsub.f32 %v5678_v18, %v2057_v24  ;;  %v2058_v26 = vmul.f32 0.03125, %v2056_v25 }
0x117a   :  { %v2060_v27 = vsub.f32 %v5681_v20, %v2058_v26  ;;  %v2061_v41 = vmul.f32 %v2059_v38, %v2059_v38 }
0x117c   :  { %v2063_v28 = vsel %vm249_vm0, %v2061_v41, 0.0  ;;  %v2062_v29 = vmul.f32 %v2060_v27, %v2060_v27 }
0x117d   :  { %2064 = vadd.xlane.f32.xlu0 %v2063_v28 }
0x117e   :  { %v2066_v30 = vsel %vm249_vm0, %v2062_v29, 0.0 }
0x117f   :  { %2067 = vadd.xlane.f32.xlu1 %v2066_v30 }
0x120a   :  { %v2065_v33 = vpop.xlane.xlu0 %2064 }
0x120b   :  { %v2069_v35 = vmul.f32 0.03125, %v2065_v33 }
0x120c   :  { %v2068_v36 = vpop.xlane.xlu1 %2067 }
0x120d   :  { %v2071_v37 = vadd.f32 1e-05, %v2069_v35  ;;  %v2070_v39 = vmul.f32 0.03125, %v2068_v36 }
0x120f   :  { %4838 = vrsqrt.f32 %v2071_v37  ;;  %v2072_v40 = vadd.f32 1e-05, %v2070_v39  ;;  %v4926_v37 = vld [vmem:[%s5128_s13] sm:$0xff] }
0x1211   :  { %4840 = vrsqrt.f32 %v2072_v40 }
0x1219   :  { %v4839_v43 = vpop.eup %4838 }
0x121a   :  { %v2075_v46 = vmul.f32 %v4839_v43, %v2059_v38 }
0x121b   :  { %v4841_v47 = vpop.eup %4840 }
0x121c   :  { %v2083_v50 = vmul.f32 %v4004_v44, %v2075_v46  ;;  %v2076_v45 = vmul.f32 %v4841_v47, %v2060_v27 }
0x121e   :  { %v2084_v52 = vmul.f32 %v4004_v44, %v2076_v45  ;;  %v2091_v48 = vadd.f32 %v4005_v51, %v2083_v50  ;;  %v4927_v44 = vld [vmem:[%s5128_s13 + $0x8] sm:$0xff]  ;;  %s6039_s13 = sld [smem:[#allocation30_spill]] }
0x1220   :  { %v2092_v0 = vadd.f32 %v4005_v51, %v2084_v52 }
0x1222   :  { %v2093_v54 = vpack.c.bf16 %v2092_v0, %v2091_v48 }
0x1224   :  { %4329 = vmatmul.mubr.msk.bf16.vlgmr.msra.gmra.mrb[48].mxu1 %vm249_vm0, %v2093_v54 }
0x1225   :  { %4334 = vmatprep.mubr.msk.bf16.mxu1 %vm5099_vm1, %v5098_v15 }
0x12f7   :  { %v2154_v55 = vpop.f32.mrb[48].mxu1 }
0x12f8   :  { %v4330_v56 = vpop.f32.mrb[49].mxu1  ;;  %v2155_v59 = vadd.f32 %v4006_v1, %v2154_v55 }
0x12f9   :  { %v2157_v53 = vpop.f32.mrb[50].mxu1 }
0x12fa   :  { %v2158_v49 = vadd.f32 %v4006_v1, %v2157_v53  ;;  %v4331_v60 = vpop.f32.mrb[51].mxu1  ;;  %v2161_v62 = vmul.f32 0.35355338, %v2155_v59 }
0x12fc   :  { %v4637_v61 = vpack.i.bf16 %v2158_v49, %v2155_v59  ;;  %v5701_v57 = vpack.c.bf16 %v2158_v49, %v2155_v59  ;;  %v2162_v34 = vmul.f32 0.35355338, %v2158_v49 }
0x12fe   :  { %4638 = vrot.lane.b32.xlu1 %v4637_v61, %s5100_s5  ;;  %4633 = vrot.lane.b32.xlu0 %v4637_v61, %s5101_s21  ;;  %v4647_v42 = vpack.i.bf16 %v2162_v34, %v2161_v62  ;;  %v2183_v63 = vpack.c.bf16 %v2162_v34, %v2161_v62 }
0x1302   :  { %4643 = vrot.lane.b32.xlu1 %v4637_v61, %s5102_s25 }
0x1306   :  { %2212 = vrot.lane.b32.xlu1 %v5701_v57, %s5103_s29 }
0x130a   :  { %4648 = vrot.lane.b32.xlu1 %v4647_v42, %s5101_s21 }
0x1370   :  { %v4639_v3 = vpop.permute.xlu1 %4638  ;;  %v4634_v4 = vpop.permute.xlu0 %4633 }
0x1371   :  { %v4636_v5 = vunpack.i.h.bf16 %v4634_v4  ;;  %v4635_v58 = vunpack.i.l.bf16 %v4634_v4  ;;  %v4641_v6 = vunpack.i.h.bf16 %v4639_v3  ;;  %v4640_v7 = vunpack.i.l.bf16 %v4639_v3 }
0x1373   :  { %v5709_v8 = vpack.c.bf16 %v4636_v5, %v4635_v58  ;;  %v5713_v12 = vpack.c.bf16 %v4641_v6, %v4640_v7 }
0x1374   :  { %v4644_v9 = vpop.permute.xlu1 %4643 }
0x1375   :  { %v4646_v10 = vunpack.i.h.bf16 %v4644_v9  ;;  %v4645_v11 = vunpack.i.l.bf16 %v4644_v9  ;;  %2262 = vrot.lane.b32.xlu0 %v5709_v8, %s5103_s29 }
0x1377   :  { %v5715_v13 = vpack.c.bf16 %v4646_v10, %v4645_v11 }
0x1378   :  { %v2213_v14 = vpop.permute.xlu1 %2212 }
0x1379   :  { %v2218_v17 = vsel %vm414_vm2, %v2213_v14, 0  ;;  %2312 = vrot.lane.b32.xlu0 %v5713_v12, %s5103_s29  ;;  %2362 = vrot.lane.b32.xlu1 %v5715_v13, %s5103_s29 }
0x137a   :  { %4333 = vmatpush3.bf16.xpose.msra.mxu1 %v2218_v17 }
0x137b   :  { %4344 = vmatprep.subr.bf16.mxu1 %v5098_v15 }
0x137c   :  { %v4649_v16 = vpop.permute.xlu1 %4648 }
0x137d   :  { %4653 = vrot.lane.b32.xlu0 %v4647_v42, %s5100_s5  ;;  %4658 = vrot.lane.b32.xlu1 %v4647_v42, %s5102_s25  ;;  %v4651_v22 = vunpack.i.h.bf16 %v4649_v16  ;;  %v4650_v23 = vunpack.i.l.bf16 %v4649_v16 }
0x137f   :  { %v2184_v26 = vpack.c.bf16 %v4651_v22, %v4650_v23 }
0x1381   :  { %4335 = vmatmul.mubr.msk.bf16.vlgmr.msra.gmra.mrb[52].mxu1 %vm414_vm2, %v2183_v63 }
0x1382   :  { %4346 = vmatprep.mubr.msk.bf16.mxu1 %vm5099_vm1, %v5098_v15 }
0x13e7   :  { %v2263_v19 = vpop.permute.xlu0 %2262 }
0x13e8   :  { %v2268_v21 = vsel %vm414_vm2, %v2263_v19, 0 }
0x13e9   :  { %4339 = vmatpush3.bf16.xpose.msra.mxu0 %v2268_v21 }
0x13ea   :  { %4350 = vmatprep.subr.bf16.mxu0 %v5098_v15 }
0x13eb   :  { %v2313_v24 = vpop.permute.xlu0 %2312  ;;  %v2363_v25 = vpop.permute.xlu1 %2362 }
0x13ec   :  { %v2318_v38 = vsel %vm414_vm2, %v2313_v24, 0  ;;  %v2368_v28 = vsel %vm414_vm2, %v2363_v25, 0 }
0x13ed   :  { %4345 = vmatpush3.bf16.xpose.msra.mxu1 %v2318_v38 }
0x13ee   :  { %4356 = vmatprep.subr.bf16.mxu1 %v5098_v15 }
0x13ef   :  { %v4654_v27 = vpop.permute.xlu0 %4653  ;;  %v4659_v41 = vpop.permute.xlu1 %4658 }
0x13f0   :  { %v4656_v29 = vunpack.i.h.bf16 %v4654_v27  ;;  %v4655_v30 = vunpack.i.l.bf16 %v4654_v27  ;;  %4341 = vmatmul.mubr.msk.bf16.vlgmr.msra.gmra.mrb[44].mxu0 %vm414_vm2, %v2184_v26  ;;  %v4661_v31 = vunpack.i.h.bf16 %v4659_v41  ;;  %v4660_v33 = vunpack.i.l.bf16 %v4659_v41 }
0x13f1   :  { %4351 = vmatpush3.bf16.xpose.msra.mxu0 %v2368_v28  ;;  %4352 = vmatprep.mubr.msk.bf16.mxu0 %vm5099_vm1, %v5098_v15 }
0x13f2   :  { %v2185_v32 = vpack.c.bf16 %v4656_v29, %v4655_v30  ;;  %4362 = vmatprep.subr.bf16.mxu0 %v5098_v15  ;;  %v2186_v35 = vpack.c.bf16 %v4661_v31, %v4660_v33 }
0x13f4   :  { %4347 = vmatmul.mubr.msk.bf16.vlgmr.msra.gmra.mrb[56].mxu1 %vm414_vm2, %v2185_v32 }
0x13f5   :  { %4358 = vmatprep.mubr.msk.bf16.mxu1 %vm5099_vm1, %v5098_v15 }
0x13f8   :  { %4353 = vmatmul.mubr.msk.bf16.vlgmr.msra.gmra.mrb[48].mxu0 %vm414_vm2, %v2186_v35 }
0x13f9   :  { %4364 = vmatprep.mubr.msk.bf16.mxu0 %vm5099_vm1, %v5098_v15 }
0x1454   :  { %v2254_v36 = vpop.f32.mrb[52].mxu1 }
0x1455   :  { %v2255_v39 = vadd.f32 %v4926_v37, %v2254_v36  ;;  %v4336_v40 = vpop.f32.mrb[53].mxu1 }
0x1456   :  { %v2257_v43 = vpop.f32.mrb[54].mxu1 }
0x1457   :  { %v2258_v46 = vadd.f32 %v4927_v44, %v2257_v43  ;;  %v4337_v47 = vpop.f32.mrb[55].mxu1  ;;  %v2411_v50 = vsel %vm612_vm3, %v2255_v39, -inf }
0x1458   :  { %2412 = vmax.xlane.f32.xlu0 %v2411_v50 }
0x1459   :  { %v2414_v45 = vsel %vm612_vm3, %v2258_v46, -inf }
0x145a   :  { %2415 = vmax.xlane.f32.xlu1 %v2414_v45 }
0x14c3   :  { %v2304_v51 = vpop.f32.mrb[44].mxu0 }
0x14c4   :  { %v2305_v52 = vadd.f32 %v4926_v37, %v2304_v51  ;;  %v4342_v48 = vpop.f32.mrb[45].mxu0 }
0x14c5   :  { %v2307_v0 = vpop.f32.mrb[46].mxu0 }
0x14c6   :  { %v4343_v54 = vpop.f32.mrb[47].mxu0  ;;  %v2417_v1 = vsel %vm612_vm3, %v2305_v52, -inf  ;;  %v2308_v49 = vadd.f32 %v4927_v44, %v2307_v0 }
0x14c7   :  { %2418 = vmax.xlane.f32.xlu0 %v2417_v1  ;;  %v2354_v55 = vpop.f32.mrb[56].mxu1 }
0x14c8   :  { %v2355_v56 = vadd.f32 %v4926_v37, %v2354_v55  ;;  %v4348_v59 = vpop.f32.mrb[57].mxu1  ;;  %v2420_v58 = vsel %vm612_vm3, %v2308_v49, -inf }
0x14c9   :  { %v2357_v53 = vpop.f32.mrb[58].mxu1 }
0x14ca   :  { %v2358_v60 = vadd.f32 %v4927_v44, %v2357_v53  ;;  %v4349_v61 = vpop.f32.mrb[59].mxu1  ;;  %v2423_v62 = vsel %vm612_vm3, %v2355_v56, -inf }
0x14cb   :  { %v2404_v34 = vpop.f32.mrb[48].mxu0  ;;  %2424 = vmax.xlane.f32.xlu0 %v2423_v62 }
0x14cc   :  { %v4354_v42 = vpop.f32.mrb[49].mxu0  ;;  %v2426_v63 = vsel %vm612_vm3, %v2358_v60, -inf  ;;  %v2405_v4 = vadd.f32 %v4926_v37, %v2404_v34 }
0x14cd   :  { %v2407_v3 = vpop.f32.mrb[50].mxu0  ;;  %2427 = vmax.xlane.f32.xlu1 %v2426_v63 }
0x14ce   :  { %v4355_v5 = vpop.f32.mrb[51].mxu0  ;;  %v2429_v6 = vsel %vm612_vm3, %v2405_v4, -inf  ;;  %v5758_v7 = vadd.f32 %v4927_v44, %v2407_v3 }
0x14cf   :  { %2421 = vmax.xlane.f32.xlu0 %v2420_v58  ;;  %v4740_v58 = vld [vmem:[%s6039_s13] sm:$0xff]  }
0x14d0   :  { %v2432_v9 = vsel %vm612_vm3, %v5758_v7, -inf }
0x14d3   :  { %2430 = vmax.xlane.f32.xlu0 %v2429_v6 }
0x14de   :  { %2534 = vrot.lane.b32.xlu1 %v5709_v8, %s5104_s3 }
0x14e2   :  { %2581 = vrot.lane.b32.xlu1 %v5713_v12, %s5104_s3 }
0x14e5   :  { %v2413_v11 = vpop.xlane.xlu0 %2412 }
0x14e6   :  { %v2435_v17 = vsub.f32 %v2255_v39, %v2413_v11 }
0x14e7   :  { %v2416_v10 = vpop.xlane.xlu1 %2415 }
0x14e8   :  { %v2436_v14 = vsub.f32 %v2258_v46, %v2416_v10  ;;  %v2443_v12 = vmul.f32 1.442695, %v2435_v17 }
0x14e9   :  { %2487 = vrot.lane.b32.xlu0 %v5701_v57, %s5104_s3 }
0x14ea   :  { %v2445_v8 = vmul.f32 1.442695, %v2436_v14 }
0x14ec   :  { %4842 = vpow2.f32 %v2445_v8 }
0x14f6   :  { %v4843_v30 = vpop.eup %4842 }
0x1506   :  { %2433 = vmax.xlane.f32.xlu1 %v2432_v9 }
0x1517   :  { %2628 = vrot.lane.b32.xlu1 %v5715_v13, %s5104_s3  ;;  %s6046_s3 = sld [smem:[#allocation35_spill]] }
0x1554   :  { %v2419_v16 = vpop.xlane.xlu0 %2418 }
0x1555   :  { %v2437_v19 = vsub.f32 %v2305_v52, %v2419_v16 }
0x1557   :  { %v2447_v21 = vmul.f32 1.442695, %v2437_v19 }
0x1558   :  { %v2425_v57 = vpop.xlane.xlu0 %2424 }
0x1559   :  { %4844 = vpow2.f32 %v2447_v21  ;;  %v2439_v22 = vsub.f32 %v2355_v56, %v2425_v57 }
0x155a   :  { %v2428_v23 = vpop.xlane.xlu1 %2427  ;;  %4846 = vpow2.f32 %v2443_v12 }
0x155b   :  { %v2451_v24 = vmul.f32 1.442695, %v2439_v22  ;;  %v2440_v25 = vsub.f32 %v2358_v60, %v2428_v23  ;;  %v2462_v60 = vsel %vm612_vm3, %v4843_v30, 0.0 }
0x155c   :  { %v2422_v38 = vpop.xlane.xlu0 %2421 }
0x155d   :  { %4848 = vpow2.f32 %v2451_v24  ;;  %v2453_v13 = vmul.f32 1.442695, %v2440_v25  ;;  %v2438_v26 = vsub.f32 %v2308_v49, %v2422_v38 }
0x155e   :  { %v2535_v27 = vpop.permute.xlu1 %2534 }
0x155f   :  { %4850 = vpow2.f32 %v2453_v13  ;;  %v2449_v41 = vmul.f32 1.442695, %v2438_v26  ;;  %4363 = vmatpush3.bf16.msra.mxu0 %v2535_v27  ;;  %v4741_v27 = vld [vmem:[%s6039_s13 + $0x8] sm:$0xff]  }
0x1560   :  { %v2431_v28 = vpop.xlane.xlu0 %2430  ;;  %4374 = vmatprep.subr.bf16.mxu0 %v5098_v15 }
0x1561   :  { %4852 = vpow2.f32 %v2449_v41  ;;  %v2441_v29 = vsub.f32 %v2405_v4, %v2431_v28 }
0x1562   :  { %v2582_v40 = vpop.permute.xlu1 %2581 }
0x1563   :  { %v4845_v32 = vpop.eup %4844  ;;  %v2455_v31 = vmul.f32 1.442695, %v2441_v29 }
0x1564   :  { %v2488_v33 = vpop.permute.xlu0 %2487  ;;  %v2465_v35 = vsel %vm612_vm3, %v4845_v32, 0.0  ;;  %v4847_v36 = vpop.eup %4846 }
0x1565   :  { %4854 = vpow2.f32 %v2455_v31  ;;  %2466 = vadd.xlane.f32.xlu0 %v2465_v35  ;;  %4357 = vmatpush3.bf16.msra.mxu1 %v2488_v33  ;;  %v2483_v37 = vpack.c.bf16 %v4843_v30, %v4847_v36  ;;  %v2459_v0 = vsel %vm612_vm3, %v4847_v36, 0.0 }
0x1566   :  { %4368 = vmatprep.subr.bf16.mxu1 %v5098_v15 }
0x1567   :  { %v4849_v39 = vpop.eup %4848 }
0x1568   :  { %4359 = vmatmul.mubr.msk.bf16.vlgmr.msra.gmra.mrb[60].mxu1 %vm612_vm3, %v2483_v37  ;;  %v2471_v43 = vsel %vm612_vm3, %v4849_v39, 0.0 }
0x1569   :  { %v4851_v44 = vpop.eup %4850  ;;  %2472 = vadd.xlane.f32.xlu0 %v2471_v43  ;;  %4369 = vmatpush3.bf16.msra.mxu1 %v2582_v40 }
0x156a   :  { %4370 = vmatprep.mubr.msk.bf16.mxu1 %vm5099_vm1, %v5098_v15  ;;  %4380 = vmatprep.subr.bf16.mxu1 %v5098_v15  ;;  %v2474_v50 = vsel %vm612_vm3, %v4851_v44, 0.0  ;;  %v2485_v51 = vpack.c.bf16 %v4851_v44, %v4849_v39 }
0x156b   :  { %v4853_v46 = vpop.eup %4852 }
0x156c   :  { %v2468_v47 = vsel %vm612_vm3, %v4853_v46, 0.0  ;;  %v2484_v45 = vpack.c.bf16 %v4853_v46, %v4845_v32 }
0x156d   :  { %2469 = vadd.xlane.f32.xlu1 %v2468_v47  ;;  %2475 = vadd.xlane.f32.xlu0 %v2474_v50 }
0x156e   :  { %4365 = vmatmul.mubr.msk.bf16.vlgmr.msra.gmra.mrb[52].mxu0 %vm612_vm3, %v2484_v45 }
0x156f   :  { %v4855_v52 = vpop.eup %4854  ;;  %4376 = vmatprep.mubr.msk.bf16.mxu0 %vm5099_vm1, %v5098_v15 }
0x1570   :  { %4371 = vmatmul.mubr.msk.bf16.vlgmr.msra.gmra.mrb[64].mxu1 %vm612_vm3, %v2485_v51  ;;  %v2477_v48 = vsel %vm612_vm3, %v4855_v52, 0.0 }
0x1571   :  { %2478 = vadd.xlane.f32.xlu0 %v2477_v48  ;;  %4384 = vmatprep.mubr.msk.bf16.mxu1 %vm5099_vm1, %v5098_v15 }
0x1572   :  { %4381 = vmatpush3.bf16.msra.mxu1 %v4740_v58 }
0x1573   :  { %4382 = vmatprep.subr.bf16.mxu1 %v5098_v15 }
0x1575   :  { %2460 = vadd.xlane.f32.xlu0 %v2459_v0 }
0x1576   :  { %4383 = vmatpush3.bf16.msra.mxu1 %v4741_v27 }
0x1577   :  { %4396 = vmatprep.subr.bf16.mxu1 %v5098_v15 }
0x1593   :  { %v2434_v54 = vpop.xlane.xlu1 %2433 }
0x1594   :  { %v2442_v1 = vsub.f32 %v5758_v7, %v2434_v54 }
0x1596   :  { %v2457_v55 = vmul.f32 1.442695, %v2442_v1 }
0x1597   :  { %v2629_v56 = vpop.permute.xlu1 %2628 }
0x1598   :  { %4856 = vpow2.f32 %v2457_v55  ;;  %4375 = vmatpush3.bf16.msra.mxu0 %v2629_v56 }
0x1599   :  { %4388 = vmatprep.subr.bf16.mxu0 %v5098_v15 }
0x15a2   :  { %v4857_v59 = vpop.eup %4856 }
0x15a3   :  { %v2480_v53 = vsel %vm612_vm3, %v4857_v59, 0.0  ;;  %v2486_v49 = vpack.c.bf16 %v4857_v59, %v4855_v52 }
0x15a4   :  { %2481 = vadd.xlane.f32.xlu1 %v2480_v53 }
0x15a5   :  { %4377 = vmatmul.mubr.msk.bf16.vlgmr.msra.gmra.mrb[56].mxu0 %vm612_vm3, %v2486_v49 }
0x15a6   :  { %4392 = vmatprep.mubr.msk.bf16.mxu0 %vm5099_vm1, %v5098_v15 }
0x15a8   :  { %2463 = vadd.xlane.f32.xlu1 %v2462_v60 }
0x15f2   :  { %v2467_v61 = vpop.xlane.xlu0 %2466 }
0x15f3   :  { %4858 = vrcp.f32 %v2467_v61 }
0x15f6   :  { %v2473_v62 = vpop.xlane.xlu0 %2472 }
0x15fa   :  { %v2470_v34 = vpop.xlane.xlu1 %2469  ;;  %v2476_v42 = vpop.xlane.xlu0 %2475 }
0x15fb   :  { %4860 = vrcp.f32 %v2470_v34 }
0x15fc   :  { %4862 = vrcp.f32 %v2473_v62  ;;  %v4018_v62 = vld [vmem:[%s6040_s15] ss:$0 sm:$0xff] }
0x15fd   :  { %4864 = vrcp.f32 %v2476_v42  ;;  %v4859_v7 = vpop.eup %4858 }
0x15fe   :  { %v2479_v13 = vpop.xlane.xlu0 %2478 }
0x15ff   :  { %4866 = vrcp.f32 %v2479_v13 }
0x1602   :  { %v2461_v39 = vpop.xlane.xlu0 %2460 }
0x1605   :  { %v4861_v10 = vpop.eup %4860 }
0x1606   :  { %v4863_v17 = vpop.eup %4862 }
0x1607   :  { %v4865_v21 = vpop.eup %4864 }
0x1609   :  { %v4867_v28 = vpop.eup %4866 }
0x1631   :  { %v2482_v26 = vpop.xlane.xlu1 %2481 }
0x1632   :  { %4868 = vrcp.f32 %v2482_v26 }
0x1635   :  { %v2464_v37 = vpop.xlane.xlu1 %2463 }
0x1636   :  { %4870 = vrcp.f32 %v2464_v37 }
0x1637   :  { %4872 = vrcp.f32 %v2461_v39  ;;  %v4028_v39 = vld [vmem:[%s6045_s23] ss:$0 sm:$0xff] }
0x163b   :  { %v2527_v63 = vpop.f32.mrb[60].mxu1 }
0x163c   :  { %v4360_v3 = vpop.f32.mrb[61].mxu1  ;;  %v4869_v30 = vpop.eup %4868 }
0x163d   :  { %v2530_v4 = vpop.f32.mrb[62].mxu1 }
0x163e   :  { %v4361_v5 = vpop.f32.mrb[63].mxu1 }
0x1640   :  { %v4871_v43 = vpop.eup %4870 }
0x1641   :  { %v2574_v6 = vpop.f32.mrb[52].mxu0  ;;  %v4873_v50 = vpop.eup %4872  ;;  %v2684_v51 = vmul.f32 %v4871_v43, %v2530_v4 }
0x1642   :  { %v4366_v9 = vpop.f32.mrb[53].mxu0  ;;  %v2685_v8 = vmul.f32 %v4859_v7, %v2574_v6  ;;  %v2683_v45 = vmul.f32 %v4873_v50, %v2527_v63 }
0x1643   :  { %v2577_v11 = vpop.f32.mrb[54].mxu0  ;;  %v2621_v14 = vpop.f32.mrb[64].mxu1 }
0x1644   :  { %v2686_v16 = vmul.f32 %v4861_v10, %v2577_v11  ;;  %v4367_v19 = vpop.f32.mrb[55].mxu0  ;;  %v4372_v12 = vpop.f32.mrb[65].mxu1  ;;  %v2687_v23 = vmul.f32 %v4863_v17, %v2621_v14 }
0x1645   :  { %v2624_v57 = vpop.f32.mrb[66].mxu1 }
0x1646   :  { %v4662_v22 = vpack.i.bf16 %v2686_v16, %v2685_v8  ;;  %v2688_v24 = vmul.f32 %v4865_v21, %v2624_v57  ;;  %v4373_v25 = vpop.f32.mrb[67].mxu1  ;;  %v4742_v21 = vld [vmem:[%s6041_s16] sm:$0xff]   ;;  %v4743_v57 = vld [vmem:[%s6041_s16 + $0x8] sm:$0xff]  }
0x1648   :  { %v4667_v38 = vpack.i.bf16 %v2688_v24, %v2687_v23  ;;  %4663 = vrot.lane.b32.xlu0 %v4662_v22, %s5105_s20  ;;  %v4744_v22 = vld [vmem:[%s6042_s18] sm:$0xff]   ;;  %v4745_v23 = vld [vmem:[%s6042_s18 + $0x8] sm:$0xff]  }
0x1649   :  { %4389 = vmatpush3.bf16.msra.mxu0 %v4744_v22 }
0x164a   :  { %4668 = vrot.lane.b32.xlu1 %v4667_v38, %s5106_s27  ;;  %4390 = vmatprep.subr.bf16.mxu0 %v5098_v15 }
0x164d   :  { %4391 = vmatpush3.bf16.msra.mxu0 %v4745_v23 }
0x164e   :  { %4404 = vmatprep.subr.bf16.mxu0 %v5098_v15 }
0x1678   :  { %v2668_v41 = vpop.f32.mrb[56].mxu0 }
0x1679   :  { %v4378_v29 = vpop.f32.mrb[57].mxu0  ;;  %v2689_v31 = vmul.f32 %v4867_v28, %v2668_v41  ;;  %v4022_v28 = vld [vmem:[%s6043_s4] ss:$0 sm:$0xff] }
0x167a   :  { %v2671_v32 = vpop.f32.mrb[58].mxu0 }
0x167b   :  { %v2690_v33 = vmul.f32 %v4869_v30, %v2671_v32  ;;  %v4379_v35 = vpop.f32.mrb[59].mxu0 }
0x167d   :  { %v4672_v36 = vpack.i.bf16 %v2690_v33, %v2689_v31  ;;  %v4023_v31 = vld [vmem:[%s6044_s22] ss:$0 sm:$0xff] }
0x167f   :  { %4673 = vrot.lane.b32.xlu1 %v4672_v36, %s5107_s0 }
0x16ba   :  { %v4664_v40 = vpop.permute.xlu0 %4663 }
0x16bb   :  { %v4666_v44 = vunpack.i.h.bf16 %v4664_v40  ;;  %v4665_v46 = vunpack.i.l.bf16 %v4664_v40 }
0x16bc   :  { %v4669_v47 = vpop.permute.xlu1 %4668 }
0x16bd   :  { %v4671_v52 = vunpack.i.h.bf16 %v4669_v47  ;;  %v4670_v48 = vunpack.i.l.bf16 %v4669_v47  ;;  %v2715_v0 = vsel %vm414_vm2, %v2683_v45, %v4665_v46  ;;  %v2716_v54 = vsel %vm414_vm2, %v2684_v51, %v4666_v44 }
0x16bf   :  { %v2718_v59 = vsel %vm612_vm3, %v2716_v54, %v4671_v52  ;;  %v2717_v53 = vsel %vm612_vm3, %v2715_v0, %v4670_v48 }
0x16f1   :  { %v4674_v1 = vpop.permute.xlu1 %4673 }
0x16f2   :  { %v4676_v55 = vunpack.i.h.bf16 %v4674_v1  ;;  %v4675_v56 = vunpack.i.l.bf16 %v4674_v1 }
0x16f4   :  { %v2719_v49 = vsel %vm921_vm4, %v2717_v53, %v4675_v56  ;;  %v2720_v60 = vsel %vm921_vm4, %v2718_v59, %v4676_v55  ;;  %v4024_v59 = vld [vmem:[%s6046_s3] ss:$0 sm:$0xff] }
0x16f5   :  { %v2721_v61 = vpack.c.bf16 %v2720_v60, %v2719_v49 }
0x16f7   :  { %4385 = vmatmul.mubr.msk.bf16.vlgmr.msra.gmra.mrb[68].mxu1 %vm249_vm0, %v2721_v61 }
0x16f8   :  { %4400 = vmatprep.mubr.msk.bf16.mxu1 %vm5099_vm1, %v5098_v15  ;;  %4397 = vmatpush3.bf16.msra.mxu1 %v4742_v21 }
0x16f9   :  { %4398 = vmatprep.subr.bf16.mxu1 %v5098_v15 }
0x16fc   :  { %4399 = vmatpush3.bf16.msra.mxu1 %v4743_v57 }
0x16fd   :  { %4410 = vmatprep.subr.bf16.mxu1 %v5098_v15 }
0x16ff   :  { %4401 = vmatmul.mubr.msk.bf16.vlgmr.msra.gmra.mrb[72].mxu1 %vm249_vm0, %v5521_v2 }
0x1700   :  { %4412 = vmatprep.mubr.msk.bf16.mxu1 %vm5099_vm1, %v5098_v15 }
0x17ca   :  { %v2782_v34 = vpop.f32.mrb[68].mxu1 }
0x17cb   :  { %v2783_v42 = vadd.f32 %v4018_v62, %v2782_v34  ;;  %v4386_v63 = vpop.f32.mrb[69].mxu1 }
0x17cc   :  { %v2785_v3 = vpop.f32.mrb[70].mxu1 }
0x17cd   :  { %v5807_v4 = vadd.f32 %v2783_v42, %v5678_v18  ;;  %v2786_v5 = vadd.f32 %v4018_v62, %v2785_v3  ;;  %v4387_v58 = vpop.f32.mrb[71].mxu1 }
0x17cf   :  { %v5810_v6 = vadd.f32 %v2786_v5, %v5681_v20  ;;  %v2793_v7 = vsel %vm249_vm0, %v5807_v4, 0.0 }
0x17d0   :  { %2794 = vadd.xlane.f32.xlu1 %v2793_v7 }
0x17d1   :  { %v2796_v9 = vsel %vm249_vm0, %v5810_v6, 0.0 }
0x17d2   :  { %2797 = vadd.xlane.f32.xlu0 %v2796_v9  ;;  %v2960_v40 = vpop.f32.mrb[72].mxu1 }
0x17d3   :  { %v4402_v43 = vpop.f32.mrb[73].mxu1  ;;  %v2961_v44 = vadd.f32 %v4028_v39, %v2960_v40 }
0x17d4   :  { %v2963_v46 = vpop.f32.mrb[74].mxu1 }
0x17d5   :  { %v2964_v47 = vadd.f32 %v4028_v39, %v2963_v46  ;;  %v4403_v50 = vpop.f32.mrb[75].mxu1 }
0x17d7   :  { %v4682_v45 = vpack.i.bf16 %v2964_v47, %v2961_v44  ;;  %v3013_v51 = vpack.c.bf16 %v2964_v47, %v2961_v44 }
0x17d9   :  { %v3021_v52 = vsel %vm414_vm2, %v3013_v51, 0 }
0x17e1   :  { %4678 = vrot.lane.b32.xlu1 %v4682_v45, %s5101_s21 }
0x185d   :  { %v2795_v10 = vpop.xlane.xlu1 %2794 }
0x185e   :  { %v2799_v11 = vmul.f32 0.03125, %v2795_v10 }
0x185f   :  { %v2798_v18 = vpop.xlane.xlu0 %2797 }
0x1860   :  { %v2801_v14 = vsub.f32 %v5807_v4, %v2799_v11  ;;  %v2800_v17 = vmul.f32 0.03125, %v2798_v18 }
0x1861   :  { %v4679_v48 = vpop.permute.xlu1 %4678 }
0x1862   :  { %v2802_v20 = vsub.f32 %v5810_v6, %v2800_v17  ;;  %v2803_v8 = vmul.f32 %v2801_v14, %v2801_v14  ;;  %v4681_v0 = vunpack.i.h.bf16 %v4679_v48  ;;  %v4680_v54 = vunpack.i.l.bf16 %v4679_v48 }
0x1864   :  { %v2805_v16 = vsel %vm249_vm0, %v2803_v8, 0.0  ;;  %v2804_v19 = vmul.f32 %v2802_v20, %v2802_v20  ;;  %v5842_v1 = vpack.c.bf16 %v4681_v0, %v4680_v54 }
0x1865   :  { %2806 = vadd.xlane.f32.xlu0 %v2805_v16 }
0x1866   :  { %v2808_v12 = vsel %vm249_vm0, %v2804_v19, 0.0  ;;  %v3068_v55 = vsel %vm414_vm2, %v5842_v1, 0 }
0x1867   :  { %4411 = vmatpush3.bf16.xpose.msra.mxu1 %v3068_v55 }
0x1868   :  { %4422 = vmatprep.subr.bf16.mxu1 %v5098_v15 }
0x1869   :  { %2809 = vadd.xlane.f32.xlu0 %v2808_v12 }
0x187f   :  { %4683 = vrot.lane.b32.xlu0 %v4682_v45, %s5100_s5 }
0x18f2   :  { %v2807_v24 = vpop.xlane.xlu0 %2806 }
0x18f3   :  { %v2811_v25 = vmul.f32 0.03125, %v2807_v24 }
0x18f5   :  { %v2813_v38 = vadd.f32 1e-05, %v2811_v25 }
0x18f6   :  { %v2810_v13 = vpop.xlane.xlu0 %2809 }
0x18f7   :  { %4874 = vrsqrt.f32 %v2813_v38  ;;  %v2812_v26 = vmul.f32 0.03125, %v2810_v13 }
0x18f9   :  { %v2814_v27 = vadd.f32 1e-05, %v2812_v26 }
0x18fa   :  { %v4684_v56 = vpop.permute.xlu0 %4683 }
0x18fb   :  { %4876 = vrsqrt.f32 %v2814_v27  ;;  %v4686_v49 = vunpack.i.h.bf16 %v4684_v56  ;;  %v4685_v60 = vunpack.i.l.bf16 %v4684_v56 }
0x18fd   :  { %v5848_v3 = vpack.c.bf16 %v4686_v49, %v4685_v60 }
0x18ff   :  { %v3115_v10 = vsel %vm414_vm2, %v5848_v3, 0 }
0x1901   :  { %v4875_v2 = vpop.eup %4874 }
0x1902   :  { %v2817_v41 = vmul.f32 %v4875_v2, %v2801_v14  ;;  %v4928_v2 = vld [vmem:[%s6026_s14] sm:$0xff] }
0x1904   :  { %v2825_v30 = vmul.f32 %v4022_v28, %v2817_v41 }
0x1905   :  { %v4877_v29 = vpop.eup %4876 }
0x1906   :  { %v2818_v32 = vmul.f32 %v4877_v29, %v2802_v20  ;;  %v2833_v35 = vadd.f32 %v4023_v31, %v2825_v30  ;;  %v4929_v30 = vld [vmem:[%s6026_s14 + $0x8] sm:$0xff]  ;;  %s5018_s14 = scalar_lea.vmem %s3893_s8, 256 }
0x1907   :  { %p5019_p4 = scmp.ne.s32.totalorder %s3893_s8, %s5018_s14  ;;  %p5024_p6 = scmp.lt.s32.totalorder %s5018_s14, %s5018_s14 }
0x1908   :  { %v2826_v33 = vmul.f32 %v4022_v28, %v2818_v32 }
0x1909   :  { %p5025_p7 = por %p5024_p6, %p5023_p5 }
0x190a   :  { %v2834_v36 = vadd.f32 %v4023_v31, %v2826_v33 }
0x190b   :  { %p5026_p8 = pnand %p5025_p7, %p5019_p4 }
0x190c   :  { %v2835_v37 = vpack.c.bf16 %v2834_v36, %v2833_v35 }
0x190e   :  { %4393 = vmatmul.mubr.msk.bf16.vlgmr.msra.gmra.mrb[60].mxu0 %vm249_vm0, %v2835_v37 }
0x190f   :  { %4406 = vmatprep.mubr.msk.bf16.mxu0 %vm5099_vm1, %v5098_v15  ;;  %4405 = vmatpush3.bf16.xpose.msra.mxu0 %v3021_v52 }
0x1910   :  { %4416 = vmatprep.subr.bf16.mxu0 %v5098_v15 }
0x19e1   :  { %v2896_v53 = vpop.f32.mrb[60].mxu0 }
0x19e2   :  { %v2897_v61 = vadd.f32 %v4024_v59, %v2896_v53  ;;  %v4394_v62 = vpop.f32.mrb[61].mxu0 }
0x19e3   :  { %v2899_v34 = vpop.f32.mrb[62].mxu0 }
0x19e4   :  { %v2900_v42 = vadd.f32 %v4024_v59, %v2899_v34  ;;  %v4395_v63 = vpop.f32.mrb[63].mxu0  ;;  %v2967_v5 = vmul.f32 0.35355338, %v2897_v61 }
0x19e6   :  { %v2968_v58 = vmul.f32 0.35355338, %v2900_v42 }
0x19e8   :  { %v2989_v7 = vpack.c.bf16 %v2968_v58, %v2967_v5  ;;  %v4702_v9 = vpack.i.bf16 %v2968_v58, %v2967_v5 }
0x19ea   :  { %4703 = vrot.lane.b32.xlu0 %v4702_v9, %s5102_s25  ;;  %4688 = vrot.lane.b32.xlu1 %v4702_v9, %s5101_s21  ;;  %s6048_s21 = sld [smem:[#allocation39_spill]] }
0x19eb   :  { %4407 = vmatmul.mubr.msk.bf16.vlgmr.msra.gmra.mrb[64].mxu0 %vm414_vm2, %v2989_v7 }
0x19ec   :  { %4417 = vmatpush3.bf16.xpose.msra.mxu0 %v3115_v10  ;;  %4418 = vmatprep.mubr.msk.bf16.mxu0 %vm5099_vm1, %v5098_v15 }
0x19ed   :  { %4428 = vmatprep.subr.bf16.mxu0 %v5098_v15 }
0x19ee   :  { %4693 = vrot.lane.b32.xlu1 %v4682_v45, %s5102_s25  ;;  %s6049_s25 = sld [smem:[#allocation42_spill]] }
0x19f2   :  { %4698 = vrot.lane.b32.xlu1 %v4702_v9, %s5100_s5  ;;  %s6047_s5 = sld [smem:[#allocation38_spill]] }
0x19f6   :  { %3282 = vrot.lane.b32.xlu1 %v3013_v51, %s5103_s29 }
0x1a5c   :  { %v4689_v11 = vpop.permute.xlu1 %4688  ;;  %v4704_v12 = vpop.permute.xlu0 %4703 }
0x1a5d   :  { %v4691_v18 = vunpack.i.h.bf16 %v4689_v11  ;;  %v4690_v14 = vunpack.i.l.bf16 %v4689_v11  ;;  %v4706_v24 = vunpack.i.h.bf16 %v4704_v12  ;;  %v4705_v25 = vunpack.i.l.bf16 %v4704_v12 }
0x1a5f   :  { %v2990_v17 = vpack.c.bf16 %v4691_v18, %v4690_v14  ;;  %v2992_v26 = vpack.c.bf16 %v4706_v24, %v4705_v25 }
0x1a60   :  { %v4694_v20 = vpop.permute.xlu1 %4693 }
0x1a61   :  { %v4696_v8 = vunpack.i.h.bf16 %v4694_v20  ;;  %v4695_v16 = vunpack.i.l.bf16 %v4694_v20  ;;  %4413 = vmatmul.mubr.msk.bf16.vlgmr.msra.gmra.mrb[76].mxu1 %vm414_vm2, %v2990_v17 }
0x1a62   :  { %4424 = vmatprep.mubr.msk.bf16.mxu1 %vm5099_vm1, %v5098_v15 }
0x1a63   :  { %v5864_v19 = vpack.c.bf16 %v4696_v8, %v4695_v16 }
0x1a64   :  { %v4699_v21 = vpop.permute.xlu1 %4698 }
0x1a65   :  { %v4701_v57 = vunpack.i.h.bf16 %v4699_v21  ;;  %v4700_v22 = vunpack.i.l.bf16 %v4699_v21  ;;  %v3162_v23 = vsel %vm414_vm2, %v5864_v19, 0 }
0x1a66   :  { %4423 = vmatpush3.bf16.xpose.msra.mxu1 %v3162_v23 }
0x1a67   :  { %v2991_v38 = vpack.c.bf16 %v4701_v57, %v4700_v22  ;;  %4434 = vmatprep.subr.bf16.mxu1 %v5098_v15 }
0x1a68   :  { %v3283_v13 = vpop.permute.xlu1 %3282 }
0x1a69   :  { %4419 = vmatmul.mubr.msk.bf16.vlgmr.msra.gmra.mrb[68].mxu0 %vm414_vm2, %v2991_v38 }
0x1a6a   :  { %4429 = vmatpush3.bf16.msra.mxu0 %v3283_v13  ;;  %4430 = vmatprep.mubr.msk.bf16.mxu0 %vm5099_vm1, %v5098_v15 }
0x1a6b   :  { %4440 = vmatprep.subr.bf16.mxu0 %v5098_v15 }
0x1a6d   :  { %4425 = vmatmul.mubr.msk.bf16.vlgmr.msra.gmra.mrb[80].mxu1 %vm414_vm2, %v2992_v26 }
0x1a6e   :  { %4436 = vmatprep.mubr.msk.bf16.mxu1 %vm5099_vm1, %v5098_v15 }
0x1abe   :  { %v3057_v27 = vpop.f32.mrb[64].mxu0 }
0x1abf   :  { %v3058_v41 = vadd.f32 %v4928_v2, %v3057_v27  ;;  %v4408_v28 = vpop.f32.mrb[65].mxu0 }
0x1ac0   :  { %v3060_v29 = vpop.f32.mrb[66].mxu0 }
0x1ac1   :  { %v3061_v32 = vadd.f32 %v4929_v30, %v3060_v29  ;;  %v4409_v31 = vpop.f32.mrb[67].mxu0  ;;  %v3205_v33 = vsel %vm612_vm3, %v3058_v41, -inf }
0x1ac2   :  { %3206 = vmax.xlane.f32.xlu1 %v3205_v33 }
0x1ac3   :  { %v3208_v35 = vsel %vm612_vm3, %v3061_v32, -inf }
0x1ac4   :  { %3209 = vmax.xlane.f32.xlu0 %v3208_v35 }
0x1b34   :  { %v3104_v36 = vpop.f32.mrb[76].mxu1 }
0x1b35   :  { %v3105_v37 = vadd.f32 %v4928_v2, %v3104_v36  ;;  %v4414_v39 = vpop.f32.mrb[77].mxu1 }
0x1b36   :  { %v3107_v40 = vpop.f32.mrb[78].mxu1 }
0x1b37   :  { %v3108_v43 = vadd.f32 %v4929_v30, %v3107_v40  ;;  %v4415_v44 = vpop.f32.mrb[79].mxu1  ;;  %v3211_v46 = vsel %vm612_vm3, %v3105_v37, -inf }
0x1b38   :  { %3212 = vmax.xlane.f32.xlu0 %v3211_v46 }
0x1b39   :  { %v3214_v47 = vsel %vm612_vm3, %v3108_v43, -inf }
0x1b3c   :  { %v3151_v50 = vpop.f32.mrb[68].mxu0  ;;  %3215 = vmax.xlane.f32.xlu0 %v3214_v47 }
0x1b3d   :  { %v3152_v45 = vadd.f32 %v4928_v2, %v3151_v50  ;;  %v4420_v51 = vpop.f32.mrb[69].mxu0 }
0x1b3e   :  { %v3154_v52 = vpop.f32.mrb[70].mxu0 }
0x1b3f   :  { %v3155_v48 = vadd.f32 %v4929_v30, %v3154_v52  ;;  %v4421_v0 = vpop.f32.mrb[71].mxu0  ;;  %v3217_v54 = vsel %vm612_vm3, %v3152_v45, -inf }
0x1b40   :  { %3218 = vmax.xlane.f32.xlu1 %v3217_v54  ;;  %v3198_v55 = vpop.f32.mrb[80].mxu1 }
0x1b41   :  { %v3199_v56 = vadd.f32 %v4928_v2, %v3198_v55  ;;  %v4426_v59 = vpop.f32.mrb[81].mxu1  ;;  %v3220_v53 = vsel %vm612_vm3, %v3155_v48, -inf }
0x1b42   :  { %3221 = vmax.xlane.f32.xlu0 %v3220_v53  ;;  %v3201_v49 = vpop.f32.mrb[82].mxu1 }
0x1b43   :  { %v3202_v60 = vadd.f32 %v4929_v30, %v3201_v49  ;;  %v4427_v61 = vpop.f32.mrb[83].mxu1  ;;  %v3223_v62 = vsel %vm612_vm3, %v3199_v56, -inf }
0x1b44   :  { %3224 = vmax.xlane.f32.xlu1 %v3223_v62 }
0x1b45   :  { %v3226_v34 = vsel %vm612_vm3, %v3202_v60, -inf }
0x1b46   :  { %3227 = vmax.xlane.f32.xlu0 %v3226_v34  ;;  %v4746_v34 = vld [vmem:[%s6047_s5] sm:$0xff]  }
0x1b4f   :  { %v3207_v42 = vpop.xlane.xlu1 %3206 }
0x1b50   :  { %v3229_v63 = vsub.f32 %v3058_v41, %v3207_v42 }
0x1b51   :  { %v3210_v5 = vpop.xlane.xlu0 %3209 }
0x1b52   :  { %v3237_v58 = vmul.f32 1.442695, %v3229_v63  ;;  %v3230_v7 = vsub.f32 %v3061_v32, %v3210_v5 }
0x1b54   :  { %v3239_v9 = vmul.f32 1.442695, %v3230_v7  ;;  %4878 = vpow2.f32 %v3237_v58 }
0x1b55   :  { %3378 = vrot.lane.b32.xlu1 %v5848_v3, %s5103_s29 }
0x1b56   :  { %4880 = vpow2.f32 %v3239_v9 }
0x1b59   :  { %3426 = vrot.lane.b32.xlu1 %v5864_v19, %s5103_s29 }
0x1b5c   :  { %3330 = vrot.lane.b32.xlu0 %v5842_v1, %s5103_s29  ;;  %s6050_s29 = sld [smem:[#allocation40_spill]] }
0x1b5e   :  { %v4879_v10 = vpop.eup %4878 }
0x1b5f   :  { %v3253_v46 = vsel %vm612_vm3, %v4879_v10, 0.0 }
0x1b60   :  { %v5892_v11 = vpop.eup %4880 }
0x1b61   :  { %v3277_v18 = vpack.c.bf16 %v5892_v11, %v4879_v10  ;;  %v4747_v10 = vld [vmem:[%s6047_s5 + $0x8] sm:$0xff]  }
0x1b63   :  { %4431 = vmatmul.mubr.msk.bf16.vlgmr.msra.gmra.mrb[72].mxu0 %vm612_vm3, %v3277_v18 }
0x1b64   :  { %4442 = vmatprep.mubr.msk.bf16.mxu0 %vm5099_vm1, %v5098_v15 }
0x1bc5   :  { %v3213_v14 = vpop.xlane.xlu0 %3212 }
0x1bc6   :  { %v3231_v17 = vsub.f32 %v3105_v37, %v3213_v14 }
0x1bc8   :  { %v3241_v3 = vmul.f32 1.442695, %v3231_v17 }
0x1bc9   :  { %v3216_v20 = vpop.xlane.xlu0 %3215 }
0x1bca   :  { %4882 = vpow2.f32 %v3241_v3  ;;  %v3232_v8 = vsub.f32 %v3108_v43, %v3216_v20 }
0x1bcc   :  { %v3243_v16 = vmul.f32 1.442695, %v3232_v8 }
0x1bcd   :  { %v3219_v19 = vpop.xlane.xlu1 %3218 }
0x1bce   :  { %4884 = vpow2.f32 %v3243_v16  ;;  %v3233_v1 = vsub.f32 %v3152_v45, %v3219_v19  ;;  %v3256_v45 = vsel %vm612_vm3, %v5892_v11, 0.0 }
0x1bcf   :  { %v3222_v12 = vpop.xlane.xlu0 %3221 }
0x1bd0   :  { %v3245_v21 = vmul.f32 1.442695, %v3233_v1  ;;  %v3234_v57 = vsub.f32 %v3155_v48, %v3222_v12 }
0x1bd1   :  { %v3225_v22 = vpop.xlane.xlu1 %3224 }
0x1bd2   :  { %4886 = vpow2.f32 %v3245_v21  ;;  %v3247_v23 = vmul.f32 1.442695, %v3234_v57  ;;  %v3235_v24 = vsub.f32 %v3199_v56, %v3225_v22 }
0x1bd3   :  { %v3228_v25 = vpop.xlane.xlu0 %3227 }
0x1bd4   :  { %v4883_v38 = vpop.eup %4882  ;;  %4888 = vpow2.f32 %v3247_v23  ;;  %v3249_v13 = vmul.f32 1.442695, %v3235_v24  ;;  %v3236_v26 = vsub.f32 %v3202_v60, %v3228_v25 }
0x1bd5   :  { %v3379_v27 = vpop.permute.xlu1 %3378  ;;  %v3259_v2 = vsel %vm612_vm3, %v4883_v38, 0.0 }
0x1bd6   :  { %4890 = vpow2.f32 %v3249_v13  ;;  %v3251_v41 = vmul.f32 1.442695, %v3236_v26  ;;  %3260 = vadd.xlane.f32.xlu1 %v3259_v2  ;;  %4441 = vmatpush3.bf16.msra.mxu0 %v3379_v27 }
0x1bd7   :  { %v3331_v28 = vpop.permute.xlu0 %3330  ;;  %4452 = vmatprep.subr.bf16.mxu0 %v5098_v15 }
0x1bd8   :  { %v4885_v29 = vpop.eup %4884  ;;  %4892 = vpow2.f32 %v3251_v41  ;;  %4435 = vmatpush3.bf16.msra.mxu1 %v3331_v28 }
0x1bd9   :  { %v3278_v30 = vpack.c.bf16 %v4885_v29, %v4883_v38  ;;  %4446 = vmatprep.subr.bf16.mxu1 %v5098_v15  ;;  %v3427_v32 = vpop.permute.xlu1 %3426  ;;  %v3262_v40 = vsel %vm612_vm3, %v4885_v29, 0.0 }
0x1bdb   :  { %4437 = vmatmul.mubr.msk.bf16.vlgmr.msra.gmra.mrb[84].mxu1 %vm612_vm3, %v3278_v30 }
0x1bdc   :  { %v4887_v31 = vpop.eup %4886  ;;  %4447 = vmatpush3.bf16.msra.mxu1 %v3427_v32  ;;  %4448 = vmatprep.mubr.msk.bf16.mxu1 %vm5099_vm1, %v5098_v15 }
0x1bdd   :  { %v3265_v33 = vsel %vm612_vm3, %v4887_v31, 0.0  ;;  %4460 = vmatprep.subr.bf16.mxu1 %v5098_v15 }
0x1bde   :  { %v4889_v35 = vpop.eup %4888  ;;  %3266 = vadd.xlane.f32.xlu0 %v3265_v33 }
0x1bdf   :  { %v3279_v36 = vpack.c.bf16 %v4889_v35, %v4887_v31  ;;  %v3268_v47 = vsel %vm612_vm3, %v4889_v35, 0.0 }
0x1be0   :  { %v4891_v37 = vpop.eup %4890 }
0x1be1   :  { %4443 = vmatmul.mubr.msk.bf16.vlgmr.msra.gmra.mrb[76].mxu0 %vm612_vm3, %v3279_v36  ;;  %v3271_v39 = vsel %vm612_vm3, %v4891_v37, 0.0 }
0x1be2   :  { %v4893_v43 = vpop.eup %4892  ;;  %3272 = vadd.xlane.f32.xlu1 %v3271_v39  ;;  %3263 = vadd.xlane.f32.xlu0 %v3262_v40 }
0x1be3   :  { %v3280_v44 = vpack.c.bf16 %v4893_v43, %v4891_v37  ;;  %4456 = vmatprep.mubr.msk.bf16.mxu0 %vm5099_vm1, %v5098_v15  ;;  %v3274_v50 = vsel %vm612_vm3, %v4893_v43, 0.0  ;;  %4453 = vmatpush3.bf16.msra.mxu0 %v4746_v34 }
0x1be4   :  { %4454 = vmatprep.subr.bf16.mxu0 %v5098_v15 }
0x1be5   :  { %4449 = vmatmul.mubr.msk.bf16.vlgmr.msra.gmra.mrb[88].mxu1 %vm612_vm3, %v3280_v44 }
0x1be6   :  { %3254 = vadd.xlane.f32.xlu1 %v3253_v46  ;;  %3269 = vadd.xlane.f32.xlu0 %v3268_v47 }
0x1be7   :  { %4464 = vmatprep.mubr.msk.bf16.mxu1 %vm5099_vm1, %v5098_v15  ;;  %4455 = vmatpush3.bf16.msra.mxu0 %v4747_v10  ;;  %v4749_v10 = vld [vmem:[%s6049_s25 + $0x8] sm:$0xff]  }
0x1be8   :  { %4468 = vmatprep.subr.bf16.mxu0 %v5098_v15 }
0x1bea   :  { %3275 = vadd.xlane.f32.xlu0 %v3274_v50 }
0x1bee   :  { %3257 = vadd.xlane.f32.xlu0 %v3256_v45 }
0x1c36   :  { %v5919_v51 = vpop.f32.mrb[72].mxu0 }
0x1c37   :  { %v4432_v52 = vpop.f32.mrb[73].mxu0 }
0x1c38   :  { %v5921_v48 = vpop.f32.mrb[74].mxu0 }
0x1c39   :  { %v4433_v0 = vpop.f32.mrb[75].mxu0 }
0x1c63   :  { %v3261_v56 = vpop.xlane.xlu1 %3260 }
0x1c64   :  { %4894 = vrcp.f32 %v3261_v56 }
0x1c6b   :  { %v3267_v54 = vpop.xlane.xlu0 %3266 }
0x1c6e   :  { %v4895_v61 = vpop.eup %4894 }
0x1c6f   :  { %v3264_v55 = vpop.xlane.xlu0 %3263  ;;  %v3273_v53 = vpop.xlane.xlu1 %3272 }
0x1c70   :  { %4896 = vrcp.f32 %v3264_v55 }
0x1c71   :  { %4898 = vrcp.f32 %v3267_v54 }
0x1c73   :  { %v3270_v59 = vpop.xlane.xlu0 %3269  ;;  %v3255_v13 = vpop.xlane.xlu1 %3254 }
0x1c74   :  { %4900 = vrcp.f32 %v3270_v59 }
0x1c75   :  { %4902 = vrcp.f32 %v3273_v53 }
0x1c77   :  { %v3276_v49 = vpop.xlane.xlu0 %3275 }
0x1c78   :  { %4904 = vrcp.f32 %v3276_v49 }
0x1c79   :  { %4906 = vrcp.f32 %v3255_v13 }
0x1c7a   :  { %v4897_v42 = vpop.eup %4896 }
0x1c7b   :  { %v4899_v18 = vpop.eup %4898  ;;  %v3258_v26 = vpop.xlane.xlu0 %3257 }
0x1c7c   :  { %4908 = vrcp.f32 %v3258_v26 }
0x1c7e   :  { %v4901_v17 = vpop.eup %4900 }
0x1c7f   :  { %v4903_v1 = vpop.eup %4902 }
0x1c82   :  { %v4905_v57 = vpop.eup %4904 }
0x1c83   :  { %v4907_v2 = vpop.eup %4906 }
0x1c84   :  { %v3481_v33 = vmul.f32 %v4907_v2, %v5919_v51  ;;  %v4040_v51 = vld [vmem:[%s6048_s21] ss:$0 sm:$0xff] }
0x1c85   :  { %v4046_v2 = vld [vmem:[#allocation2] ss:$0 sm:$0xff] }
0x1c86   :  { %v4909_v41 = vpop.eup %4908 }
0x1c87   :  { %v3482_v35 = vmul.f32 %v4909_v41, %v5921_v48 }
0x1cae   :  { %v3370_v60 = vpop.f32.mrb[84].mxu1 }
0x1caf   :  { %v4438_v62 = vpop.f32.mrb[85].mxu1  ;;  %v3483_v5 = vmul.f32 %v4895_v61, %v3370_v60 }
0x1cb0   :  { %v3373_v63 = vpop.f32.mrb[86].mxu1 }
0x1cb1   :  { %v3484_v58 = vmul.f32 %v4897_v42, %v3373_v63  ;;  %v4439_v7 = vpop.f32.mrb[87].mxu1 }
0x1cb3   :  { %v4707_v9 = vpack.i.bf16 %v3484_v58, %v3483_v5 }
0x1cb4   :  { %v3418_v11 = vpop.f32.mrb[76].mxu0 }
0x1cb5   :  { %v4444_v14 = vpop.f32.mrb[77].mxu0  ;;  %4708 = vrot.lane.b32.xlu1 %v4707_v9, %s5105_s20  ;;  %v3485_v20 = vmul.f32 %v4899_v18, %v3418_v11  ;;  %v4748_v9 = vld [vmem:[%s6049_s25] sm:$0xff]  }
0x1cb6   :  { %v3421_v3 = vpop.f32.mrb[78].mxu0  ;;  %4461 = vmatpush3.bf16.msra.mxu1 %v4748_v9 }
0x1cb7   :  { %v3486_v8 = vmul.f32 %v4901_v17, %v3421_v3  ;;  %v4445_v16 = vpop.f32.mrb[79].mxu0  ;;  %4462 = vmatprep.subr.bf16.mxu1 %v5098_v15 }
0x1cb8   :  { %v3466_v19 = vpop.f32.mrb[88].mxu1  ;;  %v4044_v16 = vld [vmem:[%s6050_s29] ss:$0 sm:$0xff] }
0x1cb9   :  { %v4712_v12 = vpack.i.bf16 %v3486_v8, %v3485_v20  ;;  %v4450_v21 = vpop.f32.mrb[89].mxu1  ;;  %v3487_v23 = vmul.f32 %v4903_v1, %v3466_v19 }
0x1cba   :  { %v3469_v22 = vpop.f32.mrb[90].mxu1  ;;  %4463 = vmatpush3.bf16.msra.mxu1 %v4749_v10 }
0x1cbb   :  { %v3488_v24 = vmul.f32 %v4905_v57, %v3469_v22  ;;  %4713 = vrot.lane.b32.xlu0 %v4712_v12, %s5106_s27  ;;  %v4451_v25 = vpop.f32.mrb[91].mxu1  ;;  %s6051_s27 = sld [smem:[#allocation41_spill]] }
0x1cbd   :  { %v4717_v38 = vpack.i.bf16 %v3488_v24, %v3487_v23 }
0x1cbf   :  { %4718 = vrot.lane.b32.xlu1 %v4717_v38, %s5107_s0  ;;  %s6052_s0 = sld [smem:[#allocation43_spill]] }
0x1cc1   :  { %v4045_v57 = vld [vmem:[%s6051_s27] ss:$0 sm:$0xff] }
0x1cc5   :  { %v4750_v38 = vld [vmem:[%s6052_s0] sm:$0xff]   ;;  %v4751_v13 = vld [vmem:[%s6052_s0 + $0x8] sm:$0xff]   ;;  %v4752_v26 = vld [vmem:[%s6052_s0 + $0x10] sm:$0xff]  }
0x1d27   :  { %v4709_v27 = vpop.permute.xlu1 %4708 }
0x1d28   :  { %v4711_v29 = vunpack.i.h.bf16 %v4709_v27  ;;  %v4710_v30 = vunpack.i.l.bf16 %v4709_v27  ;;  %v4753_v27 = vld [vmem:[%s6052_s0 + $0x18] sm:$0xff]  }
0x1d2a   :  { %v3514_v37 = vsel %vm414_vm2, %v3482_v35, %v4711_v29  ;;  %v3513_v39 = vsel %vm414_vm2, %v3481_v33, %v4710_v30 }
0x1d2d   :  { %v4714_v28 = vpop.permute.xlu0 %4713 }
0x1d2e   :  { %v4716_v32 = vunpack.i.h.bf16 %v4714_v28  ;;  %v4715_v31 = vunpack.i.l.bf16 %v4714_v28 }
0x1d30   :  { %v3515_v44 = vsel %vm612_vm3, %v3513_v39, %v4715_v31  ;;  %v3516_v46 = vsel %vm612_vm3, %v3514_v37, %v4716_v32 }
0x1d31   :  { %v4719_v36 = vpop.permute.xlu1 %4718 }
0x1d32   :  { %v4721_v40 = vunpack.i.h.bf16 %v4719_v36  ;;  %v4720_v43 = vunpack.i.l.bf16 %v4719_v36 }
0x1d34   :  { %v3518_v47 = vsel %vm921_vm4, %v3516_v46, %v4721_v40  ;;  %v3517_v50 = vsel %vm921_vm4, %v3515_v44, %v4720_v43 }
0x1d35   :  { %v3519_v45 = vpack.c.bf16 %v3518_v47, %v3517_v50 }
0x1d37   :  { %4457 = vmatmul.mubr.msk.bf16.vlgmr.msra.gmra.mrb[80].mxu0 %vm249_vm0, %v3519_v45 }
0x1d38   :  { %4476 = vmatprep.mubr.msk.bf16.mxu0 %vm5099_vm1, %v5098_v15  ;;  %4469 = vmatpush3.bf16.msra.mxu0 %v4750_v38  ;;  %v4050_v38 = vld [vmem:[#allocation5] ss:$0 sm:$0xff] }
0x1d39   :  { %4470 = vmatprep.subr.bf16.mxu0 %v5098_v15 }
0x1d3c   :  { %4471 = vmatpush3.bf16.msra.mxu0 %v4751_v13 }
0x1d3d   :  { %4472 = vmatprep.subr.bf16.mxu0 %v5098_v15 }
0x1d40   :  { %4473 = vmatpush3.bf16.msra.mxu0 %v4752_v26 }
0x1d41   :  { %4474 = vmatprep.subr.bf16.mxu0 %v5098_v15 }
0x1d44   :  { %4475 = vmatpush3.bf16.msra.mxu0 %v4753_v27 }
0x1e0a   :  { %v3580_v52 = vpop.f32.mrb[80].mxu0 }
0x1e0b   :  { %v3581_v48 = vadd.f32 %v4040_v51, %v3580_v52  ;;  %v4458_v0 = vpop.f32.mrb[81].mxu0 }
0x1e0c   :  { %v3583_v54 = vpop.f32.mrb[82].mxu0 }
0x1e0d   :  { %v5943_v55 = vadd.f32 %v3581_v48, %v5807_v4  ;;  %v3584_v56 = vadd.f32 %v4040_v51, %v3583_v54  ;;  %v4459_v59 = vpop.f32.mrb[83].mxu0 }
0x1e0f   :  { %v5946_v53 = vadd.f32 %v3584_v56, %v5810_v6  ;;  %v3591_v49 = vsel %vm249_vm0, %v5943_v55, 0.0 }
0x1e10   :  { %3592 = vadd.xlane.f32.xlu1 %v3591_v49 }
0x1e11   :  { %v3594_v60 = vsel %vm249_vm0, %v5946_v53, 0.0 }
0x1e12   :  { %3595 = vadd.xlane.f32.xlu0 %v3594_v60 }
0x1e9d   :  { %v3593_v61 = vpop.xlane.xlu1 %3592 }
0x1e9e   :  { %v3597_v62 = vmul.f32 0.03125, %v3593_v61 }
0x1e9f   :  { %v3596_v34 = vpop.xlane.xlu0 %3595 }
0x1ea0   :  { %v3599_v4 = vsub.f32 %v5943_v55, %v3597_v62  ;;  %v3598_v42 = vmul.f32 0.03125, %v3596_v34 }
0x1ea2   :  { %v3600_v63 = vsub.f32 %v5946_v53, %v3598_v42  ;;  %v3601_v6 = vmul.f32 %v3599_v4, %v3599_v4 }
0x1ea4   :  { %v3603_v5 = vsel %vm249_vm0, %v3601_v6, 0.0  ;;  %v3602_v58 = vmul.f32 %v3600_v63, %v3600_v63 }
0x1ea5   :  { %3604 = vadd.xlane.f32.xlu0 %v3603_v5 }
0x1ea6   :  { %v3606_v7 = vsel %vm249_vm0, %v3602_v58, 0.0 }
0x1ea7   :  { %3607 = vadd.xlane.f32.xlu1 %v3606_v7 }
0x1f32   :  { %v3605_v11 = vpop.xlane.xlu0 %3604 }
0x1f33   :  { %v3609_v18 = vmul.f32 0.03125, %v3605_v11 }
0x1f34   :  { %v3608_v14 = vpop.xlane.xlu1 %3607 }
0x1f35   :  { %v3611_v17 = vadd.f32 1e-05, %v3609_v18  ;;  %v3610_v3 = vmul.f32 0.03125, %v3608_v14 }
0x1f37   :  { %4910 = vrsqrt.f32 %v3611_v17  ;;  %v3612_v20 = vadd.f32 1e-05, %v3610_v3 }
0x1f39   :  { %4912 = vrsqrt.f32 %v3612_v20 }
0x1f41   :  { %v4911_v8 = vpop.eup %4910 }
0x1f42   :  { %v3615_v19 = vmul.f32 %v4911_v8, %v3599_v4 }
0x1f43   :  { %v4913_v1 = vpop.eup %4912 }
0x1f44   :  { %v3623_v12 = vmul.f32 %v4044_v16, %v3615_v19  ;;  %v3616_v21 = vmul.f32 %v4913_v1, %v3600_v63 }
0x1f46   :  { %v3624_v22 = vmul.f32 %v4044_v16, %v3616_v21  ;;  %v3631_v23 = vadd.f32 %v4045_v57, %v3623_v12 }
0x1f48   :  { %v3632_v24 = vadd.f32 %v4045_v57, %v3624_v22 }
0x1f4a   :  { %v3633_v25 = vpack.c.bf16 %v3632_v24, %v3631_v23 }
0x1f4c   :  { %4465 = vmatmul.mubr.msk.bf16.vlgmr.msra.gmra.mrb[92].mxu1 %vm249_vm0, %v3633_v25 }
0x201f   :  { %v3694_v41 = vpop.f32.mrb[92].mxu1 }
0x2020   :  { %v3695_v28 = vadd.f32 %v4046_v2, %v3694_v41  ;;  %v4466_v29 = vpop.f32.mrb[93].mxu1 }
0x2021   :  { %v3697_v30 = vpop.f32.mrb[94].mxu1 }
0x2022   :  { %v3703_v32 = vmul.f32 0.70710677, %v3695_v28  ;;  %v3698_v31 = vadd.f32 %v4046_v2, %v3697_v30  ;;  %v4467_v33 = vpop.f32.mrb[95].mxu1  ;;  %v3701_v21 = vmul.f32 0.5, %v3695_v28 }
0x2024   :  { %v3705_v35 = vand.u32 2147483647, %v3703_v32  ;;  %v3704_v36 = vmul.f32 0.70710677, %v3698_v31  ;;  %vm3745_vm8 = vcmp.ge.f32.partialorder %v3703_v32, 0.0  ;;  %v3702_v57 = vmul.f32 0.5, %v3698_v31 }
0x2026   :  { %v3707_v37 = vmul.f32 0.3275911, %v3705_v35  ;;  %v3706_v39 = vand.u32 2147483647, %v3704_v36  ;;  %v3733_v15 = vsub.f32 0.0, %v3705_v35  ;;  %vm3746_vm9 = vcmp.ge.f32.partialorder %v3704_v36, 0.0 }
0x2028   :  { %v3709_v40 = vadd.f32 1.0, %v3707_v37  ;;  %v3708_v43 = vmul.f32 0.3275911, %v3706_v39  ;;  %v3734_v46 = vsub.f32 0.0, %v3706_v39  ;;  %v3735_v50 = vmul.f32 %v3733_v15, %v3705_v35 }
0x202a   :  { %4914 = vrcp.f32 %v3709_v40  ;;  %v3710_v44 = vadd.f32 1.0, %v3708_v43  ;;  %v3736_v48 = vmul.f32 %v3734_v46, %v3706_v39  ;;  %v3737_v0 = vmul.f32 1.442695, %v3735_v50 }
0x202c   :  { %4916 = vrcp.f32 %v3710_v44  ;;  %v3739_v60 = vmul.f32 1.442695, %v3736_v48  ;;  %v4056_v48 = vld [vmem:[#allocation7] ss:$0 sm:$0xff] }
0x202d   :  { %4918 = vpow2.f32 %v3737_v0 }
0x202e   :  { %4920 = vpow2.f32 %v3739_v60 }
0x2034   :  { %v4915_v47 = vpop.eup %4914 }
0x2035   :  { %v3715_v45 = vmul.f32 1.0614054, %v4915_v47 }
0x2036   :  { %v4917_v51 = vpop.eup %4916 }
0x2037   :  { %v3717_v52 = vadd.f32 -1.4531521, %v3715_v45  ;;  %v3716_v54 = vmul.f32 1.0614054, %v4917_v51  ;;  %v4919_v9 = vpop.eup %4918 }
0x2038   :  { %v4921_v14 = vpop.eup %4920 }
0x2039   :  { %v3719_v56 = vmul.f32 %v4915_v47, %v3717_v52  ;;  %v3718_v59 = vadd.f32 -1.4531521, %v3716_v54 }
0x203b   :  { %v3721_v49 = vadd.f32 1.4214138, %v3719_v56  ;;  %v3720_v61 = vmul.f32 %v4917_v51, %v3718_v59  ;;  %v4057_v56 = vld [vmem:[#allocation8] ss:$0 sm:$0xff] }
0x203d   :  { %v3723_v62 = vmul.f32 %v4915_v47, %v3721_v49  ;;  %v3722_v34 = vadd.f32 1.4214138, %v3720_v61 }
0x203f   :  { %v3725_v4 = vadd.f32 -0.28449672, %v3723_v62  ;;  %v3724_v42 = vmul.f32 %v4917_v51, %v3722_v34 }
0x2041   :  { %v3727_v63 = vmul.f32 %v4915_v47, %v3725_v4  ;;  %v3726_v6 = vadd.f32 -0.28449672, %v3724_v42 }
0x2043   :  { %v3729_v5 = vadd.f32 0.2548296, %v3727_v63  ;;  %v3728_v58 = vmul.f32 %v4917_v51, %v3726_v6 }
0x2045   :  { %v3731_v7 = vmul.f32 %v4915_v47, %v3729_v5  ;;  %v3730_v10 = vadd.f32 0.2548296, %v3728_v58 }
0x2047   :  { %v3741_v11 = vmul.f32 %v4919_v9, %v3731_v7  ;;  %v3732_v18 = vmul.f32 %v4917_v51, %v3730_v10 }
0x2049   :  { %v3743_v17 = vsub.f32 1.0, %v3741_v11  ;;  %v3742_v3 = vmul.f32 %v4921_v14, %v3732_v18 }
0x204b   :  { %v3747_v20 = vsub.f32 0.0, %v3743_v17  ;;  %v3744_v8 = vsub.f32 1.0, %v3742_v3 }
0x204d   :  { %v3749_v16 = vsel %vm3745_vm8, %v3743_v17, %v3747_v20  ;;  %v3748_v19 = vsub.f32 0.0, %v3744_v8 }
0x204e   :  { %v3751_v1 = vadd.f32 1.0, %v3749_v16 }
0x204f   :  { %v3750_v12 = vsel %vm3746_vm9, %v3744_v8, %v3748_v19 }
0x2050   :  { %v3752_v22 = vadd.f32 1.0, %v3750_v12  ;;  %v3753_v23 = vmul.f32 %v3751_v1, %v3701_v21 }
0x2052   :  { %v3754_v24 = vmul.f32 %v3752_v22, %v3702_v57 }
0x2054   :  { %v3755_v25 = vpack.c.bf16 %v3754_v24, %v3753_v23 }
0x2056   :  { %4477 = vmatmul.mubr.msk.bf16.vlgmr.msra.gmra.mrb[84].mxu0 %vm2002_vm7, %v3755_v25 }
0x2129   :  { %v3832_v13 = vpop.f32.mrb[84].mxu0 }
0x212a   :  { %v3833_v26 = vadd.f32 %v4050_v38, %v3832_v13  ;;  %v4478_v27 = vpop.f32.mrb[85].mxu0 }
0x212b   :  { %v3835_v2 = vpop.f32.mrb[86].mxu0 }
0x212c   :  { %v3839_v41 = vadd.f32 %v3833_v26, %v5943_v55  ;;  %v3836_v29 = vadd.f32 %v4050_v38, %v3835_v2  ;;  %v4479_v30 = vpop.f32.mrb[87].mxu0 }
0x212e   :  { %v3840_v32 = vadd.f32 %v3836_v29, %v5946_v53  ;;  %v3843_v28 = vsel %vm249_vm0, %v3839_v41, 0.0 }
0x212f   :  { %3844 = vadd.xlane.f32.xlu0 %v3843_v28 }
0x2130   :  { %v3846_v31 = vsel %vm249_vm0, %v3840_v32, 0.0 }
0x2131   :  { %3847 = vadd.xlane.f32.xlu1 %v3846_v31 }
0x21bc   :  { %v3845_v33 = vpop.xlane.xlu0 %3844 }
0x21bd   :  { %v3849_v35 = vmul.f32 0.03125, %v3845_v33 }
0x21be   :  { %v3848_v36 = vpop.xlane.xlu1 %3847 }
0x21bf   :  { %v3851_v37 = vsub.f32 %v3839_v41, %v3849_v35  ;;  %v3850_v39 = vmul.f32 0.03125, %v3848_v36 }
0x21c1   :  { %v3852_v40 = vsub.f32 %v3840_v32, %v3850_v39  ;;  %v3853_v43 = vmul.f32 %v3851_v37, %v3851_v37 }
0x21c3   :  { %v3855_v44 = vsel %vm249_vm0, %v3853_v43, 0.0  ;;  %v3854_v55 = vmul.f32 %v3852_v40, %v3852_v40 }
0x21c4   :  { %3856 = vadd.xlane.f32.xlu0 %v3855_v44 }
0x21c5   :  { %v3858_v15 = vsel %vm249_vm0, %v3854_v55, 0.0 }
0x21c6   :  { %3859 = vadd.xlane.f32.xlu1 %v3858_v15 }
0x2251   :  { %v3857_v53 = vpop.xlane.xlu0 %3856 }
0x2252   :  { %v3861_v46 = vmul.f32 0.03125, %v3857_v53 }
0x2253   :  { %v3860_v47 = vpop.xlane.xlu1 %3859 }
0x2254   :  { %v3863_v50 = vadd.f32 1e-05, %v3861_v46  ;;  %v3862_v45 = vmul.f32 0.03125, %v3860_v47 }
0x2256   :  { %4922 = vrsqrt.f32 %v3863_v50  ;;  %v3864_v51 = vadd.f32 1e-05, %v3862_v45 }
0x2258   :  { %4924 = vrsqrt.f32 %v3864_v51 }
0x2260   :  { %v4923_v52 = vpop.eup %4922 }
0x2261   :  { %v3867_v0 = vmul.f32 %v4923_v52, %v3851_v37 }
0x2262   :  { %v4925_v54 = vpop.eup %4924 }
0x2263   :  { %v3875_v59 = vmul.f32 %v4056_v48, %v3867_v0  ;;  %v3868_v49 = vmul.f32 %v4925_v54, %v3852_v40 }
0x2265   :  { %v3876_v60 = vmul.f32 %v4056_v48, %v3868_v49  ;;  %v3883_v61 = vadd.f32 %v4057_v56, %v3875_v59 }
0x2267   :  { %v3884_v62 = vadd.f32 %v4057_v56, %v3876_v60  ;;  %3885 = vst.msk [vmem:[#allocation10] sm:$0xff] %vm249_vm0, %v3883_v61 }
0x2269   :  { %3886 = vst.msk [vmem:[#allocation10 + $0x8] sm:$0xff] %vm249_vm0, %v3884_v62 }
0x226a   :  { %5029 = shalt.err (!%p5026_p8)
}
0x226b   :  { %s5030_s19 = scalar_lea.hbm %s5348_s17, 256 }
0x226c   :  { %p5031_p9 = scmp.ne.s32.totalorder %s5348_s17, %s5030_s19  ;;  %p5034_p10 = scmp.lt.u32.totalorder %s5030_s19, %s5348_s17 }
0x226e   :  { %p5036_p11 = pnand %p5034_p10, %p5031_p9 }
0x2270   :  { %5039 = shalt.err (!%p5036_p11)
}
0x2271   :  { %s5109_s24 = smov 128  }
0x2272   :  { %3898 = dma.vmem_to_hbm [thread:$0]  %s3893_s8, 256, %s5348_s17, [#allocation4], %s5109_s24, %s5109_s24, %s5105_s20  }
0x2273   :  { %5046 = dma.done.wait [#allocation4], 256  }
0x2274   :  { %5047 = vsyncadd [#allocation4], 4294967040 }
0x2275   :  { %3902 = vsyncpa [#allocation3], 1 }
0x2276   :  { %3903 = vsyncpa [#allocation6], 1 }
0x2277   :  { %3904 = vsyncpa [#allocation9], 1 }
0x2278   :  { %3905 = vsyncpa [#allocation4], 1 }

</bundles_post_ra>
